<compile_context>
chip_gen: v5e
topology: v5e:2x2
jax: 0.10.0
libtpu: 0.0.40
codegen_flags: <defaults>
</compile_context>

<pallas_src>
import jax
import jax.numpy as jnp
from jax import lax
from jax.experimental import pallas as pl
from jax.experimental.pallas import tpu as pltpu


# ------------------------------ Pallas kernel ------------------------------ #

def up_doubleconv_kernel(x1_ref, x2_ref, up_ref, w1_ref, b1_ref, w2_ref, b2_ref,
                         o_ref, p1_ref, p2_ref):
    # x1_ref: (1, H1, W1, C1)      low-res input (to be upsampled)
    # x2_ref: (1, H2, W2, C2)      skip connection
    # up_ref: (H2*W2, H1*W1)       fused bilinear-upsample + zero-pad matrix
    # w1_ref: (9*(C1+C2), Cout)    conv1 weights, BN1 scale folded in
    # b1_ref: (1, Cout)            conv1 folded bias
    # w2_ref: (9*Cout, Cout)       conv2 weights, BN2 scale folded in
    # b2_ref: (1, Cout)            conv2 folded bias
    # o_ref : (1, H2, W2, Cout)
    # p1_ref: VMEM (H2+2, W2+2, C1+C2)  zero-padded conv1 input scratch
    # p2_ref: VMEM (H2+2, W2+2, Cout)   zero-padded conv2 input scratch
    H1, W1, C1 = x1_ref.shape[1], x1_ref.shape[2], x1_ref.shape[3]
    H2, W2, C2 = x2_ref.shape[1], x2_ref.shape[2], x2_ref.shape[3]
    Cout = o_ref.shape[3]
    C = C1 + C2

    # -- bilinear upsample (align_corners=True) fused with the x2-alignment
    #    zero-pad: a single MXU matmul on the flattened image.
    x1_flat = x1_ref[0].reshape(H1 * W1, C1)
    up = jnp.dot(up_ref[...], x1_flat,
                 preferred_element_type=jnp.float32)               # (H2*W2, C1)

    # -- channel concat [x2, upsample(x1)], written once into the zero-padded
    #    conv1 input scratch (1-pixel halo handled in VMEM, not in HBM).
    p1_ref[...] = jnp.zeros_like(p1_ref)
    p1_ref[1:H2 + 1, 1:W2 + 1, :] = jnp.concatenate(
        [x2_ref[0], up.reshape(H2, W2, C1)], axis=-1)

    def conv3x3_bias_relu(pad_ref, w_ref, b_ref, cin):
        # One im2col matmul (K = 9*cin) instead of 9 tiny K=cin matmuls.
        xp = pad_ref[...]                                          # (H+2, W+2, cin)
        patches = jnp.concatenate(
            [xp[dy:dy + H2, dx:dx + W2, :]
             for dy in range(3) for dx in range(3)], axis=-1)      # (H2, W2, 9*cin)
        patches = patches.reshape(H2 * W2, 9 * cin)
        y = jnp.dot(patches, w_ref[...],
                    preferred_element_type=jnp.float32)            # (H2*W2, Cout)
        return jnp.maximum(y + b_ref[...], 0.0)                    # folded BN + ReLU

    # -- conv1 + BN + ReLU (BN scale pre-folded into w1 / b1)
    h = conv3x3_bias_relu(p1_ref, w1_ref, b1_ref, C)

    # -- conv2 + BN + ReLU; the intermediate activation never leaves VMEM.
    p2_ref[...] = jnp.zeros_like(p2_ref)
    p2_ref[1:H2 + 1, 1:W2 + 1, :] = h.reshape(H2, W2, Cout)
    y = conv3x3_bias_relu(p2_ref, w2_ref, b2_ref, Cout)

    o_ref[0] = y.reshape(H2, W2, Cout).astype(o_ref.dtype)


# --------------------- Parameter / upsample-matrix prep -------------------- #

def _interp_matrix(n_out, n_in):
    # PyTorch bilinear, align_corners=True: src = i * (n_in - 1) / (n_out - 1).
    if n_in == 1:
        return jnp.ones((n_out, 1), jnp.float32)
    src = jnp.arange(n_out, dtype=jnp.float32) * (n_in - 1) / (n_out - 1)
    i0 = jnp.clip(jnp.floor(src).astype(jnp.int32), 0, n_in - 2)
    frac = src - i0.astype(jnp.float32)
    rows = jnp.arange(n_out)
    m = jnp.zeros((n_out, n_in), jnp.float32)
    m = m.at[rows, i0].add(1.0 - frac)
    m = m.at[rows, i0 + 1].add(frac)
    return m


def _upsample_pad_matrix(h_in, w_in, h_out, w_out):
    # Combined (bilinear x2, align_corners=True) + F.pad placement as one
    # (h_out*w_out, h_in*w_in) matrix acting on the flattened (H*W, C) image.
    ry = _interp_matrix(2 * h_in, h_in)            # (2*h_in, h_in)
    rx = _interp_matrix(2 * w_in, w_in)            # (2*w_in, w_in)
    pad_y, pad_x = h_out - 2 * h_in, w_out - 2 * w_in
    ry = jnp.pad(ry, ((pad_y // 2, pad_y - pad_y // 2), (0, 0)))
    rx = jnp.pad(rx, ((pad_x // 2, pad_x - pad_x // 2), (0, 0)))
    return jnp.kron(ry, rx)                        # (h_out*w_out, h_in*w_in)


def prepare_up_params(p, x1_shape, x2_shape, eps=1e-5):
    """Fold eval-mode BN into conv weights/bias and pre-build the upsample
    matrix.  Hoisted out of the forward so it is done once."""
    def fold(w_pt, cb, g, be, m, v):
        cout = w_pt.shape[0]
        scale = g / jnp.sqrt(v + eps)
        # (Cout, Cin, 3, 3) -> (9*Cin, Cout), taps (dy, dx) row-major.
        w = jnp.transpose(w_pt, (2, 3, 1, 0)).reshape(-1, cout) * scale[None, :]
        b = (cb - m) * scale + be
        return w.astype(jnp.float32), b.reshape(1, cout).astype(jnp.float32)

    w1, b1 = fold(p["w1"], p["cb1"], p["g1"], p["be1"], p["m1"], p["v1"])
    w2, b2 = fold(p["w2"], p["cb2"], p["g2"], p["be2"], p["m2"], p["v2"])
    up_mat = _upsample_pad_matrix(x1_shape[2], x1_shape[3],
                                  x2_shape[2], x2_shape[3])
    return dict(w1=w1, b1=b1, w2=w2, b2=b2, up_mat=up_mat)


# --------------------------------- Wrapper --------------------------------- #

@jax.jit
def up_forward(x1_nchw, x2_nchw, prep):
    """Pallas implementation of Up.forward (NCHW in, NCHW out)."""
    x1 = jnp.transpose(x1_nchw, (0, 2, 3, 1)).astype(jnp.float32)   # NHWC
    x2 = jnp.transpose(x2_nchw, (0, 2, 3, 1)).astype(jnp.float32)
    B, H1, W1, C1 = x1.shape
    _, H2, W2, C2 = x2.shape
    C = C1 + C2
    Cout = prep["w2"].shape[-1]

    out = pl.pallas_call(
        up_doubleconv_kernel,
        out_shape=jax.ShapeDtypeStruct((B, H2, W2, Cout), jnp.float32),
        grid=(B,),
        in_specs=[
            pl.BlockSpec((1, H1, W1, C1), lambda b: (b, 0, 0, 0)),
            pl.BlockSpec((1, H2, W2, C2), lambda b: (b, 0, 0, 0)),
            pl.BlockSpec((H2 * W2, H1 * W1), lambda b: (0, 0)),
            pl.BlockSpec((9 * C, Cout), lambda b: (0, 0)),
            pl.BlockSpec((1, Cout), lambda b: (0, 0)),
            pl.BlockSpec((9 * Cout, Cout), lambda b: (0, 0)),
            pl.BlockSpec((1, Cout), lambda b: (0, 0)),
        ],
        out_specs=pl.BlockSpec((1, H2, W2, Cout), lambda b: (b, 0, 0, 0)),
        scratch_shapes=[
            pltpu.VMEM((H2 + 2, W2 + 2, C), jnp.float32),
            pltpu.VMEM((H2 + 2, W2 + 2, Cout), jnp.float32),
        ],
        compiler_params=pltpu.CompilerParams(
            dimension_semantics=("parallel",)),
    )(x1, x2, prep["up_mat"], prep["w1"], prep["b1"], prep["w2"], prep["b2"])

    return jnp.transpose(out, (0, 3, 1, 2))                         # NCHW


# ----------------------------- Parameter init ------------------------------ #

def init_params(key, in_channels, out_channels):
    ks = jax.random.split(key, 12)
    f32 = jnp.float32

    def conv_w(k, cin, cout):
        return jax.random.normal(k, (cout, cin, 3, 3), f32) / jnp.sqrt(cin * 9.0)

    return dict(
        w1=conv_w(ks[0], in_channels, out_channels),
        cb1=0.1 * jax.random.normal(ks[1], (out_channels,), f32),
        g1=1.0 + 0.1 * jax.random.normal(ks[2], (out_channels,), f32),
        be1=0.1 * jax.random.normal(ks[3], (out_channels,), f32),
        m1=0.1 * jax.random.normal(ks[4], (out_channels,), f32),
        v1=jnp.abs(jax.random.normal(ks[5], (out_channels,), f32)) + 0.5,
        w2=conv_w(ks[6], out_channels, out_channels),
        cb2=0.1 * jax.random.normal(ks[7], (out_channels,), f32),
        g2=1.0 + 0.1 * jax.random.normal(ks[8], (out_channels,), f32),
        be2=0.1 * jax.random.normal(ks[9], (out_channels,), f32),
        m2=0.1 * jax.random.normal(ks[10], (out_channels,), f32),
        v2=jnp.abs(jax.random.normal(ks[11], (out_channels,), f32)) + 0.5,
    )


# -------------------------------- Reference -------------------------------- #

def _bilinear_up2_align_corners(x_nhwc):
    B, H, W, C = x_nhwc.shape

    def interp(x, axis, n_in):
        n_out = 2 * n_in
        if n_in == 1:
            return jnp.repeat(x, 2, axis=axis)
        src = jnp.arange(n_out, dtype=jnp.float32) * (n_in - 1) / (n_out - 1)
        i0 = jnp.clip(jnp.floor(src).astype(jnp.int32), 0, n_in - 2)
        frac = src - i0.astype(jnp.float32)
        x0 = jnp.take(x, i0, axis=axis)
        x1 = jnp.take(x, i0 + 1, axis=axis)
        shape = [1] * x.ndim
        shape[axis] = n_out
        frac = frac.reshape(shape)
        return x0 * (1.0 - frac) + x1 * frac

    x = interp(x_nhwc, 1, H)
    x = interp(x, 2, W)
    return x


def up_reference(x1_nchw, x2_nchw, p, eps=1e-5):
    x1 = jnp.transpose(x1_nchw, (0, 2, 3, 1))
    x2 = jnp.transpose(x2_nchw, (0, 2, 3, 1))
    x1 = _bilinear_up2_align_corners(x1)
    pad_y = x2.shape[1] - x1.shape[1]
    pad_x = x2.shape[2] - x1.shape[2]
    x1 = jnp.pad(x1, ((0, 0),
                      (pad_y // 2, pad_y - pad_y // 2),
                      (pad_x // 2, pad_x - pad_x // 2),
                      (0, 0)))
    x = jnp.concatenate([x2, x1], axis=-1)

    def block(x, w_pt, cb, g, be, m, v):
        w = jnp.transpose(w_pt, (2, 3, 1, 0))                      # HWIO
        y = lax.conv_general_dilated(
            x, w, (1, 1), ((1, 1), (1, 1)),
            dimension_numbers=("NHWC", "HWIO", "NHWC")) + cb
        y = (y - m) / jnp.sqrt(v + eps) * g + be
        return jnp.maximum(y, 0.0)

    x = block(x, p["w1"], p["cb1"], p["g1"], p["be1"], p["m1"], p["v1"])
    x = block(x, p["w2"], p["cb2"], p["g2"], p["be2"], p["m2"], p["v2"])
    return jnp.transpose(x, (0, 3, 1, 2))


# ----------------------------------- Main ----------------------------------- #

if __name__ == "__main__":
    key = jax.random.PRNGKey(0)
    k1, k2, kp = jax.random.split(key, 3)

    B = 2
    C1, H1, W1 = 4, 8, 8          # x1: low-resolution decoder feature
    C2, H2, W2 = 4, 16, 16        # x2: skip connection
    C_in = C1 + C2                # DoubleConv in_channels (after concat)
    C_out = 8

    x1 = jax.random.normal(k1, (B, C1, H1, W1), jnp.float32)       # NCHW
    x2 = jax.random.normal(k2, (B, C2, H2, W2), jnp.float32)       # NCHW
    params = init_params(kp, C_in, C_out)
    prep = prepare_up_params(params, x1.shape, x2.shape)

    out = jax.block_until_ready(up_forward(x1, x2, prep))
    ref = jax.block_until_ready(up_reference(x1, x2, params))

    assert out.shape == (B, C_out, H2, W2), out.shape
    max_err = float(jnp.max(jnp.abs(out - ref)))
    assert jnp.allclose(out, ref, atol=2e-2, rtol=2e-2), max_err

    print("KERNEL_OK")
</pallas_src>

<mosaic_0001>
module attributes {stable_mosaic.version = 11 : i64} {
  func.func @up_doubleconv_kernel(%arg0: i32, %arg1: memref<1x8x8x4xf32, #tpu.memory_space<vmem>>, %arg2: memref<1x16x16x4xf32, #tpu.memory_space<vmem>>, %arg3: memref<256x64xf32, #tpu.memory_space<vmem>>, %arg4: memref<72x8xf32, #tpu.memory_space<vmem>>, %arg5: memref<1x8xf32, #tpu.memory_space<vmem>>, %arg6: memref<72x8xf32, #tpu.memory_space<vmem>>, %arg7: memref<1x8xf32, #tpu.memory_space<vmem>>, %arg8: memref<1x16x16x8xf32, #tpu.memory_space<vmem>>, %arg9: memref<18x18x8xf32, #tpu.memory_space<vmem>>, %arg10: memref<18x18x8xf32, #tpu.memory_space<vmem>>) attributes {dimension_semantics = [#tpu.dimension_semantics<parallel>], iteration_bounds = array<i64: 2>, scalar_prefetch = 0 : i64, scratch_operands = 2 : i64, tpu.core_type = #tpu.core_type<tc>, window_params = [{transform_indices = @transform_0, window_bounds = array<i64: 1, 8, 8, 4>}, {transform_indices = @transform_1, window_bounds = array<i64: 1, 16, 16, 4>}, {pipeline_mode = #tpu.pipeline_mode<synchronous>, transform_indices = @transform_2, window_bounds = array<i64: 256, 64>}, {pipeline_mode = #tpu.pipeline_mode<synchronous>, transform_indices = @transform_3, window_bounds = array<i64: 72, 8>}, {pipeline_mode = #tpu.pipeline_mode<synchronous>, transform_indices = @transform_4, window_bounds = array<i64: 1, 8>}, {pipeline_mode = #tpu.pipeline_mode<synchronous>, transform_indices = @transform_5, window_bounds = array<i64: 72, 8>}, {pipeline_mode = #tpu.pipeline_mode<synchronous>, transform_indices = @transform_6, window_bounds = array<i64: 1, 8>}, {transform_indices = @transform_7, window_bounds = array<i64: 1, 16, 16, 8>}]} {
    %c0 = arith.constant 0 : index
    %c0_0 = arith.constant 0 : index
    %c0_1 = arith.constant 0 : index
    %c0_2 = arith.constant 0 : index
    %0 = vector.load %arg1[%c0, %c0_0, %c0_1, %c0_2] : memref<1x8x8x4xf32, #tpu.memory_space<vmem>>, vector<1x8x8x4xf32>
    %1 = vector.shape_cast %0 : vector<1x8x8x4xf32> to vector<8x8x4xf32>
    %2 = vector.shape_cast %1 : vector<8x8x4xf32> to vector<64x4xf32>
    %c0_3 = arith.constant 0 : index
    %c0_4 = arith.constant 0 : index
    %3 = vector.load %arg3[%c0_3, %c0_4] : memref<256x64xf32, #tpu.memory_space<vmem>>, vector<256x64xf32>
    %cst = arith.constant dense<0.000000e+00> : vector<256x4xf32>
    %4 = tpu.matmul %3, %2, %cst {dimension_numbers = #tpu.dot_dimension_numbers<[1], [0], [0], [1], [0, 0, 1, 1], [], []>} : vector<256x64xf32>, vector<64x4xf32>, vector<256x4xf32> -> vector<256x4xf32>
    %cst_5 = arith.constant 0.000000e+00 : f32
    %5 = vector.broadcast %cst_5 : f32 to vector<18x18x8xf32>
    %c0_6 = arith.constant 0 : index
    %c0_7 = arith.constant 0 : index
    %c0_8 = arith.constant 0 : index
    %6 = vector.load %arg9[%c0_6, %c0_7, %c0_8] : memref<18x18x8xf32, #tpu.memory_space<vmem>>, vector<18x18x8xf32>
    tpu.vector_store %arg9[%c0_6, %c0_7, %c0_8], %5 {strides = array<i32>} : memref<18x18x8xf32, #tpu.memory_space<vmem>>, vector<18x18x8xf32>,
    %c0_9 = arith.constant 0 : index
    %c0_10 = arith.constant 0 : index
    %c0_11 = arith.constant 0 : index
    %c0_12 = arith.constant 0 : index
    %7 = vector.load %arg2[%c0_9, %c0_10, %c0_11, %c0_12] : memref<1x16x16x4xf32, #tpu.memory_space<vmem>>, vector<1x16x16x4xf32>
    %8 = vector.shape_cast %7 : vector<1x16x16x4xf32> to vector<16x16x4xf32>
    %9 = vector.shape_cast %4 : vector<256x4xf32> to vector<16x16x4xf32>
    %10 = tpu.concatenate %8, %9 in 2 : vector<16x16x4xf32>, vector<16x16x4xf32> -> vector<16x16x8xf32>
    %c1 = arith.constant 1 : index
    %c1_13 = arith.constant 1 : index
    %c0_14 = arith.constant 0 : index
    %11 = vector.load %arg9[%c1, %c1_13, %c0_14] : memref<18x18x8xf32, #tpu.memory_space<vmem>>, vector<16x16x8xf32>
    tpu.vector_store %arg9[%c1, %c1_13, %c0_14], %10 {strides = array<i32>} : memref<18x18x8xf32, #tpu.memory_space<vmem>>, vector<16x16x8xf32>,
    %c0_15 = arith.constant 0 : index
    %c0_16 = arith.constant 0 : index
    %c0_17 = arith.constant 0 : index
    %12 = vector.load %arg9[%c0_15, %c0_16, %c0_17] : memref<18x18x8xf32, #tpu.memory_space<vmem>>, vector<18x18x8xf32>
    %13 = vector.extract_strided_slice %12 {offsets = [0, 0, 0], sizes = [16, 16, 8], strides = [1, 1, 1]} : vector<18x18x8xf32> to vector<16x16x8xf32>
    %14 = vector.extract_strided_slice %12 {offsets = [0, 1, 0], sizes = [16, 16, 8], strides = [1, 1, 1]} : vector<18x18x8xf32> to vector<16x16x8xf32>
    %15 = vector.extract_strided_slice %12 {offsets = [0, 2, 0], sizes = [16, 16, 8], strides = [1, 1, 1]} : vector<18x18x8xf32> to vector<16x16x8xf32>
    %16 = vector.extract_strided_slice %12 {offsets = [1, 0, 0], sizes = [16, 16, 8], strides = [1, 1, 1]} : vector<18x18x8xf32> to vector<16x16x8xf32>
    %17 = vector.extract_strided_slice %12 {offsets = [1, 1, 0], sizes = [16, 16, 8], strides = [1, 1, 1]} : vector<18x18x8xf32> to vector<16x16x8xf32>
    %18 = vector.extract_strided_slice %12 {offsets = [1, 2, 0], sizes = [16, 16, 8], strides = [1, 1, 1]} : vector<18x18x8xf32> to vector<16x16x8xf32>
    %19 = vector.extract_strided_slice %12 {offsets = [2, 0, 0], sizes = [16, 16, 8], strides = [1, 1, 1]} : vector<18x18x8xf32> to vector<16x16x8xf32>
    %20 = vector.extract_strided_slice %12 {offsets = [2, 1, 0], sizes = [16, 16, 8], strides = [1, 1, 1]} : vector<18x18x8xf32> to vector<16x16x8xf32>
    %21 = vector.extract_strided_slice %12 {offsets = [2, 2, 0], sizes = [16, 16, 8], strides = [1, 1, 1]} : vector<18x18x8xf32> to vector<16x16x8xf32>
    %22 = tpu.concatenate %13, %14, %15, %16, %17, %18, %19, %20, %21 in 2 : vector<16x16x8xf32>, vector<16x16x8xf32>, vector<16x16x8xf32>, vector<16x16x8xf32>, vector<16x16x8xf32>, vector<16x16x8xf32>, vector<16x16x8xf32>, vector<16x16x8xf32>, vector<16x16x8xf32> -> vector<16x16x72xf32>
    %23 = vector.shape_cast %22 : vector<16x16x72xf32> to vector<256x72xf32>
    %c0_18 = arith.constant 0 : index
    %c0_19 = arith.constant 0 : index
    %24 = vector.load %arg4[%c0_18, %c0_19] : memref<72x8xf32, #tpu.memory_space<vmem>>, vector<72x8xf32>
    %cst_20 = arith.constant dense<0.000000e+00> : vector<256x8xf32>
    %25 = tpu.matmul %23, %24, %cst_20 {dimension_numbers = #tpu.dot_dimension_numbers<[1], [0], [0], [1], [0, 0, 1, 1], [], []>} : vector<256x72xf32>, vector<72x8xf32>, vector<256x8xf32> -> vector<256x8xf32>
    %c0_21 = arith.constant 0 : index
    %c0_22 = arith.constant 0 : index
    %26 = vector.load %arg5[%c0_21, %c0_22] : memref<1x8xf32, #tpu.memory_space<vmem>>, vector<1x8xf32>
    %27 = vector.broadcast %26 : vector<1x8xf32> to vector<256x8xf32>
    %28 = arith.addf %25, %27 : vector<256x8xf32>
    %cst_23 = arith.constant 0.000000e+00 : f32
    %29 = vector.broadcast %cst_23 : f32 to vector<256x8xf32>
    %30 = arith.maximumf %28, %29 : vector<256x8xf32>
    %cst_24 = arith.constant 0.000000e+00 : f32
    %31 = vector.broadcast %cst_24 : f32 to vector<18x18x8xf32>
    %c0_25 = arith.constant 0 : index
    %c0_26 = arith.constant 0 : index
    %c0_27 = arith.constant 0 : index
    %32 = vector.load %arg10[%c0_25, %c0_26, %c0_27] : memref<18x18x8xf32, #tpu.memory_space<vmem>>, vector<18x18x8xf32>
    tpu.vector_store %arg10[%c0_25, %c0_26, %c0_27], %31 {strides = array<i32>} : memref<18x18x8xf32, #tpu.memory_space<vmem>>, vector<18x18x8xf32>,
    %33 = vector.shape_cast %30 : vector<256x8xf32> to vector<16x16x8xf32>
    %c1_28 = arith.constant 1 : index
    %c1_29 = arith.constant 1 : index
    %c0_30 = arith.constant 0 : index
    %34 = vector.load %arg10[%c1_28, %c1_29, %c0_30] : memref<18x18x8xf32, #tpu.memory_space<vmem>>, vector<16x16x8xf32>
    tpu.vector_store %arg10[%c1_28, %c1_29, %c0_30], %33 {strides = array<i32>} : memref<18x18x8xf32, #tpu.memory_space<vmem>>, vector<16x16x8xf32>,
    %c0_31 = arith.constant 0 : index
    %c0_32 = arith.constant 0 : index
    %c0_33 = arith.constant 0 : index
    %35 = vector.load %arg10[%c0_31, %c0_32, %c0_33] : memref<18x18x8xf32, #tpu.memory_space<vmem>>, vector<18x18x8xf32>
    %36 = vector.extract_strided_slice %35 {offsets = [0, 0, 0], sizes = [16, 16, 8], strides = [1, 1, 1]} : vector<18x18x8xf32> to vector<16x16x8xf32>
    %37 = vector.extract_strided_slice %35 {offsets = [0, 1, 0], sizes = [16, 16, 8], strides = [1, 1, 1]} : vector<18x18x8xf32> to vector<16x16x8xf32>
    %38 = vector.extract_strided_slice %35 {offsets = [0, 2, 0], sizes = [16, 16, 8], strides = [1, 1, 1]} : vector<18x18x8xf32> to vector<16x16x8xf32>
    %39 = vector.extract_strided_slice %35 {offsets = [1, 0, 0], sizes = [16, 16, 8], strides = [1, 1, 1]} : vector<18x18x8xf32> to vector<16x16x8xf32>
    %40 = vector.extract_strided_slice %35 {offsets = [1, 1, 0], sizes = [16, 16, 8], strides = [1, 1, 1]} : vector<18x18x8xf32> to vector<16x16x8xf32>
    %41 = vector.extract_strided_slice %35 {offsets = [1, 2, 0], sizes = [16, 16, 8], strides = [1, 1, 1]} : vector<18x18x8xf32> to vector<16x16x8xf32>
    %42 = vector.extract_strided_slice %35 {offsets = [2, 0, 0], sizes = [16, 16, 8], strides = [1, 1, 1]} : vector<18x18x8xf32> to vector<16x16x8xf32>
    %43 = vector.extract_strided_slice %35 {offsets = [2, 1, 0], sizes = [16, 16, 8], strides = [1, 1, 1]} : vector<18x18x8xf32> to vector<16x16x8xf32>
    %44 = vector.extract_strided_slice %35 {offsets = [2, 2, 0], sizes = [16, 16, 8], strides = [1, 1, 1]} : vector<18x18x8xf32> to vector<16x16x8xf32>
    %45 = tpu.concatenate %36, %37, %38, %39, %40, %41, %42, %43, %44 in 2 : vector<16x16x8xf32>, vector<16x16x8xf32>, vector<16x16x8xf32>, vector<16x16x8xf32>, vector<16x16x8xf32>, vector<16x16x8xf32>, vector<16x16x8xf32>, vector<16x16x8xf32>, vector<16x16x8xf32> -> vector<16x16x72xf32>
    %46 = vector.shape_cast %45 : vector<16x16x72xf32> to vector<256x72xf32>
    %c0_34 = arith.constant 0 : index
    %c0_35 = arith.constant 0 : index
    %47 = vector.load %arg6[%c0_34, %c0_35] : memref<72x8xf32, #tpu.memory_space<vmem>>, vector<72x8xf32>
    %cst_36 = arith.constant dense<0.000000e+00> : vector<256x8xf32>
    %48 = tpu.matmul %46, %47, %cst_36 {dimension_numbers = #tpu.dot_dimension_numbers<[1], [0], [0], [1], [0, 0, 1, 1], [], []>} : vector<256x72xf32>, vector<72x8xf32>, vector<256x8xf32> -> vector<256x8xf32>
    %c0_37 = arith.constant 0 : index
    %c0_38 = arith.constant 0 : index
    %49 = vector.load %arg7[%c0_37, %c0_38] : memref<1x8xf32, #tpu.memory_space<vmem>>, vector<1x8xf32>
    %50 = vector.broadcast %49 : vector<1x8xf32> to vector<256x8xf32>
    %51 = arith.addf %48, %50 : vector<256x8xf32>
    %cst_39 = arith.constant 0.000000e+00 : f32
    %52 = vector.broadcast %cst_39 : f32 to vector<256x8xf32>
    %53 = arith.maximumf %51, %52 : vector<256x8xf32>
    %54 = vector.shape_cast %53 : vector<256x8xf32> to vector<16x16x8xf32>
    %c0_40 = arith.constant 0 : index
    %c0_41 = arith.constant 0 : index
    %c0_42 = arith.constant 0 : index
    %c0_43 = arith.constant 0 : index
    %55 = vector.load %arg8[%c0_40, %c0_41, %c0_42, %c0_43] : memref<1x16x16x8xf32, #tpu.memory_space<vmem>>, vector<1x16x16x8xf32>
    %56 = vector.shape_cast %55 : vector<1x16x16x8xf32> to vector<16x16x8xf32>
    %57 = vector.shape_cast %54 : vector<16x16x8xf32> to vector<1x16x16x8xf32>
    tpu.vector_store %arg8[%c0_40, %c0_41, %c0_42, %c0_43], %57 {strides = array<i32>} : memref<1x16x16x8xf32, #tpu.memory_space<vmem>>, vector<1x16x16x8xf32>,
    return
  }
  func.func @transform_0(%arg0: i32) -> (i32, i32, i32, i32) {
    %c0_i32 = arith.constant 0 : i32
    %c0_i32_0 = arith.constant 0 : i32
    %c0_i32_1 = arith.constant 0 : i32
    %c0_i32_2 = arith.constant 0 : i32
    return %arg0, %c0_i32, %c0_i32_0, %c0_i32_1 : i32, i32, i32, i32
  }
  func.func @transform_1(%arg0: i32) -> (i32, i32, i32, i32) {
    %c0_i32 = arith.constant 0 : i32
    %c0_i32_0 = arith.constant 0 : i32
    %c0_i32_1 = arith.constant 0 : i32
    %c0_i32_2 = arith.constant 0 : i32
    return %arg0, %c0_i32, %c0_i32_0, %c0_i32_1 : i32, i32, i32, i32
  }
  func.func @transform_2(%arg0: i32) -> (i32, i32) {
    %c0_i32 = arith.constant 0 : i32
    %c0_i32_0 = arith.constant 0 : i32
    %c0_i32_1 = arith.constant 0 : i32
    return %c0_i32, %c0_i32_0 : i32, i32
  }
  func.func @transform_3(%arg0: i32) -> (i32, i32) {
    %c0_i32 = arith.constant 0 : i32
    %c0_i32_0 = arith.constant 0 : i32
    %c0_i32_1 = arith.constant 0 : i32
    return %c0_i32, %c0_i32_0 : i32, i32
  }
  func.func @transform_4(%arg0: i32) -> (i32, i32) {
    %c0_i32 = arith.constant 0 : i32
    %c0_i32_0 = arith.constant 0 : i32
    %c0_i32_1 = arith.constant 0 : i32
    return %c0_i32, %c0_i32_0 : i32, i32
  }
  func.func @transform_5(%arg0: i32) -> (i32, i32) {
    %c0_i32 = arith.constant 0 : i32
    %c0_i32_0 = arith.constant 0 : i32
    %c0_i32_1 = arith.constant 0 : i32
    return %c0_i32, %c0_i32_0 : i32, i32
  }
  func.func @transform_6(%arg0: i32) -> (i32, i32) {
    %c0_i32 = arith.constant 0 : i32
    %c0_i32_0 = arith.constant 0 : i32
    %c0_i32_1 = arith.constant 0 : i32
    return %c0_i32, %c0_i32_0 : i32, i32
  }
  func.func @transform_7(%arg0: i32) -> (i32, i32, i32, i32) {
    %c0_i32 = arith.constant 0 : i32
    %c0_i32_0 = arith.constant 0 : i32
    %c0_i32_1 = arith.constant 0 : i32
    %c0_i32_2 = arith.constant 0 : i32
    return %arg0, %c0_i32, %c0_i32_0, %c0_i32_1 : i32, i32, i32, i32
  }
}

</mosaic_0001>

<bundles_post_ra>
// kernel: up_forward.1
= control target key start
LH: loop header
LB: loop body
LE: loop exit
PB: predicated region body
PF: predicated region fallthrough
CT: control target
= control target key end

     0   :  { %s4434_s24 = smov 0   ;;  %s8726_s0 = inlined_call_operand.vmem [shape: f32[2,8,8,4], index: 0, kind: input, shape index: {}]   ;;  %s8727_s1 = inlined_call_operand.vmem [shape: f32[2,16,16,4], index: 1, kind: input, shape index: {}]   ;;  %s8728_s2 = inlined_call_operand.vmem [shape: f32[256,64], index: 2, kind: input, shape index: {}]   ;;  %s8729_s3 = inlined_call_operand.vmem [shape: f32[72,8], index: 3, kind: input, shape index: {}]   ;;  %s8730_s4 = inlined_call_operand.vmem [shape: f32[1,8], index: 4, kind: input, shape index: {}]   ;;  %s8731_s5 = inlined_call_operand.vmem [shape: f32[72,8], index: 5, kind: input, shape index: {}]   ;;  %s8732_s6 = inlined_call_operand.vmem [shape: f32[1,8], index: 6, kind: input, shape index: {}]   ;;  %s8733_s7 = inlined_call_operand.vmem [shape: f32[2,16,16,8], index: 7, kind: output, shape index: {}]  }
   0x1 LB: > { %s4158_s25 = sadd.s32 4294967295, %s4382_s24   ;;  %p4162_p0 = scmp.ge.s32.totalorder %s4382_s24, 1  ;;  %s4382_s24 = sphi %s4434_s24, %s17_s24  }
   0x2   : > { %p247_p1 = scmp.lt.s32.totalorder %s4382_s24, 3 }
   0x4   : > { %p248_p2 = pnand %p4162_p0, %p247_p1 }
   0x6   : > { %251 = sbr.rel (%p248_p2) target bundleno = 2204 (0x89c), region = 48 }
   0xb   : > { %p284_p3 = scmp.lt.s32.totalorder %s4158_s25, 1  ;;  %v307_v8 = vld [vmem:[%s8728_s2] sm:$0xff]  ;;  %vm339_vm0 = vcmask 523264   ;;  %v332_v9 = vld [vmem:[%s8728_s2 + $0xc8] sm:$0xff]  ;;  %v333_v11 = vld [vmem:[%s8728_s2 + $0xd0] sm:$0xff]  ;;  %vm549_vm1 = vcmask 64512  }
   0xc   : > { %v308_v10 = vld [vmem:[%s8728_s2 + $0x8] sm:$0xff]  ;;  %v309_v12 = vld [vmem:[%s8728_s2 + $0x10] sm:$0xff]  ;;  %v334_v13 = vld [vmem:[%s8728_s2 + $0xd8] sm:$0xff]  ;;  %vm552_vm2 = vcmask 58368   ;;  %v4384_v25 = vmov 0.0   ;;  %vm933_vm3 = vcmask 1046528  }
   0xd   : > { %s9598_s25 = smov (!%p284_p3, %s4158_s25), 1  ;;  %v310_v14 = vld [vmem:[%s8728_s2 + $0x18] sm:$0xff]  ;;  %v335_v15 = vld [vmem:[%s8728_s2 + $0xe0] sm:$0xff]  ;;  %v336_v17 = vld [vmem:[%s8728_s2 + $0xe8] sm:$0xff]  ;;  %551 = vst.msk [vmem:[#allocation2 + $0x8] sm:$0xff] %vm549_vm1, %v4384_v25  ;;  %vm1110_vm4 = vcmask 1045504  }
   0xe   : > { %s4267_s26 = sshll.u32 %s9598_s25, 6  ;;  %v311_v16 = vld [vmem:[%s8728_s2 + $0x20] sm:$0xff]  ;;  %v312_v18 = vld [vmem:[%s8728_s2 + $0x28] sm:$0xff]  ;;  %v337_v19 = vld [vmem:[%s8728_s2 + $0xf0] sm:$0xff]  ;;  %553 = vst.msk [vmem:[#allocation2 + $0x10] sm:$0x3] %vm552_vm2, %v4384_v25 }
   0xf   : > { %s288_s29 = scalar_lea.vmem %s8726_s0, %s4267_s26  ;;  %v313_v20 = vld [vmem:[%s8728_s2 + $0x30] sm:$0xff]  ;;  %v338_v21 = vld [vmem:[%s8728_s2 + $0xf8] sm:$0xff]  ;;  %v315_v23 = vld [vmem:[%s8728_s2 + $0x40] sm:$0xff]  ;;  %550 = vst.msk [vmem:[#allocation2] sm:$0xff] %vm549_vm1, %v4384_v25  ;;  %s4385_s26 = smov 8   ;;  %vm765_vm5 = vcmask 31744  }
  0x10   : > { %v306_v0 = vld [vmem:[%s288_s29 + $0x38] sm:$0xff]  ;;  %v305_v1 = vld [vmem:[%s288_s29 + $0x30] sm:$0xff]  ;;  %v304_v2 = vld [vmem:[%s288_s29 + $0x28] sm:$0xff]  ;;  %554 = vst.msk [vmem:[#allocation2 + $0x18] sm:$0xff] %vm549_vm1, %v4384_v25  ;;  %s4387_s15 = smov 4   ;;  %s4268_s30 = sshll.u32 %s9598_s25, 8 }
  0x11   : > { %444 = vmatpush.msra.mxu0 %v306_v0  ;;  %4270 = vmatpush.msra.mxu3 %v306_v0  ;;  %v303_v3 = vld [vmem:[%s288_s29 + $0x20] sm:$0xff]  ;;  %v302_v4 = vld [vmem:[%s288_s29 + $0x18] sm:$0xff]  ;;  %v301_v5 = vld [vmem:[%s288_s29 + $0x10] sm:$0xff]  ;;  %555 = vst.msk [vmem:[#allocation2 + $0x20] sm:$0xff] %vm549_vm1, %v4384_v25  ;;  %s4818_s10 = scalar_lea.vmem %s8727_s1, %s4268_s30  ;;  %s4388_s13 = smov 24   ;;  %vm1954_vm6 = vcmask 195584  }
  0x12   : > { %v300_v6 = vld [vmem:[%s288_s29 + $0x8] sm:$0xff]  ;;  %v299_v7 = vld [vmem:[%s288_s29] sm:$0xff]  ;;  %v314_v22 = vld [vmem:[%s8728_s2 + $0x38] sm:$0xff]  ;;  %556 = vst.msk [vmem:[#allocation2 + $0x28] sm:$0x3] %vm552_vm2, %v4384_v25  ;;  %s4386_s29 = smov 16   ;;  %s8314_s18 = scalar_lea.vmem %s8733_s7, %s4268_s30 }
  0x13   : > { %445 = vmatpush.msra.mxu0 %v305_v1  ;;  %4271 = vmatpush.msra.mxu3 %v305_v1  ;;  %v316_v24 = vld [vmem:[%s8728_s2 + $0x48] sm:$0xff]  ;;  %v317_v26 = vld [vmem:[%s8728_s2 + $0x50] sm:$0xff]  ;;  %557 = vst.msk [vmem:[#allocation2 + $0x30] sm:$0xff] %vm549_vm1, %v4384_v25  ;;  %v318_v31 = vld [vmem:[%s8728_s2 + $0x58] sm:$0xff]  ;;  %s4389_s17 = smov 32   ;;  %s4390_s20 = smov 40  }
  0x14   : > { %v832_v27 = vld [vmem:[#allocation2 + $0x8] sm:$0xff]  ;;  %558 = vst.msk [vmem:[#allocation2 + $0x38] sm:$0xff] %vm549_vm1, %v4384_v25  ;;  %v319_v36 = vld [vmem:[%s8728_s2 + $0x60] sm:$0xff]  ;;  %v321_v42 = vld [vmem:[%s8728_s2 + $0x70] sm:$0xff]  ;;  %s4392_s21 = smov 56   ;;  %s4393_s22 = smov 64  }
  0x15   : > { %446 = vmatpush.msra.mxu0 %v304_v2  ;;  %4272 = vmatpush.msra.mxu3 %v304_v2  ;;  %v833_v28 = vld [vmem:[#allocation2 + $0x10] sm:$0x3]  ;;  %v935_v29 = vrot.slane %v832_v27, 1  ;;  %559 = vst.msk [vmem:[#allocation2 + $0x40] sm:$0x3] %vm552_vm2, %v4384_v25  ;;  %v1112_v35 = vrot.slane %v832_v27, 2 }
  0x16   : > { %v937_v30 = vrot.slane %v833_v28, 1  ;;  %560 = vst.msk [vmem:[#allocation2 + $0x48] sm:$0xff] %vm549_vm1, %v4384_v25  ;;  %v831_v33 = vld [vmem:[#allocation2] sm:$0xff]  ;;  %v320_v39 = vld [vmem:[%s8728_s2 + $0x68] sm:$0xff]  ;;  %v1114_v41 = vrot.slane %v833_v28, 2  ;;  %v322_v44 = vld [vmem:[%s8728_s2 + $0x78] sm:$0xff] }
  0x17   : > { %447 = vmatpush.msra.mxu0 %v303_v3  ;;  %4273 = vmatpush.msra.mxu3 %v303_v3  ;;  %561 = vst.msk [vmem:[#allocation2 + $0x50] sm:$0xff] %vm549_vm1, %v4384_v25  ;;  %v1111_v34 = vrot.slane %v831_v33, 2  ;;  %v934_v38 = vrot.slane %v831_v33, 1  ;;  %v323_v46 = vld [vmem:[%s8728_s2 + $0x80] sm:$0xff]  ;;  %v324_v49 = vld [vmem:[%s8728_s2 + $0x88] sm:$0xff]  ;;  %v325_v52 = vld [vmem:[%s8728_s2 + $0x90] sm:$0xff] }
  0x18   : > { %v938_v32 = vsel %vm933_vm3, %v935_v29, %v937_v30  ;;  %562 = vst.msk [vmem:[#allocation2 + $0x58] sm:$0x3] %vm552_vm2, %v4384_v25  ;;  %v1115_v43 = vsel %vm1110_vm4, %v1112_v35, %v1114_v41  ;;  %v326_v61 = vld [vmem:[%s8728_s2 + $0x98] sm:$0xff]  ;;  %v327_v0 = vld [vmem:[%s8728_s2 + $0xa0] sm:$0xff]  ;;  %v634_v33 = vld [vmem:[%s4818_s10 + $0xe8] sm:$0xff]  ;;  %vm1921_vm7 = vcmask 130048  }
  0x19   : > { %448 = vmatpush.msra.mxu0 %v302_v4  ;;  %4274 = vmatpush.msra.mxu3 %v302_v4  ;;  %563 = vst.msk [vmem:[#allocation2 + $0x60] sm:$0xff] %vm549_vm1, %v4384_v25  ;;  %v1113_v37 = vsel %vm1110_vm4, %v1111_v34, %v1112_v35  ;;  %v936_v40 = vsel %vm933_vm3, %v934_v38, %v935_v29  ;;  %vm1987_vm8 = vcmask 261120   ;;  %vm2020_vm9 = vcmask 326656  }
  0x1a   : > { %1016 = vrot.lane.b32.xlu0 %v938_v32, %s4385_s26  ;;  %564 = vst.msk [vmem:[#allocation2 + $0x68] sm:$0xff] %vm549_vm1, %v4384_v25  ;;  %1191 = vrot.lane.b32.xlu1 %v1113_v37, %s4386_s29  ;;  %v607_v32 = vld [vmem:[%s4818_s10 + $0x10] sm:$0xff]  ;;  %vm2086_vm10 = vcmask 457728   ;;  %vm2053_vm11 = vcmask 392192   ;;  %vm2164_vm12 = vcmask 588800  }
  0x1b   : > { %449 = vmatpush.msra.mxu0 %v301_v5  ;;  %4275 = vmatpush.msra.mxu3 %v301_v5  ;;  %565 = vst.msk [vmem:[#allocation2 + $0x70] sm:$0x3] %vm552_vm2, %v4384_v25 }
  0x1c   : > { %566 = vst.msk [vmem:[#allocation2 + $0x78] sm:$0xff] %vm549_vm1, %v4384_v25  ;;  %1014 = vrot.lane.b32.xlu2 %v936_v40, %s4385_s26 }
  0x1d   : > { %450 = vmatpush.msra.mxu0 %v300_v6  ;;  %4276 = vmatpush.msra.mxu3 %v300_v6  ;;  %567 = vst.msk [vmem:[#allocation2 + $0x80] sm:$0xff] %vm549_vm1, %v4384_v25 }
  0x1e   : > { %568 = vst.msk [vmem:[#allocation2 + $0x88] sm:$0x3] %vm552_vm2, %v4384_v25 }
  0x1f   : > { %451 = vmatpush.msra.mxu0 %v299_v7  ;;  %4277 = vmatpush.msra.mxu3 %v299_v7  ;;  %569 = vst.msk [vmem:[#allocation2 + $0x90] sm:$0xff] %vm549_vm1, %v4384_v25 }
  0x20   : > { %4169 = vmatmul.msk.f32.vlgmr.msra.gmra.mxu0 %vm339_vm0, %v307_v8  ;;  %4194 = vmatmul.msk.f32.vlgmr.msra.gmra.mxu3 %vm339_vm0, %v332_v9  ;;  %570 = vst.msk [vmem:[#allocation2 + $0x98] sm:$0xff] %vm549_vm1, %v4384_v25  ;;  %v328_v8 = vld [vmem:[%s8728_s2 + $0xa8] sm:$0xff]  ;;  %v631_v9 = vld [vmem:[%s4818_s10 + $0xd0] sm:$0xff] }
  0x21   : > { %571 = vst.msk [vmem:[#allocation2 + $0xa0] sm:$0x3] %vm552_vm2, %v4384_v25 }
  0x22   : > { %572 = vst.msk [vmem:[#allocation2 + $0xa8] sm:$0xff] %vm549_vm1, %v4384_v25 }
  0x23   : > { %573 = vst.msk [vmem:[#allocation2 + $0xb0] sm:$0xff] %vm549_vm1, %v4384_v25 }
  0x24   : > { %574 = vst.msk [vmem:[#allocation2 + $0xb8] sm:$0x3] %vm552_vm2, %v4384_v25  ;;  %1193 = vrot.lane.b32.xlu2 %v1115_v43, %s4386_s29 }
  0x25   : > { %575 = vst.msk [vmem:[#allocation2 + $0xc0] sm:$0xff] %vm549_vm1, %v4384_v25 }
  0x26   : > { %576 = vst.msk [vmem:[#allocation2 + $0xc8] sm:$0xff] %vm549_vm1, %v4384_v25 }
  0x27   : > { %577 = vst.msk [vmem:[#allocation2 + $0xd0] sm:$0x3] %vm552_vm2, %v4384_v25 }
  0x28   : > { %4170 = vmatmul.msk.f32.gmra.mxu0 %vm339_vm0, %v308_v10  ;;  %4195 = vmatmul.msk.f32.gmra.mxu3 %vm339_vm0, %v333_v11  ;;  %578 = vst.msk [vmem:[#allocation2 + $0xd8] sm:$0xff] %vm549_vm1, %v4384_v25 }
  0x29   : > { %579 = vst.msk [vmem:[#allocation2 + $0xe0] sm:$0xff] %vm549_vm1, %v4384_v25 }
  0x2a   : > { %580 = vst.msk [vmem:[#allocation2 + $0xe8] sm:$0x3] %vm552_vm2, %v4384_v25 }
  0x2b   : > { %581 = vst.msk [vmem:[#allocation2 + $0xf0] sm:$0xff] %vm549_vm1, %v4384_v25 }
  0x2c   : > { %582 = vst.msk [vmem:[#allocation2 + $0xf8] sm:$0xff] %vm549_vm1, %v4384_v25 }
  0x2d   : > { %583 = vst.msk [vmem:[#allocation2 + $0x100] sm:$0x3] %vm552_vm2, %v4384_v25 }
  0x2e   : > { %584 = vst.msk [vmem:[#allocation2 + $0x108] sm:$0xff] %vm549_vm1, %v4384_v25 }
  0x2f   : > { %585 = vst.msk [vmem:[#allocation2 + $0x110] sm:$0xff] %vm549_vm1, %v4384_v25 }
  0x30   : > { %4171 = vmatmul.msk.f32.gmra.mxu0 %vm339_vm0, %v309_v12  ;;  %4196 = vmatmul.msk.f32.gmra.mxu3 %vm339_vm0, %v334_v13  ;;  %586 = vst.msk [vmem:[#allocation2 + $0x118] sm:$0x3] %vm552_vm2, %v4384_v25 }
  0x31   : > { %587 = vst.msk [vmem:[#allocation2 + $0x120] sm:$0xff] %vm549_vm1, %v4384_v25 }
  0x32   : > { %588 = vst.msk [vmem:[#allocation2 + $0x128] sm:$0xff] %vm549_vm1, %v4384_v25 }
  0x33   : > { %589 = vst.msk [vmem:[#allocation2 + $0x130] sm:$0x3] %vm552_vm2, %v4384_v25 }
  0x34   : > { %590 = vst.msk [vmem:[#allocation2 + $0x138] sm:$0xff] %vm549_vm1, %v4384_v25 }
  0x35   : > { %591 = vst.msk [vmem:[#allocation2 + $0x140] sm:$0xff] %vm549_vm1, %v4384_v25 }
  0x36   : > { %592 = vst.msk [vmem:[#allocation2 + $0x148] sm:$0x3] %vm552_vm2, %v4384_v25 }
  0x37   : > { %593 = vst.msk [vmem:[#allocation2 + $0x150] sm:$0xff] %vm549_vm1, %v4384_v25 }
  0x38   : > { %4172 = vmatmul.msk.f32.gmra.mxu0 %vm339_vm0, %v310_v14  ;;  %4197 = vmatmul.msk.f32.gmra.mxu3 %vm339_vm0, %v335_v15  ;;  %594 = vst.msk [vmem:[#allocation2 + $0x158] sm:$0xff] %vm549_vm1, %v4384_v25  ;;  %v329_v14 = vld [vmem:[%s8728_s2 + $0xb0] sm:$0xff] }
  0x39   : > { %595 = vst.msk [vmem:[#allocation2 + $0x160] sm:$0x3] %vm552_vm2, %v4384_v25 }
  0x3a   : > { %596 = vst.msk [vmem:[#allocation2 + $0x168] sm:$0xff] %vm549_vm1, %v4384_v25 }
  0x3b   : > { %597 = vst.msk [vmem:[#allocation2 + $0x170] sm:$0xff] %vm549_vm1, %v4384_v25 }
  0x3c   : > { %598 = vst.msk [vmem:[#allocation2 + $0x178] sm:$0x3] %vm552_vm2, %v4384_v25 }
  0x3d   : > { %599 = vst.msk [vmem:[#allocation2 + $0x180] sm:$0xff] %vm549_vm1, %v4384_v25 }
  0x3e   : > { %600 = vst.msk [vmem:[#allocation2 + $0x188] sm:$0xff] %vm549_vm1, %v4384_v25 }
  0x3f   : > { %601 = vst.msk [vmem:[#allocation2 + $0x190] sm:$0x3] %vm552_vm2, %v4384_v25 }
  0x40   : > { %4173 = vmatmul.msk.f32.gmra.mxu0 %vm339_vm0, %v311_v16  ;;  %4198 = vmatmul.msk.f32.gmra.mxu3 %vm339_vm0, %v336_v17  ;;  %602 = vst.msk [vmem:[#allocation2 + $0x198] sm:$0xff] %vm549_vm1, %v4384_v25  ;;  %v605_v17 = vld [vmem:[%s4818_s10] sm:$0xff] }
  0x41   : > { %603 = vst.msk [vmem:[#allocation2 + $0x1a0] sm:$0xff] %vm549_vm1, %v4384_v25 }
  0x42   : > { %604 = vst.msk [vmem:[#allocation2 + $0x1a8] sm:$0x3] %vm552_vm2, %v4384_v25 }
  0x43   : > { %2406 = vst.msk [vmem:[#allocation3] sm:$0xff] %vm549_vm1, %v4384_v25 }
  0x44   : > { %2407 = vst.msk [vmem:[#allocation3 + $0x8] sm:$0xff] %vm549_vm1, %v4384_v25 }
  0x45   : > { %2408 = vst.msk [vmem:[#allocation3 + $0x10] sm:$0x3] %vm552_vm2, %v4384_v25 }
  0x46   : > { %2409 = vst.msk [vmem:[#allocation3 + $0x18] sm:$0xff] %vm549_vm1, %v4384_v25 }
  0x47   : > { %2410 = vst.msk [vmem:[#allocation3 + $0x20] sm:$0xff] %vm549_vm1, %v4384_v25 }
  0x48   : > { %4174 = vmatmul.msk.f32.gmra.mxu0 %vm339_vm0, %v312_v18  ;;  %4199 = vmatmul.msk.f32.gmra.mxu3 %vm339_vm0, %v337_v19  ;;  %2411 = vst.msk [vmem:[#allocation3 + $0x28] sm:$0x3] %vm552_vm2, %v4384_v25 }
  0x49   : > { %2412 = vst.msk [vmem:[#allocation3 + $0x30] sm:$0xff] %vm549_vm1, %v4384_v25 }
  0x4a   : > { %2413 = vst.msk [vmem:[#allocation3 + $0x38] sm:$0xff] %vm549_vm1, %v4384_v25 }
  0x4b   : > { %2414 = vst.msk [vmem:[#allocation3 + $0x40] sm:$0x3] %vm552_vm2, %v4384_v25 }
  0x4c   : > { %2415 = vst.msk [vmem:[#allocation3 + $0x48] sm:$0xff] %vm549_vm1, %v4384_v25 }
  0x4d   : > { %2416 = vst.msk [vmem:[#allocation3 + $0x50] sm:$0xff] %vm549_vm1, %v4384_v25 }
  0x4e   : > { %2417 = vst.msk [vmem:[#allocation3 + $0x58] sm:$0x3] %vm552_vm2, %v4384_v25 }
  0x4f   : > { %2418 = vst.msk [vmem:[#allocation3 + $0x60] sm:$0xff] %vm549_vm1, %v4384_v25 }
  0x50   : > { %4175 = vmatmul.msk.f32.gmra.mxu0 %vm339_vm0, %v313_v20  ;;  %4200 = vmatmul.msk.f32.gmra.mxu3 %vm339_vm0, %v338_v21  ;;  %2419 = vst.msk [vmem:[#allocation3 + $0x68] sm:$0xff] %vm549_vm1, %v4384_v25  ;;  %v630_v20 = vld [vmem:[%s4818_s10 + $0xc8] sm:$0xff] }
  0x51   : > { %2420 = vst.msk [vmem:[#allocation3 + $0x70] sm:$0x3] %vm552_vm2, %v4384_v25 }
  0x52   : > { %2421 = vst.msk [vmem:[#allocation3 + $0x78] sm:$0xff] %vm549_vm1, %v4384_v25 }
  0x53   : > { %2422 = vst.msk [vmem:[#allocation3 + $0x80] sm:$0xff] %vm549_vm1, %v4384_v25 }
  0x54   : > { %2423 = vst.msk [vmem:[#allocation3 + $0x88] sm:$0x3] %vm552_vm2, %v4384_v25 }
  0x55   : > { %2424 = vst.msk [vmem:[#allocation3 + $0x90] sm:$0xff] %vm549_vm1, %v4384_v25 }
  0x56   : > { %2425 = vst.msk [vmem:[#allocation3 + $0x98] sm:$0xff] %vm549_vm1, %v4384_v25 }
  0x57   : > { %2426 = vst.msk [vmem:[#allocation3 + $0xa0] sm:$0x3] %vm552_vm2, %v4384_v25 }
  0x58   : > { %4176 = vmatmul.msk.f32.gmra.mxu0 %vm339_vm0, %v314_v22  ;;  %2427 = vst.msk [vmem:[#allocation3 + $0xa8] sm:$0xff] %vm549_vm1, %v4384_v25 }
  0x59   : > { %2428 = vst.msk [vmem:[#allocation3 + $0xb0] sm:$0xff] %vm549_vm1, %v4384_v25 }
  0x5a   : > { %2429 = vst.msk [vmem:[#allocation3 + $0xb8] sm:$0x3] %vm552_vm2, %v4384_v25 }
  0x5b   : > { %2430 = vst.msk [vmem:[#allocation3 + $0xc0] sm:$0xff] %vm549_vm1, %v4384_v25 }
  0x5c   : > { %2431 = vst.msk [vmem:[#allocation3 + $0xc8] sm:$0xff] %vm549_vm1, %v4384_v25 }
  0x5d   : > { %2432 = vst.msk [vmem:[#allocation3 + $0xd0] sm:$0x3] %vm552_vm2, %v4384_v25 }
  0x5e   : > { %2433 = vst.msk [vmem:[#allocation3 + $0xd8] sm:$0xff] %vm549_vm1, %v4384_v25 }
  0x5f   : > { %2434 = vst.msk [vmem:[#allocation3 + $0xe0] sm:$0xff] %vm549_vm1, %v4384_v25 }
  0x60   : > { %4177 = vmatmul.msk.f32.gmra.mxu0 %vm339_vm0, %v315_v23  ;;  %2435 = vst.msk [vmem:[#allocation3 + $0xe8] sm:$0x3] %vm552_vm2, %v4384_v25  ;;  %v606_v23 = vld [vmem:[%s4818_s10 + $0x8] sm:$0xff] }
  0x61   : > { %2436 = vst.msk [vmem:[#allocation3 + $0xf0] sm:$0xff] %vm549_vm1, %v4384_v25 }
  0x62   : > { %2437 = vst.msk [vmem:[#allocation3 + $0xf8] sm:$0xff] %vm549_vm1, %v4384_v25 }
  0x63   : > { %2438 = vst.msk [vmem:[#allocation3 + $0x100] sm:$0x3] %vm552_vm2, %v4384_v25 }
  0x64   : > { %2439 = vst.msk [vmem:[#allocation3 + $0x108] sm:$0xff] %vm549_vm1, %v4384_v25 }
  0x65   : > { %2440 = vst.msk [vmem:[#allocation3 + $0x110] sm:$0xff] %vm549_vm1, %v4384_v25 }
  0x66   : > { %2441 = vst.msk [vmem:[#allocation3 + $0x118] sm:$0x3] %vm552_vm2, %v4384_v25 }
  0x67   : > { %2442 = vst.msk [vmem:[#allocation3 + $0x120] sm:$0xff] %vm549_vm1, %v4384_v25 }
  0x68   : > { %4178 = vmatmul.msk.f32.gmra.mxu0 %vm339_vm0, %v316_v24  ;;  %2443 = vst.msk [vmem:[#allocation3 + $0x128] sm:$0xff] %vm549_vm1, %v4384_v25  ;;  %v609_v24 = vld [vmem:[%s4818_s10 + $0x20] sm:$0xff] }
  0x69   : > { %2444 = vst.msk [vmem:[#allocation3 + $0x130] sm:$0x3] %vm552_vm2, %v4384_v25 }
  0x6a   : > { %2445 = vst.msk [vmem:[#allocation3 + $0x138] sm:$0xff] %vm549_vm1, %v4384_v25 }
  0x6b   : > { %2446 = vst.msk [vmem:[#allocation3 + $0x140] sm:$0xff] %vm549_vm1, %v4384_v25 }
  0x6c   : > { %2447 = vst.msk [vmem:[#allocation3 + $0x148] sm:$0x3] %vm552_vm2, %v4384_v25 }
  0x6d   : > { %2448 = vst.msk [vmem:[#allocation3 + $0x150] sm:$0xff] %vm549_vm1, %v4384_v25 }
  0x6e   : > { %2449 = vst.msk [vmem:[#allocation3 + $0x158] sm:$0xff] %vm549_vm1, %v4384_v25 }
  0x6f   : > { %2450 = vst.msk [vmem:[#allocation3 + $0x160] sm:$0x3] %vm552_vm2, %v4384_v25 }
  0x70   : > { %4179 = vmatmul.msk.f32.gmra.mxu0 %vm339_vm0, %v317_v26  ;;  %2451 = vst.msk [vmem:[#allocation3 + $0x168] sm:$0xff] %vm549_vm1, %v4384_v25 }
  0x71   : > { %2452 = vst.msk [vmem:[#allocation3 + $0x170] sm:$0xff] %vm549_vm1, %v4384_v25 }
  0x72   : > { %2453 = vst.msk [vmem:[#allocation3 + $0x178] sm:$0x3] %vm552_vm2, %v4384_v25 }
  0x73   : > { %2454 = vst.msk [vmem:[#allocation3 + $0x180] sm:$0xff] %vm549_vm1, %v4384_v25 }
  0x74   : > { %2455 = vst.msk [vmem:[#allocation3 + $0x188] sm:$0xff] %vm549_vm1, %v4384_v25 }
  0x75   : > { %2456 = vst.msk [vmem:[#allocation3 + $0x190] sm:$0x3] %vm552_vm2, %v4384_v25 }
  0x76   : > { %2457 = vst.msk [vmem:[#allocation3 + $0x198] sm:$0xff] %vm549_vm1, %v4384_v25  ;;  %v4802_v4 = vpop.permute.xlu2 %1014 }
  0x77   : > { %2458 = vst.msk [vmem:[#allocation3 + $0x1a0] sm:$0xff] %vm549_vm1, %v4384_v25 }
  0x78   : > { %4180 = vmatmul.msk.f32.gmra.mxu0 %vm339_vm0, %v318_v31  ;;  %2459 = vst.msk [vmem:[#allocation3 + $0x1a8] sm:$0x3] %vm552_vm2, %v4384_v25 }
  0x79   : > { %8855 = vst [vmem:[#allocation4_spill] sm:$0xff] %v4802_v4 }
  0x7e   : > { %v4805_v6 = vpop.permute.xlu2 %1193 }
  0x7f   : > { %8856 = vst [vmem:[#allocation5_spill] sm:$0xff] %v4805_v6  ;;  %v628_v6 = vld [vmem:[%s4818_s10 + $0xb8] sm:$0xff] }
  0x80   : > { %4181 = vmatmul.msk.f32.gmra.mxu0 %vm339_vm0, %v319_v36 }
  0x88   : > { %4182 = vmatmul.msk.f32.gmra.mxu0 %vm339_vm0, %v320_v39 }
  0x8c   : > { %v4822_v11 = vpop.permute.xlu0 %1016  ;;  %v4830_v15 = vpop.permute.xlu1 %1191 }
  0x8d   : > { %8857 = vst [vmem:[#allocation6_spill] sm:$0xff] %v4822_v11 }
  0x8e   : > { %8858 = vst [vmem:[#allocation7_spill] sm:$0xff] %v4830_v15 }
  0x90   : > { %4183 = vmatmul.msk.f32.gmra.mxu0 %vm339_vm0, %v321_v42 }
  0x98   : > { %4184 = vmatmul.msk.f32.gmra.mxu0 %vm339_vm0, %v322_v44 }
  0x9d   : > { %v453_v45 = vpop.f32.mrf.mxu0 }
  0x9e   : > { %669 = vrot.lane.b32.xlu0 %v453_v45, %s4387_s15  ;;  %v632_v45 = vld [vmem:[%s4818_s10 + $0xd8] sm:$0xff] }
  0xa0   : > { %4185 = vmatmul.msk.f32.gmra.mxu0 %vm339_vm0, %v323_v46 }
  0xa3   : > { %v528_v47 = vpop.f32.mrf.mxu3 }
  0xa4   : > { %719 = vrot.lane.b32.xlu1 %v528_v47, %s4387_s15 }
  0xa5   : > { %v456_v48 = vpop.f32.mrf.mxu0 }
  0xa6   : > { %671 = vrot.lane.b32.xlu0 %v456_v48, %s4387_s15  ;;  %v608_v48 = vld [vmem:[%s4818_s10 + $0x18] sm:$0xff] }
  0xa8   : > { %4186 = vmatmul.msk.f32.gmra.mxu0 %vm339_vm0, %v324_v49  ;;  %v610_v49 = vld [vmem:[%s4818_s10 + $0x28] sm:$0xff] }
  0xab   : > { %v531_v50 = vpop.f32.mrf.mxu3 }
  0xac   : > { %721 = vrot.lane.b32.xlu2 %v531_v50, %s4387_s15 }
  0xad   : > { %v459_v51 = vpop.f32.mrf.mxu0 }
  0xae   : > { %673 = vrot.lane.b32.xlu1 %v459_v51, %s4387_s15 }
  0xb0   : > { %4187 = vmatmul.msk.f32.gmra.mxu0 %vm339_vm0, %v325_v52 }
  0xb3   : > { %v534_v53 = vpop.f32.mrf.mxu3 }
  0xb4   : > { %723 = vrot.lane.b32.xlu0 %v534_v53, %s4387_s15  ;;  %v330_v53 = vld [vmem:[%s8728_s2 + $0xb8] sm:$0xff] }
  0xb5   : > { %v462_v54 = vpop.f32.mrf.mxu0 }
  0xb6   : > { %675 = vrot.lane.b32.xlu1 %v462_v54, %s4387_s15 }
  0xb8   : > { %4188 = vmatmul.msk.f32.gmra.mxu0 %vm339_vm0, %v326_v61 }
  0xbb   : > { %v537_v55 = vpop.f32.mrf.mxu3 }
  0xbd   : > { %v465_v56 = vpop.f32.mrf.mxu0 }
  0xbe   : > { %677 = vrot.lane.b32.xlu2 %v465_v56, %s4387_s15  ;;  %725 = vrot.lane.b32.xlu1 %v537_v55, %s4387_s15 }
  0xc0   : > { %4189 = vmatmul.msk.f32.gmra.mxu0 %vm339_vm0, %v327_v0 }
  0xc3   : > { %v540_v57 = vpop.f32.mrf.mxu3 }
  0xc5   : > { %v468_v58 = vpop.f32.mrf.mxu0 }
  0xc6   : > { %727 = vrot.lane.b32.xlu2 %v540_v57, %s4387_s15 }
  0xc8   : > { %4190 = vmatmul.msk.f32.gmra.mxu0 %vm339_vm0, %v328_v8 }
  0xcb   : > { %v543_v59 = vpop.f32.mrf.mxu3 }
  0xcc   : > { %729 = vrot.lane.b32.xlu0 %v543_v59, %s4387_s15  ;;  %v633_v59 = vld [vmem:[%s4818_s10 + $0xe0] sm:$0xff] }
  0xcd   : > { %v471_v60 = vpop.f32.mrf.mxu0 }
  0xce   : > { %679 = vrot.lane.b32.xlu2 %v468_v58, %s4387_s15 }
  0xd0   : > { %4191 = vmatmul.msk.f32.gmra.mxu0 %vm339_vm0, %v329_v14 }
  0xd3   : > { %v546_v62 = vpop.f32.mrf.mxu3 }
  0xd4   : > { %731 = vrot.lane.b32.xlu1 %v546_v62, %s4387_s15  ;;  %681 = vrot.lane.b32.xlu0 %v471_v60, %s4387_s15  ;;  %v331_v62 = vld [vmem:[%s8728_s2 + $0xc0] sm:$0xff] }
  0xd5   : > { %v474_v63 = vpop.f32.mrf.mxu0 }
  0xd8   : > { %4192 = vmatmul.msk.f32.gmra.mxu0 %vm339_vm0, %v330_v53 }
  0xdc   : > { %683 = vrot.lane.b32.xlu1 %v474_v63, %s4387_s15 }
  0xdd   : > { %v477_v1 = vpop.f32.mrf.mxu0 }
  0xde   : > { %685 = vrot.lane.b32.xlu2 %v477_v1, %s4387_s15 }
  0xe0   : > { %4193 = vmatmul.msk.f32.gmra.mxu0 %vm339_vm0, %v331_v62 }
  0xe5   : > { %v480_v2 = vpop.f32.mrf.mxu0 }
  0xe6   : > { %687 = vrot.lane.b32.xlu0 %v480_v2, %s4387_s15  ;;  %v613_v2 = vld [vmem:[%s4818_s10 + $0x40] sm:$0xff] }
  0xed   : > { %v483_v3 = vpop.f32.mrf.mxu0 }
  0xee   : > { %689 = vrot.lane.b32.xlu1 %v483_v3, %s4387_s15 }
  0xf5   : > { %v486_v5 = vpop.f32.mrf.mxu0 }
  0xf6   : > { %691 = vrot.lane.b32.xlu2 %v486_v5, %s4387_s15 }
  0xfd   : > { %v489_v7 = vpop.f32.mrf.mxu0 }
  0xfe   : > { %693 = vrot.lane.b32.xlu0 %v489_v7, %s4387_s15  ;;  %v635_v7 = vld [vmem:[%s4818_s10 + $0xf0] sm:$0xff] }
 0x105   : > { %v492_v10 = vpop.f32.mrf.mxu0 }
 0x106   : > { %695 = vrot.lane.b32.xlu1 %v492_v10, %s4387_s15  ;;  %v722_v12 = vpop.permute.xlu2 %721 }
 0x107   : > { %v792_v13 = vsel %vm765_vm5, %v631_v9, %v722_v12 }
 0x108   : > { %825 = vst.msk [vmem:[#allocation2 + $0x151] sm:$0xff] %vm549_vm1, %v792_v13 }
 0x10d   : > { %v495_v16 = vpop.f32.mrf.mxu0 }
 0x10e   : > { %697 = vrot.lane.b32.xlu2 %v495_v16, %s4387_s15 }
 0x10f   : > { %v873_v16 = vld [vmem:[#allocation2 + $0x150] sm:$0xff] }
 0x110   : > { %v670_v18 = vpop.permute.xlu0 %669 }
 0x111   : > { %v766_v19 = vsel %vm765_vm5, %v605_v17, %v670_v18  ;;  %v636_v17 = vld [vmem:[%s4818_s10 + $0xf8] sm:$0xff]  ;;  %v611_v18 = vld [vmem:[%s4818_s10 + $0x30] sm:$0xff] }
 0x112   : > { %799 = vst.msk [vmem:[#allocation2 + $0x19] sm:$0xff] %vm549_vm1, %v766_v19 }
 0x115   : > { %v498_v21 = vpop.f32.mrf.mxu0 }
 0x116   : > { %699 = vrot.lane.b32.xlu0 %v498_v21, %s4387_s15  ;;  %v720_v22 = vpop.permute.xlu1 %719 }
 0x117   : > { %v791_v25 = vsel %vm765_vm5, %v630_v20, %v720_v22 }
 0x118   : > { %824 = vst.msk [vmem:[#allocation2 + $0x141] sm:$0xff] %vm549_vm1, %v791_v25  ;;  %v672_v26 = vpop.permute.xlu0 %671  ;;  %v678_v27 = vpop.permute.xlu2 %677  ;;  %v1004_v25 = vrot.slane %v873_v16, 1 }
 0x119   : > { %v767_v28 = vsel %vm765_vm5, %v606_v23, %v672_v26  ;;  %v770_v29 = vsel %vm765_vm5, %v609_v24, %v678_v27  ;;  %v834_v31 = vld [vmem:[#allocation2 + $0x18] sm:$0xff] }
 0x11a   : > { %800 = vst.msk [vmem:[#allocation2 + $0x21] sm:$0xff] %vm549_vm1, %v767_v28  ;;  %v1116_v42 = vrot.slane %v834_v31, 2  ;;  %v939_v57 = vrot.slane %v834_v31, 1  ;;  %v612_v27 = vld [vmem:[%s4818_s10 + $0x38] sm:$0xff] }
 0x11b   : > { %803 = vst.msk [vmem:[#allocation2 + $0x49] sm:$0xff] %vm549_vm1, %v770_v29 }
 0x11d   : > { %v501_v30 = vpop.f32.mrf.mxu0 }
 0x11e   : > { %1289 = vrot.lane.b32.xlu0 %v834_v31, %s4388_s13  ;;  %701 = vrot.lane.b32.xlu1 %v501_v30, %s4387_s15  ;;  %v616_v30 = vld [vmem:[%s4818_s10 + $0x58] sm:$0xff] }
 0x120   : > { %v674_v34 = vpop.permute.xlu1 %673  ;;  %v728_v35 = vpop.permute.xlu2 %727 }
 0x121   : > { %v768_v36 = vsel %vm765_vm5, %v607_v32, %v674_v34  ;;  %v795_v37 = vsel %vm765_vm5, %v634_v33, %v728_v35  ;;  %v835_v38 = vld [vmem:[#allocation2 + $0x20] sm:$0xff]  ;;  %v836_v39 = vld [vmem:[#allocation2 + $0x28] sm:$0x3] }
 0x122   : > { %801 = vst.msk [vmem:[#allocation2 + $0x31] sm:$0xff] %vm549_vm1, %v768_v36  ;;  %v940_v40 = vrot.slane %v835_v38, 1  ;;  %v942_v41 = vrot.slane %v836_v39, 1  ;;  %v1117_v43 = vrot.slane %v835_v38, 2  ;;  %v1119_v60 = vrot.slane %v836_v39, 2 }
 0x123   : > { %828 = vst.msk [vmem:[#allocation2 + $0x171] sm:$0xff] %vm549_vm1, %v795_v37  ;;  %v1181_v39 = vrot.slane %v873_v16, 2 }
 0x124   : > { %v943_v44 = vsel %vm933_vm3, %v940_v40, %v942_v41  ;;  %v1118_v46 = vsel %vm1110_vm4, %v1116_v42, %v1117_v43  ;;  %v941_v58 = vsel %vm933_vm3, %v939_v57, %v940_v40  ;;  %v1120_v1 = vsel %vm1110_vm4, %v1117_v43, %v1119_v60  ;;  %v614_v43 = vld [vmem:[%s4818_s10 + $0x48] sm:$0xff]  ;;  %v617_v60 = vld [vmem:[%s4818_s10 + $0x60] sm:$0xff] }
 0x125   : > { %1020 = vrot.lane.b32.xlu2 %v943_v44, %s4385_s26  ;;  %v504_v56 = vpop.f32.mrf.mxu0 }
 0x126   : > { %v724_v47 = vpop.permute.xlu0 %723  ;;  %1195 = vrot.lane.b32.xlu0 %v1118_v46, %s4386_s29  ;;  %1291 = vrot.lane.b32.xlu1 %v835_v38, %s4388_s13 }
 0x127   : > { %v793_v50 = vsel %vm765_vm5, %v632_v45, %v724_v47 }
 0x128   : > { %826 = vst.msk [vmem:[#allocation2 + $0x159] sm:$0xff] %vm549_vm1, %v793_v50  ;;  %v676_v51 = vpop.permute.xlu1 %675  ;;  %v680_v52 = vpop.permute.xlu2 %679 }
 0x129   : > { %v769_v54 = vsel %vm765_vm5, %v608_v48, %v676_v51  ;;  %v771_v55 = vsel %vm765_vm5, %v610_v49, %v680_v52  ;;  %v837_v26 = vld [vmem:[#allocation2 + $0x30] sm:$0xff] }
 0x12a   : > { %802 = vst.msk [vmem:[#allocation2 + $0x39] sm:$0xff] %vm549_vm1, %v769_v54  ;;  %v615_v48 = vld [vmem:[%s4818_s10 + $0x50] sm:$0xff]  ;;  %v1121_v53 = vrot.slane %v837_v26, 2  ;;  %v878_v62 = vld [vmem:[#allocation2 + $0x178] sm:$0x3] }
 0x12b   : > { %804 = vst.msk [vmem:[#allocation2 + $0x51] sm:$0xff] %vm549_vm1, %v771_v55 }
 0x12d   : > { %1391 = vrot.lane.b32.xlu2 %v941_v58, %s4389_s17  ;;  %v507_v0 = vpop.f32.mrf.mxu0 }
 0x12e   : > { %1393 = vrot.lane.b32.xlu0 %v943_v44, %s4389_s17  ;;  %1018 = vrot.lane.b32.xlu1 %v941_v58, %s4385_s26 }
 0x12f   : > { %v874_v8 = vld [vmem:[#allocation2 + $0x158] sm:$0xff]  ;;  %v875_v10 = vld [vmem:[#allocation2 + $0x160] sm:$0x3] }
 0x130   : > { %v726_v61 = vpop.permute.xlu1 %725  ;;  %v1005_v13 = vrot.slane %v874_v8, 1  ;;  %v1007_v14 = vrot.slane %v875_v10, 1  ;;  %v1182_v34 = vrot.slane %v874_v8, 2  ;;  %v1184_v38 = vrot.slane %v875_v10, 2 }
 0x131   : > { %v794_v63 = vsel %vm765_vm5, %v633_v59, %v726_v61  ;;  %v838_v20 = vld [vmem:[#allocation2 + $0x38] sm:$0xff]  ;;  %v839_v31 = vld [vmem:[#allocation2 + $0x40] sm:$0x3] }
 0x132   : > { %827 = vst.msk [vmem:[#allocation2 + $0x169] sm:$0xff] %vm549_vm1, %v794_v63  ;;  %v4900_v19 = vsel %vm933_vm3, %v1005_v13, %v1007_v14  ;;  %v4912_v28 = vsel %vm933_vm3, %v1004_v25, %v1005_v13  ;;  %v945_v36 = vrot.slane %v838_v20, 1  ;;  %v947_v37 = vrot.slane %v839_v31, 1  ;;  %v4990_v14 = vld [vmem:[#allocation2 + $0x48] sm:$0xff] }
 0x133   : > { %8859 = vst [vmem:[#allocation8_spill] sm:$0xff] %v4900_v19  ;;  %v4924_v40 = vsel %vm1110_vm4, %v1181_v39, %v1182_v34  ;;  %v4932_v42 = vsel %vm1110_vm4, %v1182_v34, %v1184_v38  ;;  %v1122_v50 = vrot.slane %v838_v20, 2  ;;  %v1124_v52 = vrot.slane %v839_v31, 2 }
 0x134   : > { %8860 = vst [vmem:[#allocation9_spill] sm:$0xff] %v4912_v28  ;;  %v4929_v41 = vsel %vm933_vm3, %v945_v36, %v947_v37  ;;  %v949_v31 = vrot.slane %v4990_v14, 1  ;;  %v1189_v37 = vrot.slane %v878_v62, 2 }
 0x135   : > { %1494 = vrot.lane.b32.xlu2 %v1120_v1, %s4390_s20  ;;  %v4954_v54 = vsel %vm1110_vm4, %v1121_v53, %v1122_v50  ;;  %v4959_v55 = vsel %vm1110_vm4, %v1122_v50, %v1124_v52  ;;  %v510_v58 = vpop.f32.mrf.mxu0 }
 0x136   : > { %1197 = vrot.lane.b32.xlu1 %v1120_v1, %s4386_s29  ;;  %705 = vrot.lane.b32.xlu0 %v507_v0, %s4387_s15  ;;  %8861 = vst [vmem:[#allocation10_spill] sm:$0xff] %v4954_v54 }
 0x137   : > { %8862 = vst [vmem:[#allocation11_spill] sm:$0xff] %v4959_v55 }
 0x138   : > { %v686_v3 = vpop.permute.xlu2 %685 }
 0x139   : > { %v774_v5 = vsel %vm765_vm5, %v613_v2, %v686_v3  ;;  %v877_v61 = vld [vmem:[#allocation2 + $0x170] sm:$0xff]  ;;  %v1012_v2 = vrot.slane %v878_v62, 1 }
 0x13a   : > { %807 = vst.msk [vmem:[#allocation2 + $0x79] sm:$0xff] %vm549_vm1, %v774_v5  ;;  %v1010_v1 = vrot.slane %v877_v61, 1  ;;  %v623_v62 = vld [vmem:[%s4818_s10 + $0x90] sm:$0xff] }
 0x13c   : > { %v4978_v5 = vsel %vm933_vm3, %v1010_v1, %v1012_v2 }
 0x13d   : > { %703 = vrot.lane.b32.xlu2 %v504_v56, %s4387_s15  ;;  %v619_v56 = vld [vmem:[%s4818_s10 + $0x70] sm:$0xff]  ;;  %v513_v3 = vpop.f32.mrf.mxu0  ;;  %8863 = vst [vmem:[#allocation12_spill] sm:$0xff] %v4978_v5 }
 0x13e   : > { %v730_v9 = vpop.permute.xlu0 %729  ;;  %1492 = vrot.lane.b32.xlu1 %v1118_v46, %s4390_s20  ;;  %1343 = vrot.lane.b32.xlu0 %v874_v8, %s4388_s13  ;;  %v944_v46 = vrot.slane %v837_v26, 1  ;;  %v618_v8 = vld [vmem:[%s4818_s10 + $0x68] sm:$0xff] }
 0x13f   : > { %v796_v12 = vsel %vm765_vm5, %v635_v7, %v730_v9  ;;  %v876_v7 = vld [vmem:[#allocation2 + $0x168] sm:$0xff] }
 0x140   : > { %829 = vst.msk [vmem:[#allocation2 + $0x181] sm:$0xff] %vm549_vm1, %v796_v12  ;;  %v4944_v47 = vsel %vm933_vm3, %v944_v46, %v945_v36  ;;  %v1009_v12 = vrot.slane %v876_v7, 1 }
 0x142   : > { %v4988_v13 = vsel %vm933_vm3, %v1009_v12, %v1010_v1 }
 0x143   : > { %8864 = vst [vmem:[#allocation13_spill] sm:$0xff] %v4988_v13 }
 0x145   : > { %1341 = vrot.lane.b32.xlu2 %v873_v16, %s4388_s13  ;;  %v4996_v16 = vld [vmem:[#allocation2 + $0x50] sm:$0xff] }
 0x146   : > { %v732_v21 = vpop.permute.xlu1 %731  ;;  %v682_v22 = vpop.permute.xlu0 %681  ;;  %1072 = vrot.lane.b32.xlu1 %v4900_v19, %s4385_s26  ;;  %1295 = vrot.lane.b32.xlu0 %v838_v20, %s4388_s13  ;;  %v950_v20 = vrot.slane %v4996_v16, 1  ;;  %v1127_v39 = vrot.slane %v4996_v16, 2 }
 0x147   : > { %v797_v23 = vsel %vm765_vm5, %v636_v17, %v732_v21  ;;  %v772_v24 = vsel %vm765_vm5, %v611_v18, %v682_v22  ;;  %v842_v17 = vld [vmem:[#allocation2 + $0x58] sm:$0x3]  ;;  %v1186_v22 = vrot.slane %v876_v7, 2 }
 0x148   : > { %830 = vst.msk [vmem:[#allocation2 + $0x189] sm:$0xff] %vm549_vm1, %v797_v23  ;;  %v952_v21 = vrot.slane %v842_v17, 1  ;;  %v1187_v23 = vrot.slane %v877_v61, 2 }
 0x149   : > { %805 = vst.msk [vmem:[#allocation2 + $0x61] sm:$0xff] %vm549_vm1, %v772_v24 }
 0x14a   : > { %v5004_v24 = vsel %vm933_vm3, %v950_v20, %v952_v21  ;;  %v5007_v25 = vsel %vm1110_vm4, %v1186_v22, %v1187_v23 }
 0x14d   : > { %1293 = vrot.lane.b32.xlu2 %v837_v26, %s4388_s13  ;;  %v620_v26 = vld [vmem:[%s4818_s10 + $0x78] sm:$0xff] }
 0x14e   : > { %v684_v29 = vpop.permute.xlu1 %683  ;;  %1443 = vrot.lane.b32.xlu1 %v4912_v28, %s4389_s17  ;;  %1070 = vrot.lane.b32.xlu0 %v4912_v28, %s4385_s26 }
 0x14f   : > { %v773_v32 = vsel %vm765_vm5, %v612_v27, %v684_v29 }
 0x150   : > { %806 = vst.msk [vmem:[#allocation2 + $0x69] sm:$0xff] %vm549_vm1, %v773_v32  ;;  %v692_v33 = vpop.permute.xlu2 %691  ;;  %v5022_v32 = vsel %vm933_vm3, %v949_v31, %v950_v20 }
 0x151   : > { %v777_v35 = vsel %vm765_vm5, %v616_v30, %v692_v33  ;;  %v621_v33 = vld [vmem:[%s4818_s10 + $0x80] sm:$0xff] }
 0x152   : > { %810 = vst.msk [vmem:[#allocation2 + $0x99] sm:$0xff] %vm549_vm1, %v777_v35 }
 0x155   : > { %1247 = vrot.lane.b32.xlu2 %v4924_v40, %s4386_s29 }
 0x156   : > { %1024 = vrot.lane.b32.xlu1 %v4929_v41, %s4385_s26  ;;  %1249 = vrot.lane.b32.xlu0 %v4932_v42, %s4386_s29 }
 0x158   : > { %v688_v44 = vpop.permute.xlu0 %687 }
 0x159   : > { %v775_v45 = vsel %vm765_vm5, %v614_v43, %v688_v44  ;;  %v1129_v43 = vrot.slane %v842_v17, 2  ;;  %v1126_v44 = vrot.slane %v4990_v14, 2 }
 0x15a   : > { %808 = vst.msk [vmem:[#allocation2 + $0x81] sm:$0xff] %vm549_vm1, %v775_v45  ;;  %v5038_v45 = vsel %vm1110_vm4, %v1187_v23, %v1189_v37 }
 0x15b   : > { %v5043_v46 = vsel %vm1110_vm4, %v1127_v39, %v1129_v43 }
 0x15c   : > { %8869 = vst [vmem:[#allocation18_spill] sm:$0xff] %v5043_v46 }
 0x15d   : > { %1445 = vrot.lane.b32.xlu2 %v4900_v19, %s4389_s17 }
 0x15e   : > { %1395 = vrot.lane.b32.xlu1 %v4944_v47, %s4389_s17  ;;  %1022 = vrot.lane.b32.xlu0 %v4944_v47, %s4385_s26 }
 0x160   : > { %v690_v49 = vpop.permute.xlu1 %689 }
 0x161   : > { %v776_v51 = vsel %vm765_vm5, %v615_v48, %v690_v49  ;;  %v5046_v48 = vsel %vm1110_vm4, %v1126_v44, %v1127_v39  ;;  %v622_v49 = vld [vmem:[%s4818_s10 + $0x88] sm:$0xff] }
 0x162   : > { %809 = vst.msk [vmem:[#allocation2 + $0x91] sm:$0xff] %vm549_vm1, %v776_v51 }
 0x163   : > { %8870 = vst [vmem:[#allocation19_spill] sm:$0xff] %v5046_v48 }
 0x165   : > { %1199 = vrot.lane.b32.xlu2 %v4954_v54, %s4386_s29 }
 0x166   : > { %1498 = vrot.lane.b32.xlu1 %v4959_v55, %s4390_s20  ;;  %1201 = vrot.lane.b32.xlu0 %v4959_v55, %s4386_s29 }
 0x168   : > { %v698_v57 = vpop.permute.xlu2 %697 }
 0x169   : > { %v780_v59 = vsel %vm765_vm5, %v619_v56, %v698_v57  ;;  %v516_v56 = vpop.f32.mrf.mxu0 }
 0x16a   : > { %813 = vst.msk [vmem:[#allocation2 + $0xc1] sm:$0xff] %vm549_vm1, %v780_v59 }
 0x16d   : > { %1397 = vrot.lane.b32.xlu2 %v4929_v41, %s4389_s17 }
 0x16e   : > { %1496 = vrot.lane.b32.xlu0 %v4954_v54, %s4390_s20  ;;  %707 = vrot.lane.b32.xlu1 %v510_v58, %s4387_s15 }
 0x170   : > { %v694_v63 = vpop.permute.xlu0 %693 }
 0x171   : > { %v778_v0 = vsel %vm765_vm5, %v617_v60, %v694_v63  ;;  %v519_v60 = vpop.f32.mrf.mxu0 }
 0x172   : > { %811 = vst.msk [vmem:[#allocation2 + $0xa9] sm:$0xff] %vm549_vm1, %v778_v0 }
 0x175   : > { %709 = vrot.lane.b32.xlu2 %v513_v3, %s4387_s15  ;;  %v5086_v3 = vld [vmem:[#allocation2 + $0x60] sm:$0xff] }
 0x176   : > { %1076 = vrot.lane.b32.xlu0 %v4978_v5, %s4385_s26  ;;  %1345 = vrot.lane.b32.xlu1 %v876_v7, %s4388_s13  ;;  %v5088_v7 = vld [vmem:[#allocation2 + $0x188] sm:$0xff]  ;;  %v1131_v39 = vrot.slane %v5086_v3, 2  ;;  %v954_v43 = vrot.slane %v5086_v3, 1 }
 0x177   : > { %v1387_v20 = vrot.slane %v5088_v7, 1 }
 0x178   : > { %v696_v9 = vpop.permute.xlu1 %695 }
 0x179   : > { %v779_v10 = vsel %vm765_vm5, %v618_v8, %v696_v9  ;;  %v5094_v8 = vld [vmem:[#allocation2 + $0x190] sm:$0x3] }
 0x17a   : > { %812 = vst.msk [vmem:[#allocation2 + $0xb1] sm:$0xff] %vm549_vm1, %v779_v10  ;;  %v1389_v21 = vrot.slane %v5094_v8, 1 }
 0x17c   : > { %v5111_v23 = vsel %vm933_vm3, %v1387_v20, %v1389_v21 }
 0x17d   : > { %1347 = vrot.lane.b32.xlu2 %v877_v61, %s4388_s13  ;;  %v5072_v61 = vld [vmem:[#allocation2 + $0x180] sm:$0xff]  ;;  %8882 = vst [vmem:[#allocation31_spill] sm:$0xff] %v5111_v23 }
 0x17e   : > { %1447 = vrot.lane.b32.xlu0 %v4988_v13, %s4389_s17  ;;  %1297 = vrot.lane.b32.xlu1 %v4990_v14, %s4388_s13  ;;  %v1386_v17 = vrot.slane %v5072_v61, 1 }
 0x17f   : > { %v4998_v18 = vpop.permute.xlu2 %1020 }
 0x180   : > { %8865 = vst [vmem:[#allocation14_spill] sm:$0xff] %v4998_v18  ;;  %v5106_v22 = vsel %vm933_vm3, %v1386_v17, %v1387_v20 }
 0x181   : > { %8881 = vst [vmem:[#allocation30_spill] sm:$0xff] %v5106_v22 }
 0x185   : > { %1299 = vrot.lane.b32.xlu2 %v4996_v16, %s4388_s13 }
 0x186   : > { %1028 = vrot.lane.b32.xlu0 %v5004_v24, %s4385_s26  ;;  %1251 = vrot.lane.b32.xlu1 %v5007_v25, %s4386_s29 }
 0x187   : > { %v5014_v27 = vpop.permute.xlu2 %1391 }
 0x188   : > { %8866 = vst [vmem:[#allocation15_spill] sm:$0xff] %v5014_v27  ;;  %v700_v29 = vpop.permute.xlu0 %699 }
 0x189   : > { %v781_v30 = vsel %vm765_vm5, %v620_v26, %v700_v29  ;;  %v5113_v26 = vld [vmem:[#allocation2 + $0x68] sm:$0xff]  ;;  %v845_v29 = vld [vmem:[#allocation2 + $0x70] sm:$0x3] }
 0x18a   : > { %814 = vst.msk [vmem:[#allocation2 + $0xc9] sm:$0xff] %vm549_vm1, %v781_v30  ;;  %v957_v37 = vrot.slane %v845_v29, 1 }
 0x18d   : > { %1074 = vrot.lane.b32.xlu2 %v4988_v13, %s4385_s26 }
 0x18e   : > { %1399 = vrot.lane.b32.xlu0 %v5022_v32, %s4389_s17  ;;  %1449 = vrot.lane.b32.xlu1 %v4978_v5, %s4389_s17 }
 0x18f   : > { %v5029_v34 = vpop.permute.xlu2 %1494 }
 0x190   : > { %8867 = vst [vmem:[#allocation16_spill] sm:$0xff] %v5029_v34  ;;  %v5031_v35 = vpop.permute.xlu0 %1289  ;;  %v702_v36 = vpop.permute.xlu1 %701 }
 0x191   : > { %8868 = vst [vmem:[#allocation17_spill] sm:$0xff] %v5031_v35  ;;  %v782_v38 = vsel %vm765_vm5, %v621_v33, %v702_v36  ;;  %v955_v36 = vrot.slane %v5113_v26, 1 }
 0x192   : > { %815 = vst.msk [vmem:[#allocation2 + $0xd9] sm:$0xff] %vm549_vm1, %v782_v38  ;;  %v1132_v38 = vrot.slane %v5113_v26, 2 }
 0x193   : > { %v5130_v44 = vsel %vm933_vm3, %v955_v36, %v957_v37  ;;  %v5171_v37 = vld [vmem:[#allocation2 + $0x80] sm:$0xff] }
 0x195   : > { %1253 = vrot.lane.b32.xlu2 %v5038_v45, %s4386_s29 }
 0x196   : > { %1502 = vrot.lane.b32.xlu0 %v5043_v46, %s4390_s20  ;;  %1203 = vrot.lane.b32.xlu1 %v5046_v48, %s4386_s29 }
 0x197   : > { %v704_v50 = vpop.permute.xlu2 %703 }
 0x198   : > { %v783_v51 = vsel %vm765_vm5, %v622_v49, %v704_v50  ;;  %v5054_v52 = vpop.permute.xlu0 %1195  ;;  %v5056_v53 = vpop.permute.xlu1 %1291  ;;  %v5135_v49 = vsel %vm1110_vm4, %v1131_v39, %v1132_v38  ;;  %v5138_v50 = vsel %vm933_vm3, %v954_v43, %v955_v36 }
 0x199   : > { %8871 = vst [vmem:[#allocation20_spill] sm:$0xff] %v5054_v52 }
 0x19a   : > { %8872 = vst [vmem:[#allocation21_spill] sm:$0xff] %v5056_v53 }
 0x19b   : > { %816 = vst.msk [vmem:[#allocation2 + $0xe1] sm:$0xff] %vm549_vm1, %v783_v51 }
 0x19c   : > { %8886 = vst [vmem:[#allocation35_spill] sm:$0xff] %v5135_v49 }
 0x19d   : > { %1026 = vrot.lane.b32.xlu2 %v5022_v32, %s4385_s26 }
 0x19e   : > { %1401 = vrot.lane.b32.xlu1 %v5004_v24, %s4389_s17  ;;  %711 = vrot.lane.b32.xlu0 %v516_v56, %s4387_s15 }
 0x19f   : > { %v5064_v57 = vpop.permute.xlu2 %1341 }
 0x1a0   : > { %8873 = vst [vmem:[#allocation22_spill] sm:$0xff] %v5064_v57  ;;  %v5066_v58 = vpop.permute.xlu0 %1393  ;;  %v5068_v59 = vpop.permute.xlu1 %1018  ;;  %v1137_v57 = vrot.slane %v5171_v37, 2 }
 0x1a1   : > { %8874 = vst [vmem:[#allocation23_spill] sm:$0xff] %v5066_v58 }
 0x1a2   : > { %8875 = vst [vmem:[#allocation24_spill] sm:$0xff] %v5068_v59 }
 0x1a5   : > { %1205 = vrot.lane.b32.xlu2 %v5043_v46, %s4386_s29 }
 0x1a6   : > { %1349 = vrot.lane.b32.xlu0 %v5072_v61, %s4388_s13  ;;  %713 = vrot.lane.b32.xlu1 %v519_v60, %s4387_s15 }
 0x1a7   : > { %v5078_v63 = vpop.permute.xlu2 %1293 }
 0x1a8   : > { %8876 = vst [vmem:[#allocation25_spill] sm:$0xff] %v5078_v63  ;;  %v5080_v0 = vpop.permute.xlu1 %1197  ;;  %v706_v1 = vpop.permute.xlu0 %705 }
 0x1a9   : > { %8877 = vst [vmem:[#allocation26_spill] sm:$0xff] %v5080_v0  ;;  %v784_v2 = vsel %vm765_vm5, %v623_v62, %v706_v1  ;;  %v522_v62 = vpop.f32.mrf.mxu0  ;;  %v1134_v1 = vrot.slane %v845_v29, 2  ;;  %v625_v29 = vld [vmem:[%s4818_s10 + $0xa0] sm:$0xff] }
 0x1aa   : > { %817 = vst.msk [vmem:[#allocation2 + $0xf1] sm:$0xff] %vm549_vm1, %v784_v2 }
 0x1ab   : > { %v5153_v2 = vsel %vm1110_vm4, %v1132_v38, %v1134_v1  ;;  %v848_v38 = vld [vmem:[#allocation2 + $0x88] sm:$0x3] }
 0x1ac   : > { %8890 = vst [vmem:[#allocation39_spill] sm:$0xff] %v5153_v2 }
 0x1ad   : > { %1500 = vrot.lane.b32.xlu2 %v5046_v48, %s4390_s20 }
 0x1ae   : > { %1301 = vrot.lane.b32.xlu0 %v5086_v3, %s4388_s13  ;;  %1351 = vrot.lane.b32.xlu1 %v5088_v7, %s4388_s13 }
 0x1af   : > { %v5096_v9 = vpop.permute.xlu2 %1247 }
 0x1b0   : > { %8878 = vst [vmem:[#allocation27_spill] sm:$0xff] %v5096_v9  ;;  %v5098_v10 = vpop.permute.xlu1 %1492  ;;  %v5100_v12 = vpop.permute.xlu0 %1343  ;;  %v962_v9 = vrot.slane %v848_v38, 1 }
 0x1b1   : > { %8879 = vst [vmem:[#allocation28_spill] sm:$0xff] %v5098_v10  ;;  %v525_v36 = vpop.f32.mrf.mxu0 }
 0x1b2   : > { %8880 = vst [vmem:[#allocation29_spill] sm:$0xff] %v5100_v12 }
 0x1b5   : > { %1451 = vrot.lane.b32.xlu2 %v5106_v22, %s4389_s17 }
 0x1b6   : > { %1453 = vrot.lane.b32.xlu0 %v5111_v23, %s4389_s17  ;;  %1303 = vrot.lane.b32.xlu1 %v5113_v26, %s4388_s13 }
 0x1b7   : > { %v5119_v30 = vpop.permute.xlu2 %1445 }
 0x1b8   : > { %8883 = vst [vmem:[#allocation32_spill] sm:$0xff] %v5119_v30  ;;  %v5121_v31 = vpop.permute.xlu1 %1072  ;;  %v5123_v33 = vpop.permute.xlu0 %1295 }
 0x1b9   : > { %8884 = vst [vmem:[#allocation33_spill] sm:$0xff] %v5121_v31 }
 0x1ba   : > { %8885 = vst [vmem:[#allocation34_spill] sm:$0xff] %v5123_v33 }
 0x1bd   : > { %1032 = vrot.lane.b32.xlu2 %v5130_v44, %s4385_s26 }
 0x1be   : > { %1207 = vrot.lane.b32.xlu0 %v5135_v49, %s4386_s29  ;;  %1030 = vrot.lane.b32.xlu1 %v5138_v50, %s4385_s26 }
 0x1bf   : > { %v5144_v51 = vpop.permute.xlu2 %1199 }
 0x1c0   : > { %8887 = vst [vmem:[#allocation36_spill] sm:$0xff] %v5144_v51  ;;  %v5146_v56 = vpop.permute.xlu1 %1443  ;;  %v5148_v60 = vpop.permute.xlu0 %1070 }
 0x1c1   : > { %8888 = vst [vmem:[#allocation37_spill] sm:$0xff] %v5146_v56 }
 0x1c2   : > { %8889 = vst [vmem:[#allocation38_spill] sm:$0xff] %v5148_v60  ;;  %v5194_v60 = vld [vmem:[#allocation2 + $0x78] sm:$0xff] }
 0x1c3   : > { %v959_v30 = vrot.slane %v5194_v60, 1 }
 0x1c5   : > { %1403 = vrot.lane.b32.xlu2 %v5138_v50, %s4389_s17 }
 0x1c6   : > { %1405 = vrot.lane.b32.xlu0 %v5130_v44, %s4389_s17  ;;  %1209 = vrot.lane.b32.xlu1 %v5153_v2, %s4386_s29 }
 0x1c7   : > { %v5159_v17 = vpop.permute.xlu2 %1397 }
 0x1c8   : > { %8891 = vst [vmem:[#allocation40_spill] sm:$0xff] %v5159_v17  ;;  %v5161_v20 = vpop.permute.xlu1 %1024  ;;  %v5163_v21 = vpop.permute.xlu0 %1249 }
 0x1c9   : > { %8892 = vst [vmem:[#allocation41_spill] sm:$0xff] %v5161_v20  ;;  %v1139_v20 = vrot.slane %v848_v38, 2 }
 0x1ca   : > { %8893 = vst [vmem:[#allocation42_spill] sm:$0xff] %v5163_v21  ;;  %v960_v21 = vrot.slane %v5171_v37, 1 }
 0x1cd   : > { %1506 = vrot.lane.b32.xlu2 %v5153_v2, %s4390_s20 }
 0x1ce   : > { %1504 = vrot.lane.b32.xlu1 %v5135_v49, %s4390_s20  ;;  %717 = vrot.lane.b32.xlu0 %v525_v36, %s4387_s15  ;;  %v5182_v36 = vsel %vm933_vm3, %v960_v21, %v962_v9  ;;  %v5200_v9 = vsel %vm933_vm3, %v959_v30, %v960_v21  ;;  %v1136_v30 = vrot.slane %v5194_v60, 2 }
 0x1cf   : > { %v710_v39 = vpop.permute.xlu2 %709 }
 0x1d0   : > { %v786_v43 = vsel %vm765_vm5, %v625_v29, %v710_v39  ;;  %v5174_v1 = vpop.permute.xlu1 %1395  ;;  %v5176_v31 = vpop.permute.xlu0 %1022  ;;  %v5216_v21 = vsel %vm1110_vm4, %v1136_v30, %v1137_v57 }
 0x1d1   : > { %8894 = vst [vmem:[#allocation43_spill] sm:$0xff] %v5174_v1 }
 0x1d2   : > { %8895 = vst [vmem:[#allocation44_spill] sm:$0xff] %v5176_v31 }
 0x1d3   : > { %819 = vst.msk [vmem:[#allocation2 + $0x109] sm:$0xff] %vm549_vm1, %v786_v43 }
 0x1d4   : > { %8901 = vst [vmem:[#allocation50_spill] sm:$0xff] %v5216_v21 }
 0x1d5   : > { %715 = vrot.lane.b32.xlu2 %v522_v62, %s4387_s15  ;;  %v624_v62 = vld [vmem:[%s4818_s10 + $0x98] sm:$0xff]  ;;  %s4391_s15 = smov 48  }
 0x1d6   : > { %1036 = vrot.lane.b32.xlu1 %v5182_v36, %s4385_s26  ;;  %1307 = vrot.lane.b32.xlu0 %v5171_v37, %s4388_s13 }
 0x1d7   : > { %v5188_v29 = vpop.permute.xlu2 %1347 }
 0x1d8   : > { %8896 = vst [vmem:[#allocation45_spill] sm:$0xff] %v5188_v29  ;;  %v5190_v39 = vpop.permute.xlu1 %1498  ;;  %v5192_v43 = vpop.permute.xlu0 %1201 }
 0x1d9   : > { %8897 = vst [vmem:[#allocation46_spill] sm:$0xff] %v5190_v39 }
 0x1da   : > { %8898 = vst [vmem:[#allocation47_spill] sm:$0xff] %v5192_v43 }
 0x1dd   : > { %1305 = vrot.lane.b32.xlu2 %v5194_v60, %s4388_s13 }
 0x1de   : > { %1407 = vrot.lane.b32.xlu1 %v5200_v9, %s4389_s17  ;;  %1034 = vrot.lane.b32.xlu0 %v5200_v9, %s4385_s26 }
 0x1df   : > { %v5207_v29 = vpop.permute.xlu2 %1299 }
 0x1e0   : > { %8899 = vst [vmem:[#allocation48_spill] sm:$0xff] %v5207_v29  ;;  %v5209_v12 = vpop.permute.xlu0 %1496  ;;  %v708_v56 = vpop.permute.xlu1 %707  ;;  %v5221_v29 = vsel %vm1110_vm4, %v1137_v57, %v1139_v20  ;;  %v5241_v57 = vld [vmem:[#allocation2 + $0x98] sm:$0xff] }
 0x1e1   : > { %8900 = vst [vmem:[#allocation49_spill] sm:$0xff] %v5209_v12  ;;  %v785_v43 = vsel %vm765_vm5, %v624_v62, %v708_v56  ;;  %v5235_v62 = vld [vmem:[#allocation2 + $0x90] sm:$0xff]  ;;  %v1142_v51 = vrot.slane %v5241_v57, 2  ;;  %v965_v31 = vrot.slane %v5241_v57, 1  ;;  %v854_v12 = vld [vmem:[#allocation2 + $0xb8] sm:$0x3] }
 0x1e2   : > { %818 = vst.msk [vmem:[#allocation2 + $0xf9] sm:$0xff] %vm549_vm1, %v785_v43  ;;  %v964_v0 = vrot.slane %v5235_v62, 1  ;;  %v972_v63 = vrot.slane %v854_v12, 1  ;;  %v1149_v59 = vrot.slane %v854_v12, 2 }
 0x1e3   : > { %8902 = vst [vmem:[#allocation51_spill] sm:$0xff] %v5221_v29 }
 0x1e5   : > { %1211 = vrot.lane.b32.xlu2 %v5216_v21, %s4386_s29 }
 0x1e6   : > { %1510 = vrot.lane.b32.xlu1 %v5221_v29, %s4390_s20  ;;  %1213 = vrot.lane.b32.xlu0 %v5221_v29, %s4386_s29 }
 0x1e7   : > { %v5227_v56 = vpop.permute.xlu2 %1074 }
 0x1e8   : > { %8903 = vst [vmem:[#allocation52_spill] sm:$0xff] %v5227_v56  ;;  %v5229_v38 = vpop.permute.xlu0 %1076  ;;  %v5231_v43 = vpop.permute.xlu1 %1345  ;;  %v851_v56 = vld [vmem:[#allocation2 + $0xa0] sm:$0x3] }
 0x1e9   : > { %8904 = vst [vmem:[#allocation53_spill] sm:$0xff] %v5229_v38  ;;  %v967_v39 = vrot.slane %v851_v56, 1 }
 0x1ea   : > { %8905 = vst [vmem:[#allocation54_spill] sm:$0xff] %v5231_v43  ;;  %v1141_v43 = vrot.slane %v5235_v62, 2 }
 0x1ec   : > { %v5255_v17 = vsel %vm1110_vm4, %v1141_v43, %v1142_v51  ;;  %v5272_v43 = vsel %vm933_vm3, %v964_v0, %v965_v31  ;;  %v5291_v0 = vld [vmem:[#allocation2 + $0xb0] sm:$0xff] }
 0x1ed   : > { %1409 = vrot.lane.b32.xlu2 %v5182_v36, %s4389_s17  ;;  %8909 = vst [vmem:[#allocation58_spill] sm:$0xff] %v5255_v17 }
 0x1ee   : > { %1309 = vrot.lane.b32.xlu1 %v5235_v62, %s4388_s13  ;;  %1508 = vrot.lane.b32.xlu0 %v5216_v21, %s4390_s20 }
 0x1ef   : > { %v5243_v20 = vpop.permute.xlu2 %1253 }
 0x1f0   : > { %8906 = vst [vmem:[#allocation55_spill] sm:$0xff] %v5243_v20  ;;  %v5245_v30 = vpop.permute.xlu0 %1447  ;;  %v5247_v38 = vpop.permute.xlu1 %1297  ;;  %v5258_v20 = vsel %vm933_vm3, %v965_v31, %v967_v39 }
 0x1f1   : > { %8907 = vst [vmem:[#allocation56_spill] sm:$0xff] %v5245_v30 }
 0x1f2   : > { %8908 = vst [vmem:[#allocation57_spill] sm:$0xff] %v5247_v38 }
 0x1f5   : > { %1311 = vrot.lane.b32.xlu2 %v5241_v57, %s4388_s13 }
 0x1f6   : > { %1215 = vrot.lane.b32.xlu1 %v5255_v17, %s4386_s29  ;;  %1040 = vrot.lane.b32.xlu0 %v5258_v20, %s4385_s26 }
 0x1f7   : > { %v5264_v30 = vpop.permute.xlu2 %1026 }
 0x1f8   : > { %8910 = vst [vmem:[#allocation59_spill] sm:$0xff] %v5264_v30  ;;  %v5266_v38 = vpop.permute.xlu0 %1028  ;;  %v5268_v33 = vpop.permute.xlu1 %1251 }
 0x1f9   : > { %8911 = vst [vmem:[#allocation60_spill] sm:$0xff] %v5266_v38 }
 0x1fa   : > { %8912 = vst [vmem:[#allocation61_spill] sm:$0xff] %v5268_v33  ;;  %v1144_v33 = vrot.slane %v851_v56, 2 }
 0x1fc   : > { %v5287_v18 = vsel %vm1110_vm4, %v1142_v51, %v1144_v33  ;;  %v5303_v33 = vld [vmem:[#allocation2 + $0xa8] sm:$0xff]  ;;  %v970_v51 = vrot.slane %v5291_v0, 1 }
 0x1fd   : > { %1038 = vrot.lane.b32.xlu2 %v5272_v43, %s4385_s26  ;;  %8916 = vst [vmem:[#allocation65_spill] sm:$0xff] %v5287_v18  ;;  %v1146_v34 = vrot.slane %v5303_v33, 2 }
 0x1fe   : > { %1413 = vrot.lane.b32.xlu1 %v5258_v20, %s4389_s17  ;;  %1411 = vrot.lane.b32.xlu0 %v5272_v43, %s4389_s17  ;;  %v5326_v58 = vsel %vm933_vm3, %v970_v51, %v972_v63 }
 0x1ff   : > { %v5280_v39 = vpop.permute.xlu2 %1205 }
 0x200   : > { %8913 = vst [vmem:[#allocation62_spill] sm:$0xff] %v5280_v39  ;;  %v5282_v30 = vpop.permute.xlu0 %1399  ;;  %v5284_v38 = vpop.permute.xlu1 %1449 }
 0x201   : > { %8914 = vst [vmem:[#allocation63_spill] sm:$0xff] %v5282_v30 }
 0x202   : > { %8915 = vst [vmem:[#allocation64_spill] sm:$0xff] %v5284_v38  ;;  %v969_v38 = vrot.slane %v5303_v33, 1 }
 0x204   : > { %v5310_v30 = vsel %vm933_vm3, %v969_v38, %v970_v51  ;;  %v1147_v38 = vrot.slane %v5291_v0, 2 }
 0x205   : > { %1217 = vrot.lane.b32.xlu2 %v5287_v18, %s4386_s29 }
 0x206   : > { %1315 = vrot.lane.b32.xlu1 %v5291_v0, %s4388_s13  ;;  %1514 = vrot.lane.b32.xlu0 %v5287_v18, %s4390_s20 }
 0x207   : > { %v5297_v31 = vpop.permute.xlu2 %1500 }
 0x208   : > { %8917 = vst [vmem:[#allocation66_spill] sm:$0xff] %v5297_v31  ;;  %v5299_v39 = vpop.permute.xlu0 %1502  ;;  %v5301_v56 = vpop.permute.xlu1 %1203 }
 0x209   : > { %8918 = vst [vmem:[#allocation67_spill] sm:$0xff] %v5299_v39 }
 0x20a   : > { %8919 = vst [vmem:[#allocation68_spill] sm:$0xff] %v5301_v56  ;;  %v626_v56 = vld [vmem:[%s4818_s10 + $0xa8] sm:$0xff] }
 0x20d   : > { %1512 = vrot.lane.b32.xlu2 %v5255_v17, %s4390_s20 }
 0x20e   : > { %1042 = vrot.lane.b32.xlu1 %v5310_v30, %s4385_s26  ;;  %1313 = vrot.lane.b32.xlu0 %v5303_v33, %s4388_s13 }
 0x20f   : > { %v5317_v39 = vpop.permute.xlu2 %1451 }
 0x210   : > { %8920 = vst [vmem:[#allocation69_spill] sm:$0xff] %v5317_v39  ;;  %v5319_v31 = vpop.permute.xlu1 %1401  ;;  %v712_v1 = vpop.permute.xlu0 %711  ;;  %v5331_v39 = vsel %vm1110_vm4, %v1147_v38, %v1149_v59  ;;  %v857_v59 = vld [vmem:[#allocation2 + $0xd0] sm:$0x3] }
 0x211   : > { %8921 = vst [vmem:[#allocation70_spill] sm:$0xff] %v5319_v31  ;;  %v787_v52 = vsel %vm765_vm5, %v626_v56, %v712_v1  ;;  %v5334_v31 = vsel %vm1110_vm4, %v1146_v34, %v1147_v38  ;;  %v5353_v34 = vld [vmem:[#allocation2 + $0xc8] sm:$0xff] }
 0x212   : > { %820 = vst.msk [vmem:[#allocation2 + $0x111] sm:$0xff] %vm549_vm1, %v787_v52  ;;  %v627_v52 = vld [vmem:[%s4818_s10 + $0xb0] sm:$0xff]  ;;  %v1152_v11 = vrot.slane %v5353_v34, 2 }
 0x213   : > { %8922 = vst [vmem:[#allocation71_spill] sm:$0xff] %v5331_v39 }
 0x214   : > { %8923 = vst [vmem:[#allocation72_spill] sm:$0xff] %v5334_v31 }
 0x215   : > { %1044 = vrot.lane.b32.xlu2 %v5326_v58, %s4385_s26 }
 0x216   : > { %1221 = vrot.lane.b32.xlu1 %v5331_v39, %s4386_s29  ;;  %1219 = vrot.lane.b32.xlu0 %v5334_v31, %s4386_s29 }
 0x217   : > { %v5341_v12 = vpop.permute.xlu2 %1032 }
 0x218   : > { %8924 = vst [vmem:[#allocation73_spill] sm:$0xff] %v5341_v12  ;;  %v5343_v63 = vpop.permute.xlu0 %1349  ;;  %v714_v1 = vpop.permute.xlu1 %713 }
 0x219   : > { %8925 = vst [vmem:[#allocation74_spill] sm:$0xff] %v5343_v63  ;;  %v788_v56 = vsel %vm765_vm5, %v627_v52, %v714_v1  ;;  %v975_v1 = vrot.slane %v5353_v34, 1 }
 0x21a   : > { %821 = vst.msk [vmem:[#allocation2 + $0x121] sm:$0xff] %vm549_vm1, %v788_v56  ;;  %v977_v56 = vrot.slane %v857_v59, 1 }
 0x21c   : > { %v5365_v63 = vsel %vm933_vm3, %v975_v1, %v977_v56 }
 0x21d   : > { %1415 = vrot.lane.b32.xlu2 %v5310_v30, %s4389_s17 }
 0x21e   : > { %1516 = vrot.lane.b32.xlu1 %v5334_v31, %s4390_s20  ;;  %1417 = vrot.lane.b32.xlu0 %v5326_v58, %s4389_s17 }
 0x21f   : > { %v5355_v51 = vpop.permute.xlu2 %1403 }
 0x220   : > { %8926 = vst [vmem:[#allocation75_spill] sm:$0xff] %v5355_v51  ;;  %v5357_v38 = vpop.permute.xlu0 %1301  ;;  %v5359_v52 = vpop.permute.xlu1 %1351 }
 0x221   : > { %8927 = vst [vmem:[#allocation76_spill] sm:$0xff] %v5357_v38  ;;  %v5377_v38 = vld [vmem:[#allocation2 + $0xc0] sm:$0xff] }
 0x222   : > { %8928 = vst [vmem:[#allocation77_spill] sm:$0xff] %v5359_v52  ;;  %v974_v53 = vrot.slane %v5377_v38, 1 }
 0x224   : > { %v5383_v56 = vsel %vm933_vm3, %v974_v53, %v975_v1  ;;  %v1154_v53 = vrot.slane %v857_v59, 2  ;;  %v1151_v1 = vrot.slane %v5377_v38, 2 }
 0x225   : > { %1518 = vrot.lane.b32.xlu2 %v5331_v39, %s4390_s20 }
 0x226   : > { %1048 = vrot.lane.b32.xlu1 %v5365_v63, %s4385_s26  ;;  %1319 = vrot.lane.b32.xlu0 %v5353_v34, %s4388_s13  ;;  %v5399_v27 = vsel %vm1110_vm4, %v1151_v1, %v1152_v11  ;;  %v5418_v1 = vld [vmem:[#allocation2 + $0xd8] sm:$0xff] }
 0x227   : > { %v5371_v12 = vpop.permute.xlu2 %1506  ;;  %8934 = vst [vmem:[#allocation83_spill] sm:$0xff] %v5399_v27 }
 0x228   : > { %8929 = vst [vmem:[#allocation78_spill] sm:$0xff] %v5371_v12  ;;  %v5373_v51 = vpop.permute.xlu0 %1453  ;;  %v5375_v52 = vpop.permute.xlu1 %1303 }
 0x229   : > { %8930 = vst [vmem:[#allocation79_spill] sm:$0xff] %v5373_v51 }
 0x22a   : > { %8931 = vst [vmem:[#allocation80_spill] sm:$0xff] %v5375_v52 }
 0x22d   : > { %1317 = vrot.lane.b32.xlu2 %v5377_v38, %s4388_s13 }
 0x22e   : > { %1419 = vrot.lane.b32.xlu1 %v5383_v56, %s4389_s17  ;;  %1046 = vrot.lane.b32.xlu0 %v5383_v56, %s4385_s26 }
 0x22f   : > { %v716_v51 = vpop.permute.xlu2 %715 }
 0x230   : > { %v789_v12 = vsel %vm765_vm5, %v628_v6, %v716_v51  ;;  %v5391_v52 = vpop.permute.xlu0 %1207  ;;  %v5393_v10 = vpop.permute.xlu1 %1030  ;;  %v5404_v6 = vsel %vm1110_vm4, %v1152_v11, %v1154_v53  ;;  %v629_v11 = vld [vmem:[%s4818_s10 + $0xc0] sm:$0xff] }
 0x231   : > { %8932 = vst [vmem:[#allocation81_spill] sm:$0xff] %v5391_v52  ;;  %v5425_v53 = vld [vmem:[#allocation2 + $0xe0] sm:$0xff]  ;;  %v860_v52 = vld [vmem:[#allocation2 + $0xe8] sm:$0x3] }
 0x232   : > { %8933 = vst [vmem:[#allocation82_spill] sm:$0xff] %v5393_v10  ;;  %v1157_v35 = vrot.slane %v5425_v53, 2  ;;  %v980_v15 = vrot.slane %v5425_v53, 1  ;;  %v982_v4 = vrot.slane %v860_v52, 1 }
 0x233   : > { %822 = vst.msk [vmem:[#allocation2 + $0x129] sm:$0xff] %vm549_vm1, %v789_v12 }
 0x234   : > { %8935 = vst [vmem:[#allocation84_spill] sm:$0xff] %v5404_v6 }
 0x235   : > { %1223 = vrot.lane.b32.xlu2 %v5399_v27, %s4386_s29 }
 0x236   : > { %1522 = vrot.lane.b32.xlu1 %v5404_v6, %s4390_s20  ;;  %1225 = vrot.lane.b32.xlu0 %v5404_v6, %s4386_s29  ;;  %v1156_v6 = vrot.slane %v5418_v1, 2 }
 0x237   : > { %v5410_v51 = vpop.permute.xlu2 %1305 }
 0x238   : > { %8936 = vst [vmem:[#allocation85_spill] sm:$0xff] %v5410_v51  ;;  %v5412_v12 = vpop.permute.xlu0 %1405  ;;  %v5414_v59 = vpop.permute.xlu1 %1209  ;;  %v5439_v39 = vsel %vm1110_vm4, %v1156_v6, %v1157_v35 }
 0x239   : > { %8937 = vst [vmem:[#allocation86_spill] sm:$0xff] %v5412_v12 }
 0x23a   : > { %8938 = vst [vmem:[#allocation87_spill] sm:$0xff] %v5414_v59 }
 0x23b   : > { %8941 = vst [vmem:[#allocation90_spill] sm:$0xff] %v5439_v39 }
 0x23d   : > { %1421 = vrot.lane.b32.xlu2 %v5365_v63, %s4389_s17 }
 0x23e   : > { %1321 = vrot.lane.b32.xlu1 %v5418_v1, %s4388_s13  ;;  %1520 = vrot.lane.b32.xlu0 %v5399_v27, %s4390_s20 }
 0x23f   : > { %v5427_v51 = vpop.permute.xlu2 %1211 }
 0x240   : > { %8939 = vst [vmem:[#allocation88_spill] sm:$0xff] %v5427_v51  ;;  %v5429_v10 = vpop.permute.xlu1 %1504  ;;  %v718_v59 = vpop.permute.xlu0 %717  ;;  %v5442_v51 = vsel %vm933_vm3, %v980_v15, %v982_v4 }
 0x241   : > { %8940 = vst [vmem:[#allocation89_spill] sm:$0xff] %v5429_v10  ;;  %v790_v12 = vsel %vm765_vm5, %v629_v11, %v718_v59  ;;  %v979_v10 = vrot.slane %v5418_v1, 1 }
 0x242   : > { %823 = vst.msk [vmem:[#allocation2 + $0x139] sm:$0xff] %vm549_vm1, %v790_v12 }
 0x243   : > { %v5456_v6 = vsel %vm933_vm3, %v979_v10, %v980_v15  ;;  %v5475_v15 = vld [vmem:[#allocation2 + $0xf8] sm:$0xff]  ;;  %v5477_v10 = vld [vmem:[#allocation2 + $0xf0] sm:$0xff] }
 0x244   : > { %v1161_v31 = vrot.slane %v5477_v10, 2 }
 0x245   : > { %1323 = vrot.lane.b32.xlu2 %v5425_v53, %s4388_s13 }
 0x246   : > { %1227 = vrot.lane.b32.xlu1 %v5439_v39, %s4386_s29  ;;  %1052 = vrot.lane.b32.xlu0 %v5442_v51, %s4385_s26 }
 0x247   : > { %v5448_v59 = vpop.permute.xlu2 %1409 }
 0x248   : > { %8942 = vst [vmem:[#allocation91_spill] sm:$0xff] %v5448_v59  ;;  %v5450_v12 = vpop.permute.xlu1 %1036  ;;  %v5452_v11 = vpop.permute.xlu0 %1307 }
 0x249   : > { %8943 = vst [vmem:[#allocation92_spill] sm:$0xff] %v5450_v12  ;;  %v5630_v28 = vld [vmem:[#allocation2 + $0x138] sm:$0xff] }
 0x24a   : > { %8944 = vst [vmem:[#allocation93_spill] sm:$0xff] %v5452_v11  ;;  %v1159_v11 = vrot.slane %v860_v52, 2 }
 0x24c   : > { %v5471_v27 = vsel %vm1110_vm4, %v1157_v35, %v1159_v11  ;;  %v985_v35 = vrot.slane %v5475_v15, 1  ;;  %v1162_v11 = vrot.slane %v5475_v15, 2 }
 0x24d   : > { %1050 = vrot.lane.b32.xlu2 %v5456_v6, %s4385_s26 }
 0x24e   : > { %1425 = vrot.lane.b32.xlu1 %v5442_v51, %s4389_s17  ;;  %1423 = vrot.lane.b32.xlu0 %v5456_v6, %s4389_s17 }
 0x24f   : > { %v5464_v4 = vpop.permute.xlu2 %1311 }
 0x250   : > { %8945 = vst [vmem:[#allocation94_spill] sm:$0xff] %v5464_v4  ;;  %v5466_v59 = vpop.permute.xlu1 %1407  ;;  %v5468_v12 = vpop.permute.xlu0 %1034 }
 0x251   : > { %8946 = vst [vmem:[#allocation95_spill] sm:$0xff] %v5466_v59  ;;  %v984_v59 = vrot.slane %v5477_v10, 1 }
 0x252   : > { %8947 = vst [vmem:[#allocation96_spill] sm:$0xff] %v5468_v12 }
 0x253   : > { %v5496_v17 = vsel %vm933_vm3, %v984_v59, %v985_v35 }
 0x254   : > { %8951 = vst [vmem:[#allocation100_spill] sm:$0xff] %v5496_v17 }
 0x255   : > { %1229 = vrot.lane.b32.xlu2 %v5471_v27, %s4386_s29 }
 0x256   : > { %1327 = vrot.lane.b32.xlu1 %v5475_v15, %s4388_s13  ;;  %1325 = vrot.lane.b32.xlu0 %v5477_v10, %s4388_s13 }
 0x257   : > { %v5483_v4 = vpop.permute.xlu2 %1038 }
 0x258   : > { %8948 = vst [vmem:[#allocation97_spill] sm:$0xff] %v5483_v4  ;;  %v5485_v12 = vpop.permute.xlu1 %1510  ;;  %v5487_v52 = vpop.permute.xlu0 %1213  ;;  %v5499_v4 = vsel %vm1110_vm4, %v1161_v31, %v1162_v11 }
 0x259   : > { %8949 = vst [vmem:[#allocation98_spill] sm:$0xff] %v5485_v12  ;;  %v863_v12 = vld [vmem:[#allocation2 + $0x100] sm:$0x3] }
 0x25a   : > { %8950 = vst [vmem:[#allocation99_spill] sm:$0xff] %v5487_v52  ;;  %v1164_v2 = vrot.slane %v863_v12, 2 }
 0x25c   : > { %v5517_v31 = vsel %vm1110_vm4, %v1162_v11, %v1164_v2 }
 0x25d   : > { %1524 = vrot.lane.b32.xlu2 %v5439_v39, %s4390_s20  ;;  %v987_v39 = vrot.slane %v863_v12, 1 }
 0x25e   : > { %1054 = vrot.lane.b32.xlu1 %v5496_v17, %s4385_s26  ;;  %1231 = vrot.lane.b32.xlu0 %v5499_v4, %s4386_s29 }
 0x25f   : > { %v5505_v52 = vpop.permute.xlu2 %1217  ;;  %v5512_v59 = vsel %vm933_vm3, %v985_v35, %v987_v39 }
 0x260   : > { %8952 = vst [vmem:[#allocation101_spill] sm:$0xff] %v5505_v52  ;;  %v5507_v18 = vpop.permute.xlu1 %1309  ;;  %v5509_v29 = vpop.permute.xlu0 %1508  ;;  %v5523_v52 = vld [vmem:[#allocation2 + $0x110] sm:$0xff] }
 0x261   : > { %8953 = vst [vmem:[#allocation102_spill] sm:$0xff] %v5507_v18  ;;  %v866_v18 = vld [vmem:[#allocation2 + $0x118] sm:$0x3]  ;;  %v990_v35 = vrot.slane %v5523_v52, 1  ;;  %v1167_v48 = vrot.slane %v5523_v52, 2 }
 0x262   : > { %8954 = vst [vmem:[#allocation103_spill] sm:$0xff] %v5509_v29  ;;  %v992_v21 = vrot.slane %v866_v18, 1  ;;  %v1169_v46 = vrot.slane %v866_v18, 2  ;;  %v5581_v18 = vld [vmem:[#allocation2 + $0x128] sm:$0xff] }
 0x263   : > { %8955 = vst [vmem:[#allocation104_spill] sm:$0xff] %v5512_v59  ;;  %v1172_v22 = vrot.slane %v5581_v18, 2 }
 0x264   : > { %v5535_v2 = vsel %vm933_vm3, %v990_v35, %v992_v21  ;;  %v5575_v54 = vsel %vm1110_vm4, %v1167_v48, %v1169_v46  ;;  %v995_v46 = vrot.slane %v5581_v18, 1 }
 0x265   : > { %1056 = vrot.lane.b32.xlu2 %v5512_v59, %s4385_s26  ;;  %8959 = vst [vmem:[#allocation108_spill] sm:$0xff] %v5535_v2 }
 0x266   : > { %1233 = vrot.lane.b32.xlu1 %v5517_v31, %s4386_s29  ;;  %1429 = vrot.lane.b32.xlu0 %v5512_v59, %s4389_s17 }
 0x267   : > { %v5525_v29 = vpop.permute.xlu2 %1512 }
 0x268   : > { %8956 = vst [vmem:[#allocation105_spill] sm:$0xff] %v5525_v29  ;;  %v5527_v12 = vpop.permute.xlu1 %1215  ;;  %v5529_v39 = vpop.permute.xlu0 %1040  ;;  %v5547_v29 = vld [vmem:[#allocation2 + $0x108] sm:$0xff] }
 0x269   : > { %8957 = vst [vmem:[#allocation106_spill] sm:$0xff] %v5527_v12  ;;  %v989_v49 = vrot.slane %v5547_v29, 1  ;;  %v1166_v55 = vrot.slane %v5547_v29, 2 }
 0x26a   : > { %8958 = vst [vmem:[#allocation107_spill] sm:$0xff] %v5529_v39 }
 0x26b   : > { %v5553_v21 = vsel %vm933_vm3, %v989_v49, %v990_v35  ;;  %v5568_v49 = vsel %vm1110_vm4, %v1166_v55, %v1167_v48  ;;  %v5572_v35 = vld [vmem:[#allocation2 + $0x120] sm:$0xff] }
 0x26c   : > { %8963 = vst [vmem:[#allocation112_spill] sm:$0xff] %v5553_v21  ;;  %v1171_v23 = vrot.slane %v5572_v35, 2  ;;  %v994_v13 = vrot.slane %v5572_v35, 1 }
 0x26d   : > { %1427 = vrot.lane.b32.xlu2 %v5496_v17, %s4389_s17 }
 0x26e   : > { %1060 = vrot.lane.b32.xlu1 %v5535_v2, %s4385_s26  ;;  %1331 = vrot.lane.b32.xlu0 %v5523_v52, %s4388_s13  ;;  %v5595_v5 = vsel %vm1110_vm4, %v1171_v23, %v1172_v22  ;;  %v5614_v23 = vsel %vm933_vm3, %v994_v13, %v995_v46 }
 0x26f   : > { %v5541_v11 = vpop.permute.xlu2 %1044  ;;  %8974 = vst [vmem:[#allocation123_spill] sm:$0xff] %v5614_v23 }
 0x270   : > { %8960 = vst [vmem:[#allocation109_spill] sm:$0xff] %v5541_v11  ;;  %v5543_v12 = vpop.permute.xlu1 %1413  ;;  %v5545_v39 = vpop.permute.xlu0 %1411 }
 0x271   : > { %8961 = vst [vmem:[#allocation110_spill] sm:$0xff] %v5543_v12 }
 0x272   : > { %8962 = vst [vmem:[#allocation111_spill] sm:$0xff] %v5545_v39 }
 0x275   : > { %1329 = vrot.lane.b32.xlu2 %v5547_v29, %s4388_s13 }
 0x276   : > { %1431 = vrot.lane.b32.xlu1 %v5553_v21, %s4389_s17  ;;  %1058 = vrot.lane.b32.xlu0 %v5553_v21, %s4385_s26 }
 0x277   : > { %v5559_v11 = vpop.permute.xlu2 %1415 }
 0x278   : > { %8964 = vst [vmem:[#allocation113_spill] sm:$0xff] %v5559_v11  ;;  %v5561_v12 = vpop.permute.xlu1 %1315  ;;  %v5563_v39 = vpop.permute.xlu0 %1514 }
 0x279   : > { %8965 = vst [vmem:[#allocation114_spill] sm:$0xff] %v5561_v12  ;;  %v869_v12 = vld [vmem:[#allocation2 + $0x130] sm:$0x3] }
 0x27a   : > { %8966 = vst [vmem:[#allocation115_spill] sm:$0xff] %v5563_v39  ;;  %v997_v48 = vrot.slane %v869_v12, 1 }
 0x27c   : > { %v5598_v19 = vsel %vm933_vm3, %v995_v46, %v997_v48 }
 0x27d   : > { %1235 = vrot.lane.b32.xlu2 %v5568_v49, %s4386_s29  ;;  %8970 = vst [vmem:[#allocation119_spill] sm:$0xff] %v5598_v19 }
 0x27e   : > { %1333 = vrot.lane.b32.xlu1 %v5572_v35, %s4388_s13  ;;  %1237 = vrot.lane.b32.xlu0 %v5575_v54, %s4386_s29 }
 0x27f   : > { %v5583_v11 = vpop.permute.xlu2 %1518 }
 0x280   : > { %8967 = vst [vmem:[#allocation116_spill] sm:$0xff] %v5583_v11  ;;  %v5585_v55 = vpop.permute.xlu1 %1042  ;;  %v5587_v39 = vpop.permute.xlu0 %1313 }
 0x281   : > { %8968 = vst [vmem:[#allocation117_spill] sm:$0xff] %v5585_v55 }
 0x282   : > { %8969 = vst [vmem:[#allocation118_spill] sm:$0xff] %v5587_v39 }
 0x285   : > { %1433 = vrot.lane.b32.xlu2 %v5535_v2, %s4389_s17  ;;  %v999_v2 = vrot.slane %v5630_v28, 1 }
 0x286   : > { %1239 = vrot.lane.b32.xlu1 %v5595_v5, %s4386_s29  ;;  %1064 = vrot.lane.b32.xlu0 %v5598_v19, %s4385_s26 }
 0x287   : > { %v5604_v55 = vpop.permute.xlu2 %1317 }
 0x288   : > { %8971 = vst [vmem:[#allocation120_spill] sm:$0xff] %v5604_v55  ;;  %v5606_v11 = vpop.permute.xlu1 %1221  ;;  %v5608_v39 = vpop.permute.xlu0 %1219 }
 0x289   : > { %8972 = vst [vmem:[#allocation121_spill] sm:$0xff] %v5606_v11 }
 0x28a   : > { %8973 = vst [vmem:[#allocation122_spill] sm:$0xff] %v5608_v39  ;;  %v5628_v39 = vld [vmem:[#allocation2 + $0x140] sm:$0xff] }
 0x28d   : > { %1335 = vrot.lane.b32.xlu2 %v5581_v18, %s4388_s13 }
 0x28e   : > { %1437 = vrot.lane.b32.xlu1 %v5598_v19, %s4389_s17  ;;  %1435 = vrot.lane.b32.xlu0 %v5614_v23, %s4389_s17  ;;  %v1177_v19 = vrot.slane %v5628_v39, 2 }
 0x28f   : > { %v5620_v48 = vpop.permute.xlu2 %1223 }
 0x290   : > { %8975 = vst [vmem:[#allocation124_spill] sm:$0xff] %v5620_v48  ;;  %v5622_v55 = vpop.permute.xlu1 %1516  ;;  %v5624_v11 = vpop.permute.xlu0 %1417 }
 0x291   : > { %8976 = vst [vmem:[#allocation125_spill] sm:$0xff] %v5622_v55  ;;  %v1176_v55 = vrot.slane %v5630_v28, 2 }
 0x292   : > { %8977 = vst [vmem:[#allocation126_spill] sm:$0xff] %v5624_v11  ;;  %v1174_v11 = vrot.slane %v869_v12, 2 }
 0x294   : > { %v5647_v21 = vsel %vm1110_vm4, %v1172_v22, %v1174_v11 }
 0x295   : > { %1062 = vrot.lane.b32.xlu2 %v5614_v23, %s4385_s26  ;;  %v1000_v23 = vrot.slane %v5628_v39, 1 }
 0x296   : > { %1339 = vrot.lane.b32.xlu1 %v5628_v39, %s4388_s13  ;;  %1337 = vrot.lane.b32.xlu0 %v5630_v28, %s4388_s13 }
 0x297   : > { %v5636_v13 = vpop.permute.xlu2 %1421 }
 0x298   : > { %8978 = vst [vmem:[#allocation127_spill] sm:$0xff] %v5636_v13  ;;  %v5638_v46 = vpop.permute.xlu1 %1048  ;;  %v5640_v48 = vpop.permute.xlu0 %1319  ;;  %v5652_v13 = vsel %vm1110_vm4, %v1176_v55, %v1177_v19 }
 0x299   : > { %8979 = vst [vmem:[#allocation128_spill] sm:$0xff] %v5638_v46  ;;  %v5655_v46 = vsel %vm933_vm3, %v999_v2, %v1000_v23 }
 0x29a   : > { %8980 = vst [vmem:[#allocation129_spill] sm:$0xff] %v5640_v48  ;;  %v872_v48 = vld [vmem:[#allocation2 + $0x148] sm:$0x3] }
 0x29b   : > { %v1002_v59 = vrot.slane %v872_v48, 1  ;;  %v1179_v17 = vrot.slane %v872_v48, 2 }
 0x29d   : > { %1241 = vrot.lane.b32.xlu2 %v5647_v21, %s4386_s29  ;;  %v5668_v55 = vsel %vm933_vm3, %v1000_v23, %v1002_v59  ;;  %v5673_v2 = vsel %vm1110_vm4, %v1177_v19, %v1179_v17 }
 0x29e   : > { %1243 = vrot.lane.b32.xlu0 %v5652_v13, %s4386_s29  ;;  %1066 = vrot.lane.b32.xlu1 %v5655_v46, %s4385_s26 }
 0x29f   : > { %v5661_v12 = vpop.permute.xlu2 %1323 }
 0x2a0   : > { %8981 = vst [vmem:[#allocation130_spill] sm:$0xff] %v5661_v12  ;;  %v5663_v22 = vpop.permute.xlu1 %1419  ;;  %v5665_v11 = vpop.permute.xlu0 %1046 }
 0x2a1   : > { %8982 = vst [vmem:[#allocation131_spill] sm:$0xff] %v5663_v22 }
 0x2a2   : > { %8983 = vst [vmem:[#allocation132_spill] sm:$0xff] %v5665_v11 }
 0x2a5   : > { %1068 = vrot.lane.b32.xlu2 %v5668_v55, %s4385_s26 }
 0x2a6   : > { %1441 = vrot.lane.b32.xlu0 %v5668_v55, %s4389_s17  ;;  %1245 = vrot.lane.b32.xlu1 %v5673_v2, %s4386_s29 }
 0x2a7   : > { %v5679_v12 = vpop.permute.xlu2 %1050 }
 0x2a8   : > { %8984 = vst [vmem:[#allocation133_spill] sm:$0xff] %v5679_v12  ;;  %v5681_v11 = vpop.permute.xlu1 %1522  ;;  %v5683_v48 = vpop.permute.xlu0 %1225 }
 0x2a9   : > { %8985 = vst [vmem:[#allocation134_spill] sm:$0xff] %v5681_v11 }
 0x2aa   : > { %8986 = vst [vmem:[#allocation135_spill] sm:$0xff] %v5683_v48 }
 0x2ad   : > { %1439 = vrot.lane.b32.xlu2 %v5655_v46, %s4389_s17 }
 0x2ae   : > { %1526 = vrot.lane.b32.xlu0 %v5471_v27, %s4390_s20  ;;  %1528 = vrot.lane.b32.xlu1 %v5499_v4, %s4390_s20 }
 0x2af   : > { %v5691_v19 = vpop.permute.xlu2 %1229 }
 0x2b0   : > { %8987 = vst [vmem:[#allocation136_spill] sm:$0xff] %v5691_v19  ;;  %v5693_v17 = vpop.permute.xlu1 %1321  ;;  %v5695_v59 = vpop.permute.xlu0 %1520 }
 0x2b1   : > { %8988 = vst [vmem:[#allocation137_spill] sm:$0xff] %v5693_v17 }
 0x2b2   : > { %8989 = vst [vmem:[#allocation138_spill] sm:$0xff] %v5695_v59  ;;  %v1490_v59 = vrot.slane %v5094_v8, 2 }
 0x2b5   : > { %1530 = vrot.lane.b32.xlu2 %v5517_v31, %s4390_s20 }
 0x2b6   : > { %1532 = vrot.lane.b32.xlu0 %v5568_v49, %s4390_s20  ;;  %1534 = vrot.lane.b32.xlu1 %v5575_v54, %s4390_s20 }
 0x2b7   : > { %v5703_v23 = vpop.permute.xlu2 %1524 }
 0x2b8   : > { %8990 = vst [vmem:[#allocation139_spill] sm:$0xff] %v5703_v23  ;;  %v5705_v12 = vpop.permute.xlu1 %1227  ;;  %v5707_v48 = vpop.permute.xlu0 %1052 }
 0x2b9   : > { %8991 = vst [vmem:[#allocation140_spill] sm:$0xff] %v5705_v12 }
 0x2ba   : > { %8992 = vst [vmem:[#allocation141_spill] sm:$0xff] %v5707_v48 }
 0x2bd   : > { %1536 = vrot.lane.b32.xlu2 %v5595_v5, %s4390_s20 }
 0x2be   : > { %1538 = vrot.lane.b32.xlu0 %v5647_v21, %s4390_s20  ;;  %1540 = vrot.lane.b32.xlu1 %v5652_v13, %s4390_s20 }
 0x2bf   : > { %v5715_v19 = vpop.permute.xlu2 %1056 }
 0x2c0   : > { %8993 = vst [vmem:[#allocation142_spill] sm:$0xff] %v5715_v19  ;;  %v5717_v17 = vpop.permute.xlu1 %1425  ;;  %v5719_v11 = vpop.permute.xlu0 %1423  ;;  %v1487_v19 = vrot.slane %v5072_v61, 2 }
 0x2c1   : > { %8994 = vst [vmem:[#allocation143_spill] sm:$0xff] %v5717_v17  ;;  %v1488_v17 = vrot.slane %v5088_v7, 2 }
 0x2c2   : > { %8995 = vst [vmem:[#allocation144_spill] sm:$0xff] %v5719_v11 }
 0x2c3   : > { %v5738_v11 = vsel %vm1110_vm4, %v1487_v19, %v1488_v17  ;;  %v5752_v22 = vsel %vm1110_vm4, %v1488_v17, %v1490_v59  ;;  %v5756_v19 = vld [vmem:[#allocation2 + $0x30] sm:$0xff] }
 0x2c4   : > { %8999 = vst [vmem:[#allocation148_spill] sm:$0xff] %v5738_v11 }
 0x2c5   : > { %1542 = vrot.lane.b32.xlu2 %v5673_v2, %s4390_s20 }
 0x2c6   : > { %1544 = vrot.lane.b32.xlu0 %v4924_v40, %s4390_s20  ;;  %1546 = vrot.lane.b32.xlu1 %v4932_v42, %s4390_s20 }
 0x2c7   : > { %v5727_v48 = vpop.permute.xlu2 %1427 }
 0x2c8   : > { %8996 = vst [vmem:[#allocation145_spill] sm:$0xff] %v5727_v48  ;;  %v5729_v12 = vpop.permute.xlu1 %1327  ;;  %v5731_v23 = vpop.permute.xlu0 %1325 }
 0x2c9   : > { %8997 = vst [vmem:[#allocation146_spill] sm:$0xff] %v5729_v12 }
 0x2ca   : > { %8998 = vst [vmem:[#allocation147_spill] sm:$0xff] %v5731_v23 }
 0x2cd   : > { %1548 = vrot.lane.b32.xlu2 %v5007_v25, %s4390_s20 }
 0x2ce   : > { %1550 = vrot.lane.b32.xlu0 %v5038_v45, %s4390_s20  ;;  %1552 = vrot.lane.b32.xlu1 %v5738_v11, %s4390_s20  ;;  %v5760_v11 = vld [vmem:[#allocation2 + $0x38] sm:$0xff] }
 0x2cf   : > { %v5744_v48 = vpop.permute.xlu2 %1329 }
 0x2d0   : > { %9000 = vst [vmem:[#allocation149_spill] sm:$0xff] %v5744_v48  ;;  %v5746_v12 = vpop.permute.xlu1 %1054  ;;  %v5748_v23 = vpop.permute.xlu0 %1231 }
 0x2d1   : > { %9001 = vst [vmem:[#allocation150_spill] sm:$0xff] %v5746_v12 }
 0x2d2   : > { %9002 = vst [vmem:[#allocation151_spill] sm:$0xff] %v5748_v23 }
 0x2d5   : > { %1554 = vrot.lane.b32.xlu2 %v5752_v22, %s4390_s20 }
 0x2d6   : > { %1590 = vrot.lane.b32.xlu0 %v5756_v19, %s4391_s15  ;;  %1592 = vrot.lane.b32.xlu1 %v5760_v11, %s4391_s15 }
 0x2d7   : > { %v5764_v48 = vpop.permute.xlu2 %1235 }
 0x2d8   : > { %9003 = vst [vmem:[#allocation152_spill] sm:$0xff] %v5764_v48  ;;  %v5766_v8 = vpop.permute.xlu1 %1233  ;;  %v5768_v17 = vpop.permute.xlu0 %1429  ;;  %v5874_v48 = vld [vmem:[#allocation2 + $0x170] sm:$0xff] }
 0x2d9   : > { %9004 = vst [vmem:[#allocation153_spill] sm:$0xff] %v5766_v8  ;;  %v5888_v8 = vld [vmem:[#allocation2 + $0x1a0] sm:$0xff] }
 0x2da   : > { %9005 = vst [vmem:[#allocation154_spill] sm:$0xff] %v5768_v17 }
 0x2db   : > { %9021 = vst [vmem:[#allocation170_spill] sm:$0xff] %v5874_v48 }
 0x2dd   : > { %1594 = vrot.lane.b32.xlu2 %v4990_v14, %s4391_s15 }
 0x2de   : > { %1596 = vrot.lane.b32.xlu0 %v4996_v16, %s4391_s15  ;;  %1598 = vrot.lane.b32.xlu1 %v5086_v3, %s4391_s15 }
 0x2df   : > { %v5776_v59 = vpop.permute.xlu2 %1433 }
 0x2e0   : > { %9006 = vst [vmem:[#allocation155_spill] sm:$0xff] %v5776_v59  ;;  %v5778_v23 = vpop.permute.xlu1 %1060  ;;  %v5780_v12 = vpop.permute.xlu0 %1331 }
 0x2e1   : > { %9007 = vst [vmem:[#allocation156_spill] sm:$0xff] %v5778_v23 }
 0x2e2   : > { %9008 = vst [vmem:[#allocation157_spill] sm:$0xff] %v5780_v12  ;;  %v5886_v12 = vld [vmem:[#allocation2 + $0x198] sm:$0xff] }
 0x2e5   : > { %1600 = vrot.lane.b32.xlu2 %v5113_v26, %s4391_s15 }
 0x2e6   : > { %1602 = vrot.lane.b32.xlu0 %v5194_v60, %s4391_s15  ;;  %1604 = vrot.lane.b32.xlu1 %v5171_v37, %s4391_s15 }
 0x2e7   : > { %v5788_v14 = vpop.permute.xlu2 %1335 }
 0x2e8   : > { %9009 = vst [vmem:[#allocation158_spill] sm:$0xff] %v5788_v14  ;;  %v5790_v16 = vpop.permute.xlu1 %1431  ;;  %v5792_v3 = vpop.permute.xlu0 %1058  ;;  %v5860_v14 = vld [vmem:[#allocation2 + $0x158] sm:$0xff] }
 0x2e9   : > { %9010 = vst [vmem:[#allocation159_spill] sm:$0xff] %v5790_v16 }
 0x2ea   : > { %9011 = vst [vmem:[#allocation160_spill] sm:$0xff] %v5792_v3 }
 0x2eb   : > { %9018 = vst [vmem:[#allocation167_spill] sm:$0xff] %v5860_v14 }
 0x2ed   : > { %1606 = vrot.lane.b32.xlu2 %v5235_v62, %s4391_s15 }
 0x2ee   : > { %1608 = vrot.lane.b32.xlu0 %v5241_v57, %s4391_s15  ;;  %1610 = vrot.lane.b32.xlu1 %v5303_v33, %s4391_s15 }
 0x2ef   : > { %v5800_v26 = vpop.permute.xlu2 %1062 }
 0x2f0   : > { %v5802_v60 = vpop.permute.xlu1 %1333  ;;  %v5804_v37 = vpop.permute.xlu0 %1237 }
 0x2f1   : > { %9012 = vst [vmem:[#allocation161_spill] sm:$0xff] %v5802_v60  ;;  %v5870_v60 = vld [vmem:[#allocation2 + $0x168] sm:$0xff] }
 0x2f2   : > { %9013 = vst [vmem:[#allocation162_spill] sm:$0xff] %v5804_v37 }
 0x2f3   : > { %9020 = vst [vmem:[#allocation169_spill] sm:$0xff] %v5870_v60 }
 0x2f5   : > { %1612 = vrot.lane.b32.xlu2 %v5291_v0, %s4391_s15 }
 0x2f6   : > { %1614 = vrot.lane.b32.xlu0 %v5377_v38, %s4391_s15  ;;  %1616 = vrot.lane.b32.xlu1 %v5353_v34, %s4391_s15 }
 0x2f7   : > { %v5812_v62 = vpop.permute.xlu2 %1241 }
 0x2f8   : > { %v5814_v57 = vpop.permute.xlu1 %1239  ;;  %v5816_v33 = vpop.permute.xlu0 %1064 }
 0x2fd   : > { %1618 = vrot.lane.b32.xlu2 %v5418_v1, %s4391_s15 }
 0x2fe   : > { %1620 = vrot.lane.b32.xlu0 %v5425_v53, %s4391_s15  ;;  %1622 = vrot.lane.b32.xlu1 %v5477_v10, %s4391_s15 }
 0x2ff   : > { %v5824_v0 = vpop.permute.xlu2 %1068 }
 0x300   : > { %v5826_v38 = vpop.permute.xlu1 %1437  ;;  %v5828_v34 = vpop.permute.xlu0 %1435 }
 0x301   : > { %9014 = vst [vmem:[#allocation163_spill] sm:$0xff] %v5826_v38  ;;  %v5856_v38 = vld [vmem:[#allocation2 + $0x150] sm:$0xff] }
 0x302   : > { %9015 = vst [vmem:[#allocation164_spill] sm:$0xff] %v5828_v34 }
 0x303   : > { %9017 = vst [vmem:[#allocation166_spill] sm:$0xff] %v5856_v38 }
 0x305   : > { %1624 = vrot.lane.b32.xlu2 %v5475_v15, %s4391_s15 }
 0x306   : > { %1626 = vrot.lane.b32.xlu0 %v5547_v29, %s4391_s15  ;;  %1628 = vrot.lane.b32.xlu1 %v5523_v52, %s4391_s15 }
 0x307   : > { %v5836_v1 = vpop.permute.xlu2 %1439 }
 0x308   : > { %v5838_v53 = vpop.permute.xlu1 %1339  ;;  %v5840_v10 = vpop.permute.xlu0 %1337 }
 0x30d   : > { %1630 = vrot.lane.b32.xlu2 %v5572_v35, %s4391_s15 }
 0x30e   : > { %1632 = vrot.lane.b32.xlu0 %v5581_v18, %s4391_s15  ;;  %1634 = vrot.lane.b32.xlu1 %v5630_v28, %s4391_s15 }
 0x30f   : > { %v5848_v15 = vpop.permute.xlu2 %1530 }
 0x310   : > { %9016 = vst [vmem:[#allocation165_spill] sm:$0xff] %v5848_v15  ;;  %v5850_v29 = vpop.permute.xlu1 %1066  ;;  %v5852_v52 = vpop.permute.xlu0 %1243 }
 0x315   : > { %1636 = vrot.lane.b32.xlu2 %v5628_v39, %s4391_s15 }
 0x316   : > { %1638 = vrot.lane.b32.xlu0 %v5856_v38, %s4391_s15  ;;  %1640 = vrot.lane.b32.xlu1 %v5860_v14, %s4391_s15  ;;  %v9051_v14 = vld [vmem:[#allocation31_spill] sm:$0xff] }
 0x317   : > { %v5864_v37 = vpop.permute.xlu2 %1536 }
 0x318   : > { %9019 = vst [vmem:[#allocation168_spill] sm:$0xff] %v5864_v37  ;;  %v5866_v23 = vpop.permute.xlu1 %1245  ;;  %v5868_v34 = vpop.permute.xlu0 %1441 }
 0x31d   : > { %1642 = vrot.lane.b32.xlu2 %v5870_v60, %s4391_s15  ;;  %v9040_v60 = vld [vmem:[#allocation119_spill] sm:$0xff] }
 0x31e   : > { %1644 = vrot.lane.b32.xlu0 %v5874_v48, %s4391_s15  ;;  %1646 = vrot.lane.b32.xlu1 %v5072_v61, %s4391_s15  ;;  %v9036_v48 = vld [vmem:[#allocation112_spill] sm:$0xff] }
 0x31f   : > { %v5880_v3 = vpop.permute.xlu2 %1542 }
 0x320   : > { %v5882_v37 = vpop.permute.xlu1 %1528  ;;  %v5884_v59 = vpop.permute.xlu0 %1526 }
 0x321   : > { %9022 = vst [vmem:[#allocation171_spill] sm:$0xff] %v5882_v37 }
 0x322   : > { %9023 = vst [vmem:[#allocation172_spill] sm:$0xff] %v5884_v59 }
 0x325   : > { %1648 = vrot.lane.b32.xlu2 %v5088_v7, %s4391_s15 }
 0x326   : > { %1650 = vrot.lane.b32.xlu0 %v5886_v12, %s4391_s15  ;;  %1652 = vrot.lane.b32.xlu1 %v5888_v8, %s4391_s15 }
 0x327   : > { %v5896_v61 = vpop.permute.xlu2 %1548 }
 0x328   : > { %9024 = vst [vmem:[#allocation173_spill] sm:$0xff] %v5896_v61  ;;  %v5898_v16 = vpop.permute.xlu1 %1534  ;;  %v5900_v15 = vpop.permute.xlu0 %1532  ;;  %v9069_v61 = vld [vmem:[#allocation65_spill] sm:$0xff] }
 0x329   : > { %9025 = vst [vmem:[#allocation174_spill] sm:$0xff] %v5898_v16  ;;  %v1688_v16 = vrot.slane %v5888_v8, 1 }
 0x32a   : > { %9026 = vst [vmem:[#allocation175_spill] sm:$0xff] %v5900_v15 }
 0x32d   : > { %1692 = vrot.lane.b32.xlu2 %v4944_v47, %s4392_s21 }
 0x32e   : > { %1694 = vrot.lane.b32.xlu0 %v4929_v41, %s4392_s21  ;;  %1696 = vrot.lane.b32.xlu1 %v5022_v32, %s4392_s21 }
 0x32f   : > { %v5908_v7 = vpop.permute.xlu2 %1554 }
 0x330   : > { %9027 = vst [vmem:[#allocation176_spill] sm:$0xff] %v5908_v7  ;;  %v5910_v17 = vpop.permute.xlu1 %1540  ;;  %v5912_v37 = vpop.permute.xlu0 %1538 }
 0x331   : > { %9028 = vst [vmem:[#allocation177_spill] sm:$0xff] %v5912_v37  ;;  %v1687_v37 = vrot.slane %v5886_v12, 1 }
 0x333   : > { %v1689_v7 = vsel %vm933_vm3, %v1687_v37, %v1688_v16 }
 0x335   : > { %1698 = vrot.lane.b32.xlu2 %v5004_v24, %s4392_s21 }
 0x336   : > { %1700 = vrot.lane.b32.xlu0 %v5138_v50, %s4392_s21  ;;  %1702 = vrot.lane.b32.xlu1 %v5130_v44, %s4392_s21 }
 0x337   : > { %v5920_v47 = vpop.permute.xlu2 %1594 }
 0x338   : > { %v5922_v41 = vpop.permute.xlu1 %1546  ;;  %v5924_v32 = vpop.permute.xlu0 %1544 }
 0x339   : > { %9029 = vst [vmem:[#allocation178_spill] sm:$0xff] %v5922_v41  ;;  %v9076_v41 = vld [vmem:[#allocation84_spill] sm:$0xff] }
 0x33d   : > { %1704 = vrot.lane.b32.xlu2 %v5200_v9, %s4392_s21 }
 0x33e   : > { %1706 = vrot.lane.b32.xlu0 %v5182_v36, %s4392_s21  ;;  %1708 = vrot.lane.b32.xlu1 %v5272_v43, %s4392_s21 }
 0x33f   : > { %v5932_v24 = vpop.permute.xlu2 %1600 }
 0x340   : > { %v5934_v50 = vpop.permute.xlu1 %1552  ;;  %v5936_v44 = vpop.permute.xlu0 %1550 }
 0x341   : > { %9030 = vst [vmem:[#allocation179_spill] sm:$0xff] %v5934_v50  ;;  %v9037_v50 = vld [vmem:[#allocation123_spill] sm:$0xff] }
 0x342   : > { %9031 = vst [vmem:[#allocation180_spill] sm:$0xff] %v5936_v44 }
 0x345   : > { %1710 = vrot.lane.b32.xlu2 %v5258_v20, %s4392_s21 }
 0x346   : > { %1712 = vrot.lane.b32.xlu0 %v5310_v30, %s4392_s21  ;;  %1714 = vrot.lane.b32.xlu1 %v5326_v58, %s4392_s21 }
 0x347   : > { %v5944_v9 = vpop.permute.xlu2 %1606 }
 0x348   : > { %v5946_v36 = vpop.permute.xlu1 %1592  ;;  %v5948_v43 = vpop.permute.xlu0 %1590 }
 0x34d   : > { %1716 = vrot.lane.b32.xlu2 %v5383_v56, %s4392_s21  ;;  %v9033_v56 = vld [vmem:[#allocation100_spill] sm:$0xff] }
 0x34e   : > { %1718 = vrot.lane.b32.xlu0 %v5365_v63, %s4392_s21  ;;  %1720 = vrot.lane.b32.xlu1 %v5456_v6, %s4392_s21  ;;  %v9034_v63 = vld [vmem:[#allocation104_spill] sm:$0xff] }
 0x34f   : > { %v5956_v20 = vpop.permute.xlu2 %1612 }
 0x350   : > { %9032 = vst [vmem:[#allocation181_spill] sm:$0xff] %v5956_v20  ;;  %v5958_v30 = vpop.permute.xlu1 %1598  ;;  %v5960_v58 = vpop.permute.xlu0 %1596  ;;  %v9073_v20 = vld [vmem:[#allocation72_spill] sm:$0xff] }
 0x355   : > { %1722 = vrot.lane.b32.xlu2 %v5442_v51, %s4392_s21  ;;  %v9038_v51 = vld [vmem:[#allocation108_spill] sm:$0xff] }
 0x356   : > { %1724 = vrot.lane.b32.xlu0 %v9033_v56, %s4392_s21  ;;  %1726 = vrot.lane.b32.xlu1 %v9034_v63, %s4392_s21 }
 0x357   : > { %v5970_v6 = vpop.permute.xlu2 %1618 }
 0x358   : > { %9035 = vst [vmem:[#allocation100_spill] sm:$0xff] %v5970_v6  ;;  %v5972_v15 = vpop.permute.xlu1 %1604  ;;  %v5974_v59 = vpop.permute.xlu0 %1602 }
 0x35d   : > { %1728 = vrot.lane.b32.xlu2 %v9036_v48, %s4392_s21 }
 0x35e   : > { %1732 = vrot.lane.b32.xlu1 %v9037_v50, %s4392_s21  ;;  %1730 = vrot.lane.b32.xlu0 %v9038_v51, %s4392_s21  ;;  %v9044_v51 = vld [vmem:[#allocation9_spill] sm:$0xff] }
 0x35f   : > { %v5983_v56 = vpop.permute.xlu2 %1624 }
 0x360   : > { %9039 = vst [vmem:[#allocation104_spill] sm:$0xff] %v5983_v56  ;;  %v5985_v63 = vpop.permute.xlu1 %1610  ;;  %v5987_v6 = vpop.permute.xlu0 %1608  ;;  %v9045_v56 = vld [vmem:[#allocation13_spill] sm:$0xff] }
 0x365   : > { %1734 = vrot.lane.b32.xlu2 %v9040_v60, %s4392_s21  ;;  %v9046_v60 = vld [vmem:[#allocation8_spill] sm:$0xff] }
 0x366   : > { %1738 = vrot.lane.b32.xlu1 %v5668_v55, %s4392_s21  ;;  %1736 = vrot.lane.b32.xlu0 %v5655_v46, %s4392_s21 }
 0x367   : > { %v5995_v48 = vpop.permute.xlu2 %1630 }
 0x368   : > { %9041 = vst [vmem:[#allocation112_spill] sm:$0xff] %v5995_v48  ;;  %v5997_v37 = vpop.permute.xlu1 %1616  ;;  %v5999_v50 = vpop.permute.xlu0 %1614  ;;  %v6013_v48 = vld [vmem:[#allocation2 + $0x1a8] sm:$0x3] }
 0x369   : > { %9042 = vst [vmem:[#allocation123_spill] sm:$0xff] %v5997_v37  ;;  %v9050_v37 = vld [vmem:[#allocation12_spill] sm:$0xff] }
 0x36a   : > { %9043 = vst [vmem:[#allocation108_spill] sm:$0xff] %v5999_v50 }
 0x36d   : > { %1740 = vrot.lane.b32.xlu2 %v9044_v51, %s4392_s21  ;;  %v9052_v51 = vld [vmem:[#allocation30_spill] sm:$0xff] }
 0x36e   : > { %1744 = vrot.lane.b32.xlu1 %v9045_v56, %s4392_s21  ;;  %1742 = vrot.lane.b32.xlu0 %v9046_v60, %s4392_s21  ;;  %v1690_v60 = vrot.slane %v6013_v48, 1 }
 0x36f   : > { %v6007_v44 = vpop.permute.xlu2 %1636 }
 0x370   : > { %9047 = vst [vmem:[#allocation119_spill] sm:$0xff] %v6007_v44  ;;  %v6009_v55 = vpop.permute.xlu1 %1622  ;;  %v6011_v46 = vpop.permute.xlu0 %1620 }
 0x371   : > { %9048 = vst [vmem:[#allocation9_spill] sm:$0xff] %v6009_v55 }
 0x372   : > { %9049 = vst [vmem:[#allocation13_spill] sm:$0xff] %v6011_v46  ;;  %v1691_v46 = vsel %vm933_vm3, %v1688_v16, %v1690_v60  ;;  %v9062_v16 = vld [vmem:[#allocation19_spill] sm:$0xff] }
 0x375   : > { %1746 = vrot.lane.b32.xlu2 %v9050_v37, %s4392_s21  ;;  %v9056_v37 = vld [vmem:[#allocation10_spill] sm:$0xff] }
 0x376   : > { %1750 = vrot.lane.b32.xlu1 %v9051_v14, %s4392_s21  ;;  %1748 = vrot.lane.b32.xlu0 %v9052_v51, %s4392_s21 }
 0x377   : > { %v6021_v56 = vpop.permute.xlu2 %1642 }
 0x378   : > { %9053 = vst [vmem:[#allocation8_spill] sm:$0xff] %v6021_v56  ;;  %v6024_v44 = vpop.permute.xlu1 %1628  ;;  %v6026_v55 = vpop.permute.xlu0 %1626  ;;  %v1789_v56 = vrot.slane %v5888_v8, 2 }
 0x379   : > { %9054 = vst [vmem:[#allocation12_spill] sm:$0xff] %v6024_v44  ;;  %v9060_v44 = vld [vmem:[#allocation11_spill] sm:$0xff] }
 0x37a   : > { %9055 = vst [vmem:[#allocation31_spill] sm:$0xff] %v6026_v55  ;;  %v9061_v55 = vld [vmem:[#allocation18_spill] sm:$0xff] }
 0x37d   : > { %1752 = vrot.lane.b32.xlu2 %v1689_v7, %s4392_s21 }
 0x37e   : > { %1793 = vrot.lane.b32.xlu1 %v9056_v37, %s4393_s22  ;;  %1754 = vrot.lane.b32.xlu0 %v1691_v46, %s4392_s21  ;;  %v9063_v37 = vld [vmem:[#allocation35_spill] sm:$0xff] }
 0x37f   : > { %v6033_v14 = vpop.permute.xlu2 %1648 }
 0x380   : > { %9057 = vst [vmem:[#allocation30_spill] sm:$0xff] %v6033_v14  ;;  %v6035_v51 = vpop.permute.xlu1 %1634  ;;  %v6037_v50 = vpop.permute.xlu0 %1632  ;;  %v9068_v14 = vld [vmem:[#allocation51_spill] sm:$0xff] }
 0x381   : > { %9058 = vst [vmem:[#allocation10_spill] sm:$0xff] %v6035_v51  ;;  %v9064_v51 = vld [vmem:[#allocation50_spill] sm:$0xff] }
 0x382   : > { %9059 = vst [vmem:[#allocation182_spill] sm:$0xff] %v6037_v50 }
 0x385   : > { %1795 = vrot.lane.b32.xlu2 %v9060_v44, %s4393_s22  ;;  %v9065_v44 = vld [vmem:[#allocation39_spill] sm:$0xff] }
 0x386   : > { %1799 = vrot.lane.b32.xlu1 %v9061_v55, %s4393_s22  ;;  %1797 = vrot.lane.b32.xlu0 %v9062_v16, %s4393_s22 }
 0x387   : > { %v6045_v7 = vpop.permute.xlu2 %1692 }
 0x388   : > { %v6047_v60 = vpop.permute.xlu1 %1640  ;;  %v6049_v46 = vpop.permute.xlu0 %1638 }
 0x38d   : > { %1801 = vrot.lane.b32.xlu2 %v9063_v37, %s4393_s22  ;;  %v9070_v37 = vld [vmem:[#allocation58_spill] sm:$0xff] }
 0x38e   : > { %1805 = vrot.lane.b32.xlu1 %v9064_v51, %s4393_s22  ;;  %1803 = vrot.lane.b32.xlu0 %v9065_v44, %s4393_s22 }
 0x38f   : > { %v6057_v50 = vpop.permute.xlu2 %1698 }
 0x390   : > { %v6059_v55 = vpop.permute.xlu1 %1646  ;;  %v6061_v16 = vpop.permute.xlu0 %1644 }
 0x391   : > { %9066 = vst [vmem:[#allocation11_spill] sm:$0xff] %v6059_v55  ;;  %v9074_v55 = vld [vmem:[#allocation83_spill] sm:$0xff] }
 0x392   : > { %9067 = vst [vmem:[#allocation18_spill] sm:$0xff] %v6061_v16 }
 0x395   : > { %1807 = vrot.lane.b32.xlu2 %v9068_v14, %s4393_s22  ;;  %v9075_v14 = vld [vmem:[#allocation71_spill] sm:$0xff] }
 0x396   : > { %1811 = vrot.lane.b32.xlu1 %v9069_v61, %s4393_s22  ;;  %1809 = vrot.lane.b32.xlu0 %v9070_v37, %s4393_s22 }
 0x397   : > { %v6069_v38 = vpop.permute.xlu2 %1704 }
 0x398   : > { %v6071_v51 = vpop.permute.xlu1 %1652  ;;  %v6073_v44 = vpop.permute.xlu0 %1650 }
 0x399   : > { %9071 = vst [vmem:[#allocation19_spill] sm:$0xff] %v6071_v51 }
 0x39a   : > { %9072 = vst [vmem:[#allocation35_spill] sm:$0xff] %v6073_v44  ;;  %v1788_v44 = vrot.slane %v5886_v12, 2  ;;  %v2159_v12 = vld [vmem:[%s8729_s3 + $0x40] sm:$0xff] }
 0x39b   : > { %2268 = vmatpush.msra.mxu1 %v2159_v12  ;;  %4278 = vmatpush.msrb.mxu3 %v2159_v12 }
 0x39d   : > { %1813 = vrot.lane.b32.xlu2 %v9073_v20, %s4393_s22  ;;  %v9077_v20 = vld [vmem:[#allocation90_spill] sm:$0xff] }
 0x39e   : > { %1817 = vrot.lane.b32.xlu1 %v9074_v55, %s4393_s22  ;;  %1815 = vrot.lane.b32.xlu0 %v9075_v14, %s4393_s22 }
 0x39f   : > { %v6081_v16 = vpop.permute.xlu2 %1710 }
 0x3a0   : > { %v6083_v61 = vpop.permute.xlu1 %1696  ;;  %v6085_v37 = vpop.permute.xlu0 %1694 }
 0x3a5   : > { %1819 = vrot.lane.b32.xlu2 %v9076_v41, %s4393_s22  ;;  %v1790_v41 = vsel %vm1110_vm4, %v1788_v44, %v1789_v56 }
 0x3a6   : > { %1823 = vrot.lane.b32.xlu1 %v5471_v27, %s4393_s22  ;;  %1821 = vrot.lane.b32.xlu0 %v9077_v20, %s4393_s22 }
 0x3a7   : > { %v6093_v51 = vpop.permute.xlu2 %1716 }
 0x3a8   : > { %9078 = vst [vmem:[#allocation50_spill] sm:$0xff] %v6093_v51  ;;  %v6095_v55 = vpop.permute.xlu1 %1702  ;;  %v6097_v14 = vpop.permute.xlu0 %1700 }
 0x3ad   : > { %1825 = vrot.lane.b32.xlu2 %v5499_v4, %s4393_s22 }
 0x3ae   : > { %1829 = vrot.lane.b32.xlu1 %v5568_v49, %s4393_s22  ;;  %1827 = vrot.lane.b32.xlu0 %v5517_v31, %s4393_s22 }
 0x3af   : > { %v6108_v27 = vpop.permute.xlu2 %1722 }
 0x3b0   : > { %9079 = vst [vmem:[#allocation39_spill] sm:$0xff] %v6108_v27  ;;  %v6110_v20 = vpop.permute.xlu1 %1708  ;;  %v6112_v51 = vpop.permute.xlu0 %1706  ;;  %v9098_v27 = vld [vmem:[#allocation15_spill] sm:$0xff] }
 0x3b5   : > { %1831 = vrot.lane.b32.xlu2 %v5575_v54, %s4393_s22 }
 0x3b6   : > { %1835 = vrot.lane.b32.xlu1 %v5647_v21, %s4393_s22  ;;  %1833 = vrot.lane.b32.xlu0 %v5595_v5, %s4393_s22 }
 0x3b7   : > { %v6120_v4 = vpop.permute.xlu2 %1728 }
 0x3b8   : > { %9080 = vst [vmem:[#allocation51_spill] sm:$0xff] %v6120_v4  ;;  %v6122_v49 = vpop.permute.xlu1 %1714  ;;  %v6124_v31 = vpop.permute.xlu0 %1712 }
 0x3bd   : > { %1837 = vrot.lane.b32.xlu2 %v5652_v13, %s4393_s22  ;;  %v2158_v13 = vld [vmem:[%s8729_s3 + $0x38] sm:$0xff] }
 0x3be   : > { %1841 = vrot.lane.b32.xlu1 %v4924_v40, %s4393_s22  ;;  %1839 = vrot.lane.b32.xlu0 %v5673_v2, %s4393_s22  ;;  %v2157_v40 = vld [vmem:[%s8729_s3 + $0x30] sm:$0xff]  ;;  %v2156_v2 = vld [vmem:[%s8729_s3 + $0x28] sm:$0xff] }
 0x3bf   : > { %v6132_v54 = vpop.permute.xlu2 %1734  ;;  %2269 = vmatpush.msra.mxu1 %v2158_v13  ;;  %4279 = vmatpush.msrb.mxu3 %v2158_v13  ;;  %v9086_v13 = vld [vmem:[#allocation148_spill] sm:$0xff] }
 0x3c0   : > { %9081 = vst [vmem:[#allocation65_spill] sm:$0xff] %v6132_v54  ;;  %v6134_v21 = vpop.permute.xlu1 %1720  ;;  %v6136_v5 = vpop.permute.xlu0 %1718 }
 0x3c1   : > { %9082 = vst [vmem:[#allocation58_spill] sm:$0xff] %v6134_v21  ;;  %2270 = vmatpush.msra.mxu1 %v2157_v40  ;;  %4280 = vmatpush.msrb.mxu3 %v2157_v40  ;;  %v1791_v40 = vrot.slane %v6013_v48, 2  ;;  %v4323_v21 = vld [vmem:[#allocation2 + $0x8] sm:$0xff] }
 0x3c2   : > { %9083 = vst [vmem:[#allocation72_spill] sm:$0xff] %v6136_v5  ;;  %v9100_v5 = vld [vmem:[#allocation28_spill] sm:$0xff] }
 0x3c3   : > { %2271 = vmatpush.msra.mxu1 %v2156_v2  ;;  %4281 = vmatpush.msrb.mxu3 %v2156_v2  ;;  %v2152_v2 = vld [vmem:[%s8729_s3 + $0x8] sm:$0xff] }
 0x3c5   : > { %1843 = vrot.lane.b32.xlu2 %v4932_v42, %s4393_s22  ;;  %v2155_v42 = vld [vmem:[%s8729_s3 + $0x20] sm:$0xff] }
 0x3c6   : > { %1847 = vrot.lane.b32.xlu1 %v5038_v45, %s4393_s22  ;;  %1845 = vrot.lane.b32.xlu0 %v5007_v25, %s4393_s22  ;;  %v2154_v25 = vld [vmem:[%s8729_s3 + $0x18] sm:$0xff]  ;;  %v2153_v45 = vld [vmem:[%s8729_s3 + $0x10] sm:$0xff] }
 0x3c7   : > { %v6156_v8 = vpop.permute.xlu2 %1740  ;;  %2272 = vmatpush.msra.mxu1 %v2155_v42  ;;  %4282 = vmatpush.msrb.mxu3 %v2155_v42 }
 0x3c8   : > { %v6158_v44 = vpop.permute.xlu1 %1726  ;;  %v6160_v12 = vpop.permute.xlu0 %1724 }
 0x3c9   : > { %9084 = vst [vmem:[#allocation83_spill] sm:$0xff] %v6158_v44  ;;  %2273 = vmatpush.msra.mxu1 %v2154_v25  ;;  %4283 = vmatpush.msrb.mxu3 %v2154_v25 }
 0x3ca   : > { %9085 = vst [vmem:[#allocation71_spill] sm:$0xff] %v6160_v12  ;;  %v4322_v12 = vld [vmem:[#allocation2] sm:$0xff] }
 0x3cb   : > { %2274 = vmatpush.msra.mxu1 %v2153_v45  ;;  %4284 = vmatpush.msrb.mxu3 %v2153_v45  ;;  %v9093_v45 = vld [vmem:[#allocation4_spill] sm:$0xff] }
 0x3cd   : > { %1849 = vrot.lane.b32.xlu2 %v9086_v13, %s4393_s22  ;;  %2275 = vmatpush.msra.mxu1 %v2152_v2 }
 0x3ce   : > { %1853 = vrot.lane.b32.xlu1 %v1790_v41, %s4393_s22  ;;  %1851 = vrot.lane.b32.xlu0 %v5752_v22, %s4393_s22  ;;  %v2151_v41 = vld [vmem:[%s8729_s3] sm:$0xff]  ;;  %v1792_v22 = vsel %vm1110_vm4, %v1789_v56, %v1791_v40  ;;  %v1889_v56 = vsel %vm549_vm1, %v4322_v12, %v9093_v45  ;;  %v9099_v12 = vld [vmem:[#allocation6_spill] sm:$0xff] }
 0x3cf   : > { %v6184_v4 = vpop.permute.xlu2 %1746  ;;  %2276 = vmatpush.msra.mxu1 %v2151_v41  ;;  %4285 = vmatpush.msrb.mxu3 %v2152_v2  ;;  %v1890_v45 = vsel %vm549_vm1, %v4323_v21, %v9099_v12  ;;  %v9103_v12 = vld [vmem:[#allocation21_spill] sm:$0xff] }
 0x3d0   : > { %v6180_v42 = vpop.permute.xlu1 %1732  ;;  %v6182_v54 = vpop.permute.xlu0 %1730  ;;  %9089 = vst [vmem:[#allocation148_spill] sm:$0xff] %v6184_v4 }
 0x3d1   : > { %9087 = vst [vmem:[#allocation84_spill] sm:$0xff] %v6180_v42  ;;  %4286 = vmatpush.msrb.mxu3 %v2151_v41  ;;  %v9096_v41 = vld [vmem:[#allocation7_spill] sm:$0xff] }
 0x3d2   : > { %9088 = vst [vmem:[#allocation90_spill] sm:$0xff] %v6182_v54 }
 0x3d5   : > { %1855 = vrot.lane.b32.xlu2 %v1792_v22, %s4393_s22  ;;  %v1922_v22 = vsel %vm1921_vm7, %v1889_v56, %v9096_v41 }
 0x3d7   : > { %v6195_v13 = vpop.permute.xlu2 %1752 }
 0x3d8   : > { %v6191_v48 = vpop.permute.xlu1 %1738  ;;  %v6193_v25 = vpop.permute.xlu0 %1736  ;;  %9092 = vst [vmem:[#allocation185_spill] sm:$0xff] %v6195_v13 }
 0x3d9   : > { %9090 = vst [vmem:[#allocation183_spill] sm:$0xff] %v6191_v48  ;;  %v9097_v48 = vld [vmem:[#allocation17_spill] sm:$0xff] }
 0x3da   : > { %9091 = vst [vmem:[#allocation184_spill] sm:$0xff] %v6193_v25  ;;  %v1955_v25 = vsel %vm1954_vm6, %v1922_v22, %v9097_v48 }
 0x3db   : > { %v1988_v13 = vsel %vm1987_vm8, %v1955_v25, %v9098_v27  ;;  %v9102_v25 = vld [vmem:[#allocation5_spill] sm:$0xff] }
 0x3df   : > { %v1796_v44 = vpop.permute.xlu2 %1795 }
 0x3e0   : > { %v6197_v42 = vpop.permute.xlu1 %1744  ;;  %v6199_v54 = vpop.permute.xlu0 %1742 }
 0x3e7   : > { %v1802_v41 = vpop.permute.xlu2 %1801 }
 0x3e8   : > { %v6203_v40 = vpop.permute.xlu1 %1750  ;;  %v6205_v2 = vpop.permute.xlu0 %1748 }
 0x3e9   : > { %9094 = vst [vmem:[#allocation4_spill] sm:$0xff] %v6203_v40  ;;  %v2021_v40 = vsel %vm2020_vm9, %v1988_v13, %v9100_v5  ;;  %v9104_v13 = vld [vmem:[#allocation23_spill] sm:$0xff] }
 0x3ea   : > { %9095 = vst [vmem:[#allocation186_spill] sm:$0xff] %v6205_v2  ;;  %v2054_v56 = vsel %vm2053_vm11, %v2021_v40, %v5948_v43  ;;  %v1923_v2 = vsel %vm1921_vm7, %v1890_v45, %v9102_v25  ;;  %v9105_v40 = vld [vmem:[#allocation16_spill] sm:$0xff] }
 0x3eb   : > { %v2087_v48 = vsel %vm2086_vm10, %v2054_v56, %v6045_v7  ;;  %v1956_v5 = vsel %vm1954_vm6, %v1923_v2, %v9103_v12  ;;  %v4324_v56 = vld [vmem:[#allocation2 + $0x18] sm:$0xff]  ;;  %v9107_v12 = vld [vmem:[#allocation20_spill] sm:$0xff] }
 0x3ec   : > { %v1989_v43 = vsel %vm1987_vm8, %v1956_v5, %v9104_v13  ;;  %v9108_v13 = vld [vmem:[#allocation25_spill] sm:$0xff] }
 0x3ed   : > { %v2022_v4 = vsel %vm2020_vm9, %v1989_v43, %v9105_v40  ;;  %v9110_v43 = vld [vmem:[#allocation49_spill] sm:$0xff] }
 0x3ee   : > { %v2055_v7 = vsel %vm2053_vm11, %v2022_v4, %v5946_v36  ;;  %v9109_v4 = vld [vmem:[#allocation43_spill] sm:$0xff] }
 0x3ef   : > { %v6239_v25 = vpop.permute.xlu2 %1807 }
 0x3f0   : > { %v1794_v22 = vpop.permute.xlu1 %1793  ;;  %v6221_v27 = vpop.permute.xlu0 %1754 }
 0x3f1   : > { %9101 = vst [vmem:[#allocation7_spill] sm:$0xff] %v6221_v27  ;;  %v2119_v21 = vsel %vm339_vm0, %v2087_v48, %v1794_v22  ;;  %v9106_v27 = vld [vmem:[#allocation24_spill] sm:$0xff]  ;;  %v2088_v48 = vsel %vm2086_vm10, %v2055_v7, %v6085_v37 }
 0x3f2   : > { %4201 = vmatmul.msk.f32.vlgmr.msra.gmra.mxu1 %vm2164_vm12, %v2119_v21  ;;  %v1891_v45 = vsel %vm549_vm1, %v4324_v56, %v9106_v27  ;;  %v2120_v21 = vsel %vm339_vm0, %v2088_v48, %v1796_v44 }
 0x3f3   : > { %v1924_v5 = vsel %vm1921_vm7, %v1891_v45, %v9107_v12  ;;  %v4325_v45 = vld [vmem:[#allocation2 + $0x20] sm:$0xff] }
 0x3f4   : > { %v1957_v36 = vsel %vm1954_vm6, %v1924_v5, %v9108_v13  ;;  %v9112_v5 = vld [vmem:[#allocation26_spill] sm:$0xff] }
 0x3f5   : > { %v1990_v27 = vsel %vm1987_vm8, %v1957_v36, %v9109_v4  ;;  %v9113_v4 = vld [vmem:[#allocation34_spill] sm:$0xff] }
 0x3f6   : > { %v2023_v37 = vsel %vm2020_vm9, %v1990_v27, %v9110_v43  ;;  %v9114_v27 = vld [vmem:[#allocation40_spill] sm:$0xff]  ;;  %v9115_v43 = vld [vmem:[#allocation46_spill] sm:$0xff] }
 0x3f7   : > { %v2056_v40 = vsel %vm2053_vm11, %v2023_v37, %v5920_v47  ;;  %v6261_v36 = vpop.permute.xlu2 %1813 }
 0x3f8   : > { %v1800_v22 = vpop.permute.xlu1 %1799  ;;  %v1798_v2 = vpop.permute.xlu0 %1797  ;;  %v2089_v44 = vsel %vm2086_vm10, %v2056_v40, %v6083_v61  ;;  %v9116_v40 = vld [vmem:[#allocation44_spill] sm:$0xff] }
 0x3f9   : > { %v2121_v48 = vsel %vm339_vm0, %v2089_v44, %v1798_v2  ;;  %v1893_v44 = vsel %vm549_vm1, %v5756_v19, %v9116_v40 }
 0x3fa   : > { %4202 = vmatmul.msk.f32.gmra.mxu1 %vm2164_vm12, %v2120_v21  ;;  %v9111_v21 = vld [vmem:[#allocation14_spill] sm:$0xff] }
 0x3fb   : > { %v1892_v12 = vsel %vm549_vm1, %v4325_v45, %v9111_v21 }
 0x3fc   : > { %v1925_v13 = vsel %vm1921_vm7, %v1892_v12, %v9112_v5  ;;  %v9117_v5 = vld [vmem:[#allocation36_spill] sm:$0xff] }
 0x3fd   : > { %v1958_v47 = vsel %vm1954_vm6, %v1925_v13, %v9113_v4  ;;  %v1926_v13 = vsel %vm1921_vm7, %v1893_v44, %v9117_v5  ;;  %v9118_v4 = vld [vmem:[#allocation57_spill] sm:$0xff] }
 0x3fe   : > { %v1991_v61 = vsel %vm1987_vm8, %v1958_v47, %v9114_v27  ;;  %v9119_v47 = vld [vmem:[#allocation63_spill] sm:$0xff] }
 0x3ff   : > { %v2024_v2 = vsel %vm2020_vm9, %v1991_v61, %v9115_v43  ;;  %v6288_v27 = vpop.permute.xlu2 %1819 }
 0x400   : > { %v1806_v7 = vpop.permute.xlu1 %1805  ;;  %v1804_v56 = vpop.permute.xlu0 %1803  ;;  %v2057_v37 = vsel %vm2053_vm11, %v2024_v2, %v5960_v58  ;;  %v1959_v58 = vsel %vm1954_vm6, %v1926_v13, %v9118_v4  ;;  %v9123_v13 = vld [vmem:[#allocation48_spill] sm:$0xff] }
 0x401   : > { %v1992_v19 = vsel %vm1987_vm8, %v1959_v58, %v9119_v47  ;;  %v9125_v58 = vld [vmem:[#allocation67_spill] sm:$0xff] }
 0x402   : > { %4203 = vmatmul.msk.f32.gmra.mxu1 %vm2164_vm12, %v2121_v48  ;;  %v2090_v48 = vsel %vm2086_vm10, %v2057_v37, %v6057_v50  ;;  %v9120_v50 = vld [vmem:[#allocation66_spill] sm:$0xff] }
 0x403   : > { %v2122_v12 = vsel %vm339_vm0, %v2090_v48, %v1800_v22  ;;  %v2025_v61 = vsel %vm2020_vm9, %v1992_v19, %v9120_v50  ;;  %v9121_v22 = vld [vmem:[#allocation41_spill] sm:$0xff]  ;;  %v9122_v48 = vld [vmem:[#allocation47_spill] sm:$0xff] }
 0x404   : > { %v2058_v43 = vsel %vm2053_vm11, %v2025_v61, %v5958_v30  ;;  %v1894_v2 = vsel %vm549_vm1, %v5760_v11, %v9121_v22  ;;  %v9124_v30 = vld [vmem:[#allocation70_spill] sm:$0xff]  ;;  %v4326_v50 = vld [vmem:[#allocation2 + $0x48] sm:$0xff]  ;;  %v9126_v61 = vld [vmem:[#allocation59_spill] sm:$0xff] }
 0x405   : > { %v2091_v37 = vsel %vm2086_vm10, %v2058_v43, %v6097_v14 }
 0x406   : > { %v2123_v5 = vsel %vm339_vm0, %v2091_v37, %v1802_v41  ;;  %v1895_v41 = vsel %vm549_vm1, %v4326_v50, %v9126_v61  ;;  %v9127_v37 = vld [vmem:[#allocation68_spill] sm:$0xff] }
 0x407   : > { %v6315_v19 = vpop.permute.xlu2 %1825 }
 0x408   : > { %v6276_v45 = vpop.permute.xlu1 %1811  ;;  %v6278_v21 = vpop.permute.xlu0 %1809 }
 0x40a   : > { %4204 = vmatmul.msk.f32.gmra.mxu1 %vm2164_vm12, %v2122_v12  ;;  %v1927_v12 = vsel %vm1921_vm7, %v1894_v2, %v9122_v48  ;;  %v1928_v48 = vsel %vm1921_vm7, %v1895_v41, %v9127_v37  ;;  %v9132_v41 = vld [vmem:[#allocation62_spill] sm:$0xff] }
 0x40b   : > { %v1960_v4 = vsel %vm1954_vm6, %v1927_v12, %v9123_v13  ;;  %v9129_v13 = vld [vmem:[#allocation75_spill] sm:$0xff] }
 0x40c   : > { %v1993_v11 = vsel %vm1987_vm8, %v1960_v4, %v9124_v30  ;;  %v9130_v30 = vld [vmem:[#allocation89_spill] sm:$0xff] }
 0x40d   : > { %v2026_v14 = vsel %vm2020_vm9, %v1993_v11, %v9125_v58  ;;  %v4327_v58 = vld [vmem:[#allocation2 + $0x50] sm:$0xff] }
 0x40e   : > { %v2059_v47 = vsel %vm2053_vm11, %v2026_v14, %v5932_v24  ;;  %v9131_v14 = vld [vmem:[#allocation60_spill] sm:$0xff] }
 0x40f   : > { %v2092_v43 = vsel %vm2086_vm10, %v2059_v47, %v6095_v55  ;;  %v1896_v47 = vsel %vm549_vm1, %v4327_v58, %v9131_v14 }
 0x410   : > { %v6299_v40 = vpop.permute.xlu1 %1817  ;;  %v6301_v44 = vpop.permute.xlu0 %1815  ;;  %v2124_v12 = vsel %vm339_vm0, %v2092_v43, %v1804_v56  ;;  %v1929_v43 = vsel %vm1921_vm7, %v1896_v47, %v9132_v41 }
 0x412   : > { %4205 = vmatmul.msk.f32.gmra.mxu1 %vm2164_vm12, %v2123_v5  ;;  %v9128_v5 = vld [vmem:[#allocation76_spill] sm:$0xff] }
 0x413   : > { %v1961_v24 = vsel %vm1954_vm6, %v1928_v48, %v9128_v5  ;;  %v9133_v48 = vld [vmem:[#allocation80_spill] sm:$0xff]  ;;  %v9134_v5 = vld [vmem:[#allocation86_spill] sm:$0xff] }
 0x414   : > { %v1994_v4 = vsel %vm1987_vm8, %v1961_v24, %v9129_v13 }
 0x415   : > { %v2027_v55 = vsel %vm2020_vm9, %v1994_v4, %v9130_v30  ;;  %v4328_v30 = vld [vmem:[#allocation2 + $0x60] sm:$0xff] }
 0x416   : > { %v2060_v11 = vsel %vm2053_vm11, %v2027_v55, %v5974_v59  ;;  %v6350_v59 = vpop.permute.xlu2 %1831  ;;  %v9136_v55 = vld [vmem:[#allocation82_spill] sm:$0xff] }
 0x417   : > { %v2093_v56 = vsel %vm2086_vm10, %v2060_v11, %v6069_v38  ;;  %v9135_v38 = vld [vmem:[#allocation78_spill] sm:$0xff]  ;;  %v1913_v11 = vsel %vm549_vm1, %v5572_v35, %v5800_v26  ;;  %v9138_v26 = vld [vmem:[#allocation85_spill] sm:$0xff] }
 0x418   : > { %v6321_v22 = vpop.permute.xlu1 %1823  ;;  %v6323_v2 = vpop.permute.xlu0 %1821  ;;  %v2125_v37 = vsel %vm339_vm0, %v2093_v56, %v1806_v7  ;;  %v1897_v7 = vsel %vm549_vm1, %v4328_v30, %v9136_v55  ;;  %v1946_v47 = vsel %vm1921_vm7, %v1913_v11, %v5814_v57  ;;  %v9142_v11 = vld [vmem:[#allocation87_spill] sm:$0xff] }
 0x41a   : > { %4206 = vmatmul.msk.f32.gmra.mxu1 %vm2164_vm12, %v2124_v12  ;;  %v1962_v12 = vsel %vm1954_vm6, %v1929_v43, %v9133_v48  ;;  %v9137_v43 = vld [vmem:[#allocation81_spill] sm:$0xff]  ;;  %v9139_v48 = vld [vmem:[#allocation95_spill] sm:$0xff] }
 0x41b   : > { %v1995_v24 = vsel %vm1987_vm8, %v1962_v12, %v9134_v5  ;;  %v1930_v35 = vsel %vm1921_vm7, %v1897_v7, %v9137_v43  ;;  %v9140_v12 = vld [vmem:[#allocation103_spill] sm:$0xff] }
 0x41c   : > { %v2028_v13 = vsel %vm2020_vm9, %v1995_v24, %v9135_v38 }
 0x41d   : > { %v2061_v4 = vsel %vm2053_vm11, %v2028_v13, %v5972_v15  ;;  %v1979_v15 = vsel %vm1954_vm6, %v1946_v47, %v5840_v10  ;;  %v4329_v13 = vld [vmem:[#allocation2 + $0x68] sm:$0xff] }
 0x41e   : > { %v2094_v58 = vsel %vm2086_vm10, %v2061_v4, %v6112_v51  ;;  %v1963_v51 = vsel %vm1954_vm6, %v1930_v35, %v9138_v26  ;;  %v9141_v4 = vld [vmem:[#allocation73_spill] sm:$0xff]  ;;  %v4330_v35 = vld [vmem:[#allocation2 + $0x78] sm:$0xff]  ;;  %v9145_v26 = vld [vmem:[#allocation96_spill] sm:$0xff] }
 0x41f   : > { %v2126_v56 = vsel %vm339_vm0, %v2094_v58, %v6239_v25  ;;  %v1996_v57 = vsel %vm1987_vm8, %v1963_v51, %v9139_v48  ;;  %v2012_v25 = vsel %vm1987_vm8, %v1979_v15, %v5836_v1  ;;  %v1898_v30 = vsel %vm549_vm1, %v4329_v13, %v9141_v4  ;;  %v9143_v47 = vld [vmem:[#allocation93_spill] sm:$0xff] }
 0x420   : > { %v6341_v50 = vpop.permute.xlu1 %1829  ;;  %v6343_v61 = vpop.permute.xlu0 %1827  ;;  %v2029_v10 = vsel %vm2020_vm9, %v1996_v57, %v9140_v12  ;;  %v2045_v5 = vsel %vm2020_vm9, %v2012_v25, %v5910_v17  ;;  %v1914_v1 = vsel %vm549_vm1, %v5581_v18, %v5816_v33  ;;  %v1899_v51 = vsel %vm549_vm1, %v4330_v35, %v9145_v26  ;;  %v9151_v13 = vld [vmem:[#allocation37_spill] sm:$0xff]  ;;  %v9160_v26 = vld [vmem:[#allocation115_spill] sm:$0xff] }
 0x421   : > { %v2062_v24 = vsel %vm2053_vm11, %v2029_v10, %v5944_v9  ;;  %v2078_v38 = vsel %vm2053_vm11, %v2045_v5, %v6049_v46  ;;  %v1931_v9 = vsel %vm1921_vm7, %v1898_v30, %v9142_v11  ;;  %v1947_v18 = vsel %vm1921_vm7, %v1914_v1, %v5812_v62  ;;  %v9146_v62 = vld [vmem:[#allocation98_spill] sm:$0xff]  ;;  %v9147_v10 = vld [vmem:[#allocation88_spill] sm:$0xff]  ;;  %v9152_v1 = vld [vmem:[#allocation105_spill] sm:$0xff] }
 0x422   : > { %4207 = vmatmul.msk.f32.gmra.mxu1 %vm2164_vm12, %v2125_v37  ;;  %v6381_v37 = vpop.permute.xlu2 %1837  ;;  %v2095_v55 = vsel %vm2086_vm10, %v2062_v24, %v6110_v20  ;;  %v2111_v17 = vsel %vm2086_vm10, %v2078_v38, %v6156_v8  ;;  %v1980_v33 = vsel %vm1954_vm6, %v1947_v18, %v5838_v53  ;;  %v1915_v20 = vsel %vm549_vm1, %v5630_v28, %v5850_v29  ;;  %v9148_v24 = vld [vmem:[#allocation102_spill] sm:$0xff] }
 0x423   : > { %v2127_v58 = vsel %vm339_vm0, %v2095_v55, %v6278_v21  ;;  %v9144_v21 = vld [vmem:[#allocation91_spill] sm:$0xff]  ;;  %v2013_v43 = vsel %vm1987_vm8, %v1980_v33, %v5868_v34  ;;  %v1948_v28 = vsel %vm1921_vm7, %v1915_v20, %v5852_v52  ;;  %v1932_v5 = vsel %vm1921_vm7, %v1899_v51, %v9147_v10  ;;  %v9149_v38 = vld [vmem:[#allocation22_spill] sm:$0xff]  ;;  %v9156_v33 = vld [vmem:[#allocation29_spill] sm:$0xff] }
 0x424   : > { %v2046_v53 = vsel %vm2020_vm9, %v2013_v43, %v5880_v3  ;;  %v9159_v43 = vld [vmem:[#allocation32_spill] sm:$0xff]  ;;  %v9161_v51 = vld [vmem:[#allocation178_spill] sm:$0xff] }
 0x425   : > { %v2079_v34 = vsel %vm2053_vm11, %v2046_v53, %v6047_v60  ;;  %v1981_v60 = vsel %vm1954_vm6, %v1948_v28, %v9149_v38  ;;  %v9162_v53 = vld [vmem:[#allocation181_spill] sm:$0xff]  ;;  %v9163_v28 = vld [vmem:[#allocation18_spill] sm:$0xff] }
 0x426   : > { %v2112_v12 = vsel %vm2086_vm10, %v2079_v34, %v6199_v54  ;;  %v2014_v4 = vsel %vm1987_vm8, %v1981_v60, %v9151_v13  ;;  %v9164_v34 = vld [vmem:[#allocation38_spill] sm:$0xff] }
 0x427   : > { %v2047_v30 = vsel %vm2020_vm9, %v2014_v4, %v5924_v32  ;;  %v4332_v10 = vld [vmem:[#allocation2 + $0x90] sm:$0xff] }
 0x428   : > { %v6366_v14 = vpop.permute.xlu1 %1835  ;;  %v6374_v41 = vpop.permute.xlu0 %1833  ;;  %v9168_v38 = vld [vmem:[#allocation106_spill] sm:$0xff] }
 0x429   : > { %v9169_v13 = vld [vmem:[#allocation118_spill] sm:$0xff] }
 0x42a   : > { %4208 = vmatmul.msk.f32.gmra.mxu1 %vm2164_vm12, %v2126_v56  ;;  %v1964_v56 = vsel %vm1954_vm6, %v1931_v9, %v9143_v47  ;;  %v1844_v57 = vpop.permute.xlu2 %1843  ;;  %v9153_v9 = vld [vmem:[#allocation8_spill] sm:$0xff] }
 0x42b   : > { %v1997_v15 = vsel %vm1987_vm8, %v1964_v56, %v9144_v21  ;;  %v2144_v52 = vsel %vm339_vm0, %v2112_v12, %v1844_v57  ;;  %v9154_v47 = vld [vmem:[#allocation92_spill] sm:$0xff]  ;;  %v9155_v56 = vld [vmem:[#allocation99_spill] sm:$0xff]  ;;  %v9157_v21 = vld [vmem:[#allocation94_spill] sm:$0xff] }
 0x42c   : > { %v2030_v48 = vsel %vm2020_vm9, %v1997_v15, %v9146_v62  ;;  %v9158_v15 = vld [vmem:[#allocation110_spill] sm:$0xff] }
 0x42d   : > { %v2063_v29 = vsel %vm2053_vm11, %v2030_v48, %v5987_v6  ;;  %v1965_v6 = vsel %vm1954_vm6, %v1932_v5, %v9148_v24  ;;  %v9166_v5 = vld [vmem:[#allocation97_spill] sm:$0xff]  ;;  %v9167_v24 = vld [vmem:[#allocation148_spill] sm:$0xff] }
 0x42e   : > { %v2096_v25 = vsel %vm2086_vm10, %v2063_v29, %v6081_v16  ;;  %v9150_v16 = vld [vmem:[#allocation111_spill] sm:$0xff] }
 0x42f   : > { %v2128_v3 = vsel %vm339_vm0, %v2096_v25, %v6276_v45  ;;  %v1998_v54 = vsel %vm1987_vm8, %v1965_v6, %v9150_v16  ;;  %v1916_v45 = vsel %vm549_vm1, %v5628_v39, %v5824_v0  ;;  %v9165_v25 = vld [vmem:[#allocation166_spill] sm:$0xff] }
 0x430   : > { %v1842_v7 = vpop.permute.xlu1 %1841  ;;  %v6420_v8 = vpop.permute.xlu0 %1839  ;;  %v2031_v55 = vsel %vm2020_vm9, %v1998_v54, %v9152_v1  ;;  %v1917_v12 = vsel %vm549_vm1, %v9165_v25, %v9164_v34  ;;  %v9188_v25 = vld [vmem:[#allocation64_spill] sm:$0xff] }
 0x431   : > { %v2143_v46 = vsel %vm339_vm0, %v2111_v17, %v1842_v7  ;;  %v1949_v7 = vsel %vm1921_vm7, %v1916_v45, %v5866_v23  ;;  %v2064_v11 = vsel %vm2053_vm11, %v2031_v55, %v5985_v63  ;;  %v9170_v45 = vld [vmem:[#allocation27_spill] sm:$0xff]  ;;  %v9172_v55 = vld [vmem:[#allocation56_spill] sm:$0xff] }
 0x432   : > { %4209 = vmatmul.msk.f32.gmra.mxu1 %vm2164_vm12, %v2127_v58  ;;  %4225 = vmatmul.msk.f32.vlgmr.msrb.gmra.mxu3 %vm2164_vm12, %v2143_v46  ;;  %v2080_v46 = vsel %vm2053_vm11, %v2047_v30, %v9153_v9  ;;  %v4331_v58 = vld [vmem:[#allocation2 + $0x80] sm:$0xff]  ;;  %v2097_v0 = vsel %vm2086_vm10, %v2064_v11, %v6124_v31  ;;  %v1982_v20 = vsel %vm1954_vm6, %v1949_v7, %v9156_v33  ;;  %v9171_v30 = vld [vmem:[#allocation54_spill] sm:$0xff]  ;;  %v9173_v7 = vld [vmem:[#allocation113_spill] sm:$0xff] }
 0x433   : > { %v1900_v39 = vsel %vm549_vm1, %v4331_v58, %v9154_v47  ;;  %v2113_v32 = vsel %vm2086_vm10, %v2080_v46, %v6197_v42  ;;  %v2129_v23 = vsel %vm339_vm0, %v2097_v0, %v6261_v36  ;;  %v2015_v35 = vsel %vm1987_vm8, %v1982_v20, %v9159_v43  ;;  %v4333_v11 = vld [vmem:[#allocation2 + $0x98] sm:$0xff]  ;;  %v9175_v58 = vld [vmem:[#allocation125_spill] sm:$0xff]  ;;  %v9179_v33 = vld [vmem:[#allocation50_spill] sm:$0xff] }
 0x434   : > { %v1933_v18 = vsel %vm1921_vm7, %v1900_v39, %v9155_v56  ;;  %v2048_v62 = vsel %vm2020_vm9, %v2015_v35, %v9161_v51  ;;  %v9174_v9 = vld [vmem:[#allocation107_spill] sm:$0xff]  ;;  %v9176_v39 = vld [vmem:[#allocation173_spill] sm:$0xff]  ;;  %v9177_v56 = vld [vmem:[#allocation108_spill] sm:$0xff] }
 0x435   : > { %v1966_v31 = vsel %vm1954_vm6, %v1933_v18, %v9157_v21  ;;  %v2081_v29 = vsel %vm2053_vm11, %v2048_v62, %v9163_v28  ;;  %v1902_v46 = vsel %vm549_vm1, %v4333_v11, %v9174_v9  ;;  %v9180_v21 = vld [vmem:[#allocation186_spill] sm:$0xff] }
 0x436   : > { %v1999_v42 = vsel %vm1987_vm8, %v1966_v31, %v9158_v15  ;;  %v2114_v6 = vsel %vm2086_vm10, %v2081_v29, %v9167_v24  ;;  %v9181_v15 = vld [vmem:[#allocation101_spill] sm:$0xff]  ;;  %v9184_v62 = vld [vmem:[#allocation114_spill] sm:$0xff] }
 0x437   : > { %v2032_v36 = vsel %vm2020_vm9, %v1999_v42, %v9160_v26  ;;  %v1935_v42 = vsel %vm1921_vm7, %v1902_v46, %v9181_v15  ;;  %v9182_v26 = vld [vmem:[#allocation33_spill] sm:$0xff]  ;;  %v9186_v28 = vld [vmem:[#allocation126_spill] sm:$0xff] }
 0x438   : > { %v1846_v17 = vpop.permute.xlu0 %1845  ;;  %v1848_v48 = vpop.permute.xlu1 %1847  ;;  %v2065_v57 = vsel %vm2053_vm11, %v2032_v36, %v9162_v53  ;;  %v9183_v36 = vld [vmem:[#allocation167_spill] sm:$0xff]  ;;  %v9185_v53 = vld [vmem:[#allocation42_spill] sm:$0xff] }
 0x439   : > { %v2145_v63 = vsel %vm339_vm0, %v2113_v32, %v1846_v17  ;;  %v2146_v54 = vsel %vm339_vm0, %v2114_v6, %v1848_v48  ;;  %v1850_v32 = vpop.permute.xlu2 %1849  ;;  %v1918_v51 = vsel %vm549_vm1, %v9183_v36, %v9182_v26  ;;  %v1968_v48 = vsel %vm1954_vm6, %v1935_v42, %v9184_v62  ;;  %v9191_v6 = vld [vmem:[#allocation123_spill] sm:$0xff]  ;;  %v9199_v9 = vld [vmem:[#allocation122_spill] sm:$0xff]  ;;  %v9206_v36 = vld [vmem:[#allocation100_spill] sm:$0xff] }
 0x43a   : > { %4210 = vmatmul.msk.f32.gmra.mxu1 %vm2164_vm12, %v2128_v3  ;;  %4226 = vmatmul.msk.f32.gmra.mxu3 %vm2164_vm12, %v2144_v52  ;;  %v1901_v3 = vsel %vm549_vm1, %v4332_v10, %v9166_v5  ;;  %v2098_v52 = vsel %vm2086_vm10, %v2065_v57, %v6122_v49  ;;  %v1950_v49 = vsel %vm1921_vm7, %v1917_v12, %v9170_v45  ;;  %v9189_v10 = vld [vmem:[#allocation180_spill] sm:$0xff]  ;;  %v4334_v45 = vld [vmem:[#allocation2 + $0xa8] sm:$0xff]  ;;  %v9204_v15 = vld [vmem:[#allocation138_spill] sm:$0xff] }
 0x43b   : > { %v1934_v60 = vsel %vm1921_vm7, %v1901_v3, %v9168_v38  ;;  %v2130_v16 = vsel %vm339_vm0, %v2098_v52, %v6301_v44  ;;  %v1983_v1 = vsel %vm1954_vm6, %v1950_v49, %v9171_v30  ;;  %v1951_v57 = vsel %vm1921_vm7, %v1918_v51, %v9185_v53  ;;  %v9190_v3 = vld [vmem:[#allocation116_spill] sm:$0xff]  ;;  %v9195_v49 = vld [vmem:[#allocation117_spill] sm:$0xff]  ;;  %v9207_v62 = vld [vmem:[#allocation35_spill] sm:$0xff] }
 0x43c   : > { %v1967_v4 = vsel %vm1954_vm6, %v1934_v60, %v9169_v13  ;;  %v2016_v17 = vsel %vm1987_vm8, %v1983_v1, %v9172_v55  ;;  %v2001_v29 = vsel %vm1987_vm8, %v1968_v48, %v9186_v28  ;;  %v9192_v60 = vld [vmem:[#allocation30_spill] sm:$0xff]  ;;  %v9194_v13 = vld [vmem:[#allocation169_spill] sm:$0xff]  ;;  %v1903_v30 = vsel %vm549_vm1, %v4334_v45, %v9195_v49  ;;  %v9196_v1 = vld [vmem:[#allocation72_spill] sm:$0xff] }
 0x43d   : > { %v2000_v44 = vsel %vm1987_vm8, %v1967_v4, %v9173_v7  ;;  %v2049_v0 = vsel %vm2020_vm9, %v2016_v17, %v9176_v39  ;;  %v2034_v52 = vsel %vm2020_vm9, %v2001_v29, %v9190_v3  ;;  %v9197_v17 = vld [vmem:[#allocation4_spill] sm:$0xff]  ;;  %v1936_v46 = vsel %vm1921_vm7, %v1903_v30, %v9199_v9  ;;  %v9200_v39 = vld [vmem:[#allocation74_spill] sm:$0xff]  ;;  %v9208_v28 = vld [vmem:[#allocation109_spill] sm:$0xff] }
 0x43e   : > { %v2033_v47 = vsel %vm2020_vm9, %v2000_v44, %v9175_v58  ;;  %v2067_v38 = vsel %vm2053_vm11, %v2034_v52, %v9191_v6  ;;  %v9198_v44 = vld [vmem:[#allocation61_spill] sm:$0xff]  ;;  %v9213_v6 = vld [vmem:[#allocation170_spill] sm:$0xff]  ;;  %v9218_v30 = vld [vmem:[#allocation127_spill] sm:$0xff] }
 0x43f   : > { %v2066_v18 = vsel %vm2053_vm11, %v2033_v47, %v9177_v56  ;;  %v2100_v55 = vsel %vm2086_vm10, %v2067_v38, %v9196_v1  ;;  %v9221_v9 = vld [vmem:[#allocation176_spill] sm:$0xff] }
 0x440   : > { %v2099_v20 = vsel %vm2086_vm10, %v2066_v18, %v9179_v33  ;;  %v1852_v24 = vpop.permute.xlu0 %1851  ;;  %v2132_v58 = vsel %vm339_vm0, %v2100_v55, %v6288_v27  ;;  %v6589_v18 = vld [vmem:[#allocation3] sm:$0xff]  ;;  %v9203_v27 = vld [vmem:[#allocation69_spill] sm:$0xff]  ;;  %v1854_v26 = vpop.permute.xlu1 %1853  ;;  %v4336_v55 = vld [vmem:[#allocation2 + $0xc0] sm:$0xff] }
 0x441   : > { %v2131_v43 = vsel %vm339_vm0, %v2099_v20, %v6299_v40  ;;  %v9187_v40 = vld [vmem:[#allocation45_spill] sm:$0xff] }
 0x442   : > { %4211 = vmatmul.msk.f32.gmra.mxu1 %vm2164_vm12, %v2129_v23  ;;  %4227 = vmatmul.msk.f32.gmra.mxu3 %vm2164_vm12, %v2145_v63  ;;  %v9178_v23 = vld [vmem:[#allocation11_spill] sm:$0xff]  ;;  %v1984_v34 = vsel %vm1954_vm6, %v1951_v57, %v9187_v40  ;;  %v4335_v57 = vld [vmem:[#allocation2 + $0xb0] sm:$0xff] }
 0x443   : > { %v2082_v63 = vsel %vm2053_vm11, %v2049_v0, %v9178_v23  ;;  %v2017_v12 = vsel %vm1987_vm8, %v1984_v34, %v9188_v25  ;;  %v6591_v23 = vld [vmem:[#allocation3 + $0x8] sm:$0xff]  ;;  %v1904_v29 = vsel %vm549_vm1, %v4335_v57, %v9208_v28  ;;  %v9209_v40 = vld [vmem:[#allocation58_spill] sm:$0xff]  ;;  %v9210_v25 = vld [vmem:[#allocation185_spill] sm:$0xff] }
 0x444   : > { %v2115_v31 = vsel %vm2086_vm10, %v2082_v63, %v9180_v21  ;;  %v2050_v5 = vsel %vm2020_vm9, %v2017_v12, %v9189_v10  ;;  %v9202_v63 = vld [vmem:[#allocation131_spill] sm:$0xff]  ;;  %v2595_v21 = vrot.slane %v6589_v18, 1  ;;  %v9211_v10 = vld [vmem:[#allocation121_spill] sm:$0xff] }
 0x445   : > { %v2147_v35 = vsel %vm339_vm0, %v2115_v31, %v1850_v32  ;;  %v9201_v32 = vld [vmem:[#allocation120_spill] sm:$0xff]  ;;  %v2596_v31 = vrot.slane %v6591_v23, 1  ;;  %v9230_v57 = vld [vmem:[#allocation9_spill] sm:$0xff] }
 0x446   : > { %v1969_v56 = vsel %vm1954_vm6, %v1936_v46, %v9201_v32 }
 0x447   : > { %v2002_v33 = vsel %vm1987_vm8, %v1969_v56, %v9202_v63  ;;  %v2597_v53 = vsel %vm933_vm3, %v2595_v21, %v2596_v31  ;;  %v9224_v56 = vld [vmem:[#allocation39_spill] sm:$0xff] }
 0x448   : > { %v2035_v42 = vsel %vm2020_vm9, %v2002_v33, %v9204_v15  ;;  %2675 = vrot.lane.b32.xlu0 %v2597_v53, %s4385_s26  ;;  %v9225_v33 = vld [vmem:[#allocation7_spill] sm:$0xff] }
 0x449   : > { %v2068_v51 = vsel %vm2053_vm11, %v2035_v42, %v9206_v36 }
 0x44a   : > { %4212 = vmatmul.msk.f32.gmra.mxu1 %vm2164_vm12, %v2130_v16  ;;  %4228 = vmatmul.msk.f32.gmra.mxu3 %vm2164_vm12, %v2146_v54  ;;  %v2083_v16 = vsel %vm2053_vm11, %v2050_v5, %v9192_v60  ;;  %v9193_v54 = vld [vmem:[#allocation52_spill] sm:$0xff]  ;;  %v2101_v34 = vsel %vm2086_vm10, %v2068_v51, %v9209_v40  ;;  %v1937_v5 = vsel %vm1921_vm7, %v1904_v29, %v9211_v10  ;;  %v9214_v60 = vld [vmem:[#allocation129_spill] sm:$0xff]  ;;  %v9232_v10 = vld [vmem:[#allocation71_spill] sm:$0xff] }
 0x44b   : > { %v1919_v4 = vsel %vm549_vm1, %v9194_v13, %v9193_v54  ;;  %v2116_v7 = vsel %vm2086_vm10, %v2083_v16, %v9197_v17  ;;  %v2133_v3 = vsel %vm339_vm0, %v2101_v34, %v6323_v2  ;;  %v1970_v16 = vsel %vm1954_vm6, %v1937_v5, %v9214_v60  ;;  %v9215_v54 = vld [vmem:[#allocation55_spill] sm:$0xff]  ;;  %v9219_v17 = vld [vmem:[#allocation132_spill] sm:$0xff]  ;;  %v4337_v34 = vld [vmem:[#allocation2 + $0xc8] sm:$0xff] }
 0x44c   : > { %v1952_v11 = vsel %vm1921_vm7, %v1919_v4, %v9198_v44  ;;  %v2148_v47 = vsel %vm339_vm0, %v2116_v7, %v1852_v24  ;;  %v9212_v24 = vld [vmem:[#allocation53_spill] sm:$0xff]  ;;  %v9217_v2 = vld [vmem:[#allocation79_spill] sm:$0xff]  ;;  %v2003_v1 = vsel %vm1987_vm8, %v1970_v16, %v9218_v30  ;;  %v1905_v7 = vsel %vm549_vm1, %v4336_v55, %v9219_v17  ;;  %v9220_v44 = vld [vmem:[#allocation134_spill] sm:$0xff] }
 0x44d   : > { %v1985_v0 = vsel %vm1954_vm6, %v1952_v11, %v9200_v39  ;;  %v1920_v38 = vsel %vm549_vm1, %v9213_v6, %v9212_v24  ;;  %v9216_v4 = vld [vmem:[#allocation77_spill] sm:$0xff]  ;;  %v2036_v11 = vsel %vm2020_vm9, %v2003_v1, %v9220_v44  ;;  %v6663_v51 = vld [vmem:[%s8730_s4] ss:$0 sm:$0xff]  ;;  %v9235_v16 = vld [vmem:[#allocation143_spill] sm:$0xff] }
 0x44e   : > { %v2018_v20 = vsel %vm1987_vm8, %v1985_v0, %v9203_v27  ;;  %v1953_v13 = vsel %vm1921_vm7, %v1920_v38, %v9215_v54  ;;  %v9223_v0 = vld [vmem:[#allocation19_spill] sm:$0xff]  ;;  %v9240_v44 = vld [vmem:[#allocation140_spill] sm:$0xff] }
 0x44f   : > { %v1986_v45 = vsel %vm1954_vm6, %v1953_v13, %v9216_v4  ;;  %v9236_v13 = vld [vmem:[#allocation172_spill] sm:$0xff]  ;;  %v4338_v30 = vld [vmem:[#allocation2 + $0xd8] sm:$0xff] }
 0x450   : > { %v2019_v49 = vsel %vm1987_vm8, %v1986_v45, %v9217_v2  ;;  %v9237_v45 = vld [vmem:[#allocation104_spill] sm:$0xff]  ;;  %v9239_v55 = vld [vmem:[#allocation83_spill] sm:$0xff] }
 0x451   : > { %v2052_v46 = vsel %vm2020_vm9, %v2019_v49, %v9221_v9 }
 0x452   : > { %4213 = vmatmul.msk.f32.gmra.mxu1 %vm2164_vm12, %v2131_v43  ;;  %4229 = vmatmul.msk.f32.gmra.mxu3 %vm2164_vm12, %v2147_v35  ;;  %v9205_v43 = vld [vmem:[#allocation179_spill] sm:$0xff]  ;;  %v2085_v32 = vsel %vm2053_vm11, %v2052_v46, %v9223_v0 }
 0x453   : > { %v2051_v35 = vsel %vm2020_vm9, %v2018_v20, %v9205_v43  ;;  %v2118_v27 = vsel %vm2086_vm10, %v2085_v32, %v9225_v33  ;;  %v9226_v20 = vld [vmem:[#allocation124_spill] sm:$0xff]  ;;  %v9227_v43 = vld [vmem:[#allocation137_spill] sm:$0xff]  ;;  %v9241_v46 = vld [vmem:[#allocation147_spill] sm:$0xff] }
 0x454   : > { %v2084_v48 = vsel %vm2053_vm11, %v2051_v35, %v9207_v62  ;;  %v1938_v21 = vsel %vm1921_vm7, %v1905_v7, %v9226_v20  ;;  %v6665_v62 = vld [vmem:[#allocation3 + $0x10] sm:$0x3]  ;;  %v9243_v32 = vld [vmem:[#allocation171_spill] sm:$0xff] }
 0x455   : > { %v2117_v12 = vsel %vm2086_vm10, %v2084_v48, %v9210_v25  ;;  %v1971_v35 = vsel %vm1954_vm6, %v1938_v21, %v9227_v43  ;;  %v9229_v48 = vld [vmem:[#allocation139_spill] sm:$0xff]  ;;  %v9231_v25 = vld [vmem:[#allocation128_spill] sm:$0xff] }
 0x456   : > { %v2149_v52 = vsel %vm339_vm0, %v2117_v12, %v1854_v26  ;;  %v9228_v26 = vld [vmem:[#allocation144_spill] sm:$0xff]  ;;  %v1906_v12 = vsel %vm549_vm1, %v4337_v34, %v9231_v25  ;;  %v9249_v25 = vld [vmem:[#allocation154_spill] sm:$0xff] }
 0x457   : > { %v2004_v36 = vsel %vm1987_vm8, %v1971_v35, %v9228_v26  ;;  %v4339_v20 = vld [vmem:[#allocation2 + $0xe0] sm:$0xff] }
 0x458   : > { %v2037_v53 = vsel %vm2020_vm9, %v2004_v36, %v9229_v48 }
 0x459   : > { %v2070_v28 = vsel %vm2053_vm11, %v2037_v53, %v9230_v57 }
 0x45a   : > { %4214 = vmatmul.msk.f32.gmra.mxu1 %vm2164_vm12, %v2132_v58  ;;  %4230 = vmatmul.msk.f32.gmra.mxu3 %vm2164_vm12, %v2148_v47  ;;  %v1856_v58 = vpop.permute.xlu2 %1855  ;;  %v9222_v47 = vld [vmem:[#allocation13_spill] sm:$0xff]  ;;  %v2103_v5 = vsel %vm2086_vm10, %v2070_v28, %v9232_v10  ;;  %v9248_v28 = vld [vmem:[#allocation146_spill] sm:$0xff] }
 0x45b   : > { %v2069_v39 = vsel %vm2053_vm11, %v2036_v11, %v9222_v47  ;;  %v2150_v42 = vsel %vm339_vm0, %v2118_v27, %v1856_v58  ;;  %v2135_v6 = vsel %vm339_vm0, %v2103_v5, %v6315_v19  ;;  %v9238_v19 = vld [vmem:[#allocation133_spill] sm:$0xff]  ;;  %v4340_v10 = vld [vmem:[#allocation2 + $0xf0] sm:$0xff] }
 0x45c   : > { %v2102_v63 = vsel %vm2086_vm10, %v2069_v39, %v9224_v56  ;;  %v1907_v1 = vsel %vm549_vm1, %v4338_v30, %v9238_v19  ;;  %v9242_v39 = vld [vmem:[#allocation145_spill] sm:$0xff]  ;;  %v9250_v5 = vld [vmem:[#allocation150_spill] sm:$0xff] }
 0x45d   : > { %v2134_v15 = vsel %vm339_vm0, %v2102_v63, %v6321_v22  ;;  %v2598_v22 = vrot.slane %v6665_v62, 1  ;;  %v1940_v11 = vsel %vm1921_vm7, %v1907_v1, %v9240_v44  ;;  %v9244_v63 = vld [vmem:[#allocation31_spill] sm:$0xff]  ;;  %v9255_v19 = vld [vmem:[#allocation149_spill] sm:$0xff] }
 0x45e   : > { %v1973_v58 = vsel %vm1954_vm6, %v1940_v11, %v9241_v46  ;;  %v9258_v11 = vld [vmem:[#allocation112_spill] sm:$0xff] }
 0x45f   : > { %v2599_v40 = vsel %vm933_vm3, %v2596_v31, %v2598_v22  ;;  %v9234_v31 = vld [vmem:[#allocation130_spill] sm:$0xff]  ;;  %v2006_v0 = vsel %vm1987_vm8, %v1973_v58, %v9242_v39  ;;  %v9247_v22 = vld [vmem:[#allocation136_spill] sm:$0xff]  ;;  %v4341_v58 = vld [vmem:[#allocation2 + $0xf8] sm:$0xff] }
 0x460   : > { %2677 = vrot.lane.b32.xlu1 %v2599_v40, %s4385_s26  ;;  %v2039_v56 = vsel %vm2020_vm9, %v2006_v0, %v9243_v32  ;;  %v9260_v39 = vld [vmem:[#allocation84_spill] sm:$0xff] }
 0x461   : > { %v2072_v33 = vsel %vm2053_vm11, %v2039_v56, %v9244_v63  ;;  %v9261_v56 = vld [vmem:[#allocation153_spill] sm:$0xff] }
 0x462   : > { %4215 = vmatmul.msk.f32.gmra.mxu1 %vm2164_vm12, %v2133_v3  ;;  %4231 = vmatmul.msk.f32.gmra.mxu3 %vm2164_vm12, %v2149_v52  ;;  %v9233_v52 = vld [vmem:[#allocation135_spill] sm:$0xff] }
 0x463   : > { %v1939_v24 = vsel %vm1921_vm7, %v1906_v12, %v9233_v52  ;;  %v9251_v52 = vld [vmem:[#allocation165_spill] sm:$0xff] }
 0x464   : > { %v1972_v60 = vsel %vm1954_vm6, %v1939_v24, %v9234_v31  ;;  %v9252_v31 = vld [vmem:[#allocation12_spill] sm:$0xff] }
 0x465   : > { %v2005_v54 = vsel %vm1987_vm8, %v1972_v60, %v9235_v16 }
 0x466   : > { %v2038_v4 = vsel %vm2020_vm9, %v2005_v54, %v9236_v13  ;;  %v9253_v54 = vld [vmem:[#allocation90_spill] sm:$0xff] }
 0x467   : > { %v2071_v2 = vsel %vm2053_vm11, %v2038_v4, %v9237_v45  ;;  %v9254_v45 = vld [vmem:[#allocation151_spill] sm:$0xff] }
 0x468   : > { %v2104_v17 = vsel %vm2086_vm10, %v2071_v2, %v9239_v55  ;;  %v9256_v55 = vld [vmem:[#allocation159_spill] sm:$0xff] }
 0x469   : > { %v2136_v9 = vsel %vm339_vm0, %v2104_v17, %v6343_v61  ;;  %v9245_v61 = vld [vmem:[#allocation141_spill] sm:$0xff] }
 0x46a   : > { %4216 = vmatmul.msk.f32.gmra.mxu1 %vm2164_vm12, %v2134_v15  ;;  %4232 = vmatmul.msk.f32.gmra.mxu3 %vm2164_vm12, %v2150_v42  ;;  %v1908_v21 = vsel %vm549_vm1, %v4339_v20, %v9245_v61  ;;  %v9246_v15 = vld [vmem:[#allocation51_spill] sm:$0xff]  ;;  %v9262_v20 = vld [vmem:[#allocation157_spill] sm:$0xff] }
 0x46b   : > { %v2105_v42 = vsel %vm2086_vm10, %v2072_v33, %v9246_v15  ;;  %v1941_v48 = vsel %vm1921_vm7, %v1908_v21, %v9247_v22 }
 0x46c   : > { %v2137_v35 = vsel %vm339_vm0, %v2105_v42, %v6341_v50 }
 0x46f   : > { %v2278_v29 = vpop.f32.mrf.mxu1 }
 0x470   : > { %v2279_v3 = vadd.f32 %v6663_v51, %v2278_v29  ;;  %v1974_v29 = vsel %vm1954_vm6, %v1941_v48, %v9248_v28  ;;  %v9264_v48 = vld [vmem:[#allocation174_spill] sm:$0xff] }
 0x471   : > { %v2007_v12 = vsel %vm1987_vm8, %v1974_v29, %v9249_v25 }
 0x472   : > { %v2374_v38 = vmax.f32 %v2279_v3, 0.0  ;;  %4217 = vmatmul.msk.f32.gmra.mxu1 %vm2164_vm12, %v2135_v6  ;;  %v1909_v3 = vsel %vm549_vm1, %v4340_v10, %v9250_v5  ;;  %v2040_v24 = vsel %vm2020_vm9, %v2007_v12, %v9251_v52  ;;  %v4342_v12 = vld [vmem:[#allocation2 + $0x108] sm:$0xff]  ;;  %v9266_v10 = vld [vmem:[#allocation160_spill] sm:$0xff] }
 0x473   : > { %v2073_v60 = vsel %vm2053_vm11, %v2040_v24, %v9252_v31  ;;  %v1942_v2 = vsel %vm1921_vm7, %v1909_v3, %v9254_v45  ;;  %v1911_v5 = vsel %vm549_vm1, %v4342_v12, %v9266_v10  ;;  %v9267_v3 = vld [vmem:[#allocation65_spill] sm:$0xff]  ;;  %v9270_v45 = vld [vmem:[#allocation164_spill] sm:$0xff] }
 0x474   : > { %2461 = vst.msk [vmem:[#allocation3 + $0x19] sm:$0xff] %vm549_vm1, %v2374_v38  ;;  %v2106_v13 = vsel %vm2086_vm10, %v2073_v60, %v9253_v54  ;;  %v1975_v1 = vsel %vm1954_vm6, %v1942_v2, %v9255_v19  ;;  %v9272_v19 = vld [vmem:[#allocation10_spill] sm:$0xff] }
 0x475   : > { %v2008_v17 = vsel %vm1987_vm8, %v1975_v1, %v9256_v55  ;;  %v4343_v55 = vld [vmem:[#allocation2 + $0x110] sm:$0xff] }
 0x477   : > { %v2281_v49 = vpop.f32.mrf.mxu1 }
 0x478   : > { %v2282_v7 = vadd.f32 %v6663_v51, %v2281_v49  ;;  %v2138_v49 = vsel %vm339_vm0, %v2106_v13, %v6350_v59  ;;  %v9259_v59 = vld [vmem:[#allocation142_spill] sm:$0xff]  ;;  %v9269_v13 = vld [vmem:[#allocation161_spill] sm:$0xff] }
 0x47a   : > { %v2375_v47 = vmax.f32 %v2282_v7, 0.0  ;;  %4218 = vmatmul.msk.f32.gmra.mxu1 %vm2164_vm12, %v2136_v9  ;;  %v9257_v7 = vld [vmem:[#allocation175_spill] sm:$0xff] }
 0x47b   : > { %v6719_v26 = vld [vmem:[#allocation3 + $0x18] sm:$0xff]  ;;  %v2041_v44 = vsel %vm2020_vm9, %v2008_v17, %v9257_v7  ;;  %v9273_v17 = vld [vmem:[#allocation156_spill] sm:$0xff] }
 0x47c   : > { %2462 = vst.msk [vmem:[#allocation3 + $0x21] sm:$0xff] %vm549_vm1, %v2375_v47  ;;  %v2600_v34 = vrot.slane %v6719_v26, 1  ;;  %v2074_v9 = vsel %vm2053_vm11, %v2041_v44, %v9258_v11  ;;  %v1910_v47 = vsel %vm549_vm1, %v4341_v58, %v9259_v59  ;;  %v1912_v7 = vsel %vm549_vm1, %v4343_v55, %v9273_v17  ;;  %v9274_v44 = vld [vmem:[#allocation184_spill] sm:$0xff] }
 0x47d   : > { %v2107_v0 = vsel %vm2086_vm10, %v2074_v9, %v9260_v39  ;;  %v1943_v63 = vsel %vm1921_vm7, %v1910_v47, %v9261_v56  ;;  %v9276_v56 = vld [vmem:[#allocation158_spill] sm:$0xff] }
 0x47e   : > { %v2139_v33 = vsel %vm339_vm0, %v2107_v0, %v6374_v41  ;;  %v1976_v61 = vsel %vm1954_vm6, %v1943_v63, %v9262_v20 }
 0x47f   : > { %v2284_v27 = vpop.f32.mrf.mxu1 }
 0x480   : > { %v2285_v43 = vadd.f32 %v6663_v51, %v2284_v27 }
 0x482   : > { %v2376_v36 = vmax.f32 %v2285_v43, 0.0  ;;  %4219 = vmatmul.msk.f32.gmra.mxu1 %vm2164_vm12, %v2137_v35 }
 0x483   : > { %v6724_v53 = vld [vmem:[#allocation3 + $0x20] sm:$0xff]  ;;  %v6726_v57 = vld [vmem:[#allocation3 + $0x28] sm:$0x3] }
 0x484   : > { %2463 = vst.msk [vmem:[#allocation3 + $0x31] sm:$0xff] %vm549_vm1, %v2376_v36  ;;  %v2601_v40 = vrot.slane %v6724_v53, 1  ;;  %v2603_v50 = vrot.slane %v6726_v57, 1  ;;  %v9263_v36 = vld [vmem:[#allocation155_spill] sm:$0xff] }
 0x485   : > { %v2009_v22 = vsel %vm1987_vm8, %v1976_v61, %v9263_v36  ;;  %v9277_v61 = vld [vmem:[#allocation163_spill] sm:$0xff] }
 0x486   : > { %v6741_v6 = vsel %vm933_vm3, %v2601_v40, %v2603_v50  ;;  %v6744_v38 = vsel %vm933_vm3, %v2600_v34, %v2601_v40  ;;  %v2042_v28 = vsel %vm2020_vm9, %v2009_v22, %v9264_v48  ;;  %v9265_v50 = vld [vmem:[#allocation182_spill] sm:$0xff]  ;;  %v9279_v22 = vld [vmem:[#allocation119_spill] sm:$0xff] }
 0x487   : > { %2681 = vrot.lane.b32.xlu0 %v6741_v6, %s4385_s26  ;;  %2679 = vrot.lane.b32.xlu2 %v6744_v38, %s4385_s26  ;;  %v2287_v16 = vpop.f32.mrf.mxu1  ;;  %v2075_v34 = vsel %vm2053_vm11, %v2042_v28, %v9265_v50  ;;  %v9280_v50 = vld [vmem:[#allocation183_spill] sm:$0xff] }
 0x488   : > { %v2288_v4 = vadd.f32 %v6663_v51, %v2287_v16  ;;  %v2108_v52 = vsel %vm2086_vm10, %v2075_v34, %v9267_v3  ;;  %v9268_v16 = vld [vmem:[#allocation152_spill] sm:$0xff] }
 0x489   : > { %v2140_v31 = vsel %vm339_vm0, %v2108_v52, %v6366_v14  ;;  %v1944_v54 = vsel %vm1921_vm7, %v1911_v5, %v9268_v16 }
 0x48a   : > { %v2377_v30 = vmax.f32 %v2288_v4, 0.0  ;;  %4220 = vmatmul.msk.f32.gmra.mxu1 %vm2164_vm12, %v2138_v49  ;;  %v1977_v4 = vsel %vm1954_vm6, %v1944_v54, %v9269_v13  ;;  %v9271_v49 = vld [vmem:[#allocation168_spill] sm:$0xff] }
 0x48b   : > { %v6778_v27 = vld [vmem:[#allocation3 + $0x30] sm:$0xff]  ;;  %v2010_v2 = vsel %vm1987_vm8, %v1977_v4, %v9270_v45 }
 0x48c   : > { %2464 = vst.msk [vmem:[#allocation3 + $0x39] sm:$0xff] %vm549_vm1, %v2377_v30  ;;  %v2605_v41 = vrot.slane %v6778_v27, 1  ;;  %v2043_v30 = vsel %vm2020_vm9, %v2010_v2, %v9271_v49 }
 0x48d   : > { %v2076_v14 = vsel %vm2053_vm11, %v2043_v30, %v9272_v19 }
 0x48e   : > { %v2109_v11 = vsel %vm2086_vm10, %v2076_v14, %v9274_v44 }
 0x48f   : > { %v2290_v46 = vpop.f32.mrf.mxu1  ;;  %v2141_v59 = vsel %vm339_vm0, %v2109_v11, %v6381_v37 }
 0x490   : > { %v2291_v32 = vadd.f32 %v6663_v51, %v2290_v46  ;;  %v9275_v46 = vld [vmem:[#allocation162_spill] sm:$0xff] }
 0x491   : > { %v1945_v58 = vsel %vm1921_vm7, %v1912_v7, %v9275_v46 }
 0x492   : > { %v2378_v21 = vmax.f32 %v2291_v32, 0.0  ;;  %4221 = vmatmul.msk.f32.gmra.mxu1 %vm2164_vm12, %v2139_v33  ;;  %v1978_v63 = vsel %vm1954_vm6, %v1945_v58, %v9276_v56 }
 0x493   : > { %v6783_v15 = vld [vmem:[#allocation3 + $0x38] sm:$0xff]  ;;  %v6785_v42 = vld [vmem:[#allocation3 + $0x40] sm:$0x3] }
 0x494   : > { %2465 = vst.msk [vmem:[#allocation3 + $0x49] sm:$0xff] %vm549_vm1, %v2378_v21  ;;  %v2606_v43 = vrot.slane %v6783_v15, 1  ;;  %v2608_v35 = vrot.slane %v6785_v42, 1  ;;  %v2011_v21 = vsel %vm1987_vm8, %v1978_v63, %v9277_v61 }
 0x496   : > { %v6796_v29 = vsel %vm933_vm3, %v2606_v43, %v2608_v35  ;;  %v6799_v40 = vsel %vm933_vm3, %v2605_v41, %v2606_v43  ;;  %v9278_v43 = vld [vmem:[#allocation177_spill] sm:$0xff] }
 0x497   : > { %2685 = vrot.lane.b32.xlu2 %v6796_v29, %s4385_s26  ;;  %2683 = vrot.lane.b32.xlu1 %v6799_v40, %s4385_s26  ;;  %v2293_v25 = vpop.f32.mrf.mxu1  ;;  %v2044_v35 = vsel %vm2020_vm9, %v2011_v21, %v9278_v43 }
 0x498   : > { %v2294_v24 = vadd.f32 %v6663_v51, %v2293_v25  ;;  %v2077_v48 = vsel %vm2053_vm11, %v2044_v35, %v9279_v22 }
 0x499   : > { %v2110_v34 = vsel %vm2086_vm10, %v2077_v48, %v9280_v50 }
 0x49a   : > { %v2379_v60 = vmax.f32 %v2294_v24, 0.0  ;;  %4222 = vmatmul.msk.f32.gmra.mxu1 %vm2164_vm12, %v2140_v31  ;;  %v2142_v12 = vsel %vm339_vm0, %v2110_v34, %v6420_v8 }
 0x49b   : > { %v6835_v47 = vld [vmem:[#allocation3 + $0x48] sm:$0xff] }
 0x49c   : > { %2466 = vst.msk [vmem:[#allocation3 + $0x51] sm:$0xff] %vm549_vm1, %v2379_v60  ;;  %v2610_v37 = vrot.slane %v6835_v47, 1 }
 0x49f   : > { %v2296_v1 = vpop.f32.mrf.mxu1 }
 0x4a0   : > { %v2297_v9 = vadd.f32 %v6663_v51, %v2296_v1 }
 0x4a2   : > { %v2380_v39 = vmax.f32 %v2297_v9, 0.0  ;;  %4223 = vmatmul.msk.f32.gmra.mxu1 %vm2164_vm12, %v2141_v59 }
 0x4a3   : > { %v6838_v0 = vld [vmem:[#allocation3 + $0x50] sm:$0xff]  ;;  %v6840_v32 = vld [vmem:[#allocation3 + $0x58] sm:$0x3] }
 0x4a4   : > { %2467 = vst.msk [vmem:[#allocation3 + $0x61] sm:$0xff] %vm549_vm1, %v2380_v39  ;;  %v2611_v33 = vrot.slane %v6838_v0, 1  ;;  %v2613_v20 = vrot.slane %v6840_v32, 1 }
 0x4a6   : > { %v6853_v41 = vsel %vm933_vm3, %v2611_v33, %v2613_v20  ;;  %v6856_v36 = vsel %vm933_vm3, %v2610_v37, %v2611_v33 }
 0x4a7   : > { %v2299_v28 = vpop.f32.mrf.mxu1  ;;  %2689 = vrot.lane.b32.xlu1 %v6853_v41, %s4385_s26  ;;  %2687 = vrot.lane.b32.xlu0 %v6856_v36, %s4385_s26 }
 0x4a8   : > { %v2300_v25 = vadd.f32 %v6663_v51, %v2299_v28 }
 0x4aa   : > { %v2381_v10 = vmax.f32 %v2300_v25, 0.0  ;;  %4224 = vmatmul.msk.f32.gmra.mxu1 %vm2164_vm12, %v2142_v12 }
 0x4ab   : > { %v6872_v52 = vld [vmem:[#allocation3 + $0x60] sm:$0xff] }
 0x4ac   : > { %2468 = vst.msk [vmem:[#allocation3 + $0x69] sm:$0xff] %vm549_vm1, %v2381_v10  ;;  %v2615_v16 = vrot.slane %v6872_v52, 1 }
 0x4af   : > { %v2302_v5 = vpop.f32.mrf.mxu1 }
 0x4b0   : > { %v2303_v3 = vadd.f32 %v6663_v51, %v2302_v5 }
 0x4b2   : > { %v2382_v24 = vmax.f32 %v2303_v3, 0.0 }
 0x4b3   : > { %v6874_v31 = vld [vmem:[#allocation3 + $0x68] sm:$0xff]  ;;  %v6876_v60 = vld [vmem:[#allocation3 + $0x70] sm:$0x3] }
 0x4b4   : > { %2469 = vst.msk [vmem:[#allocation3 + $0x79] sm:$0xff] %vm549_vm1, %v2382_v24  ;;  %v2616_v8 = vrot.slane %v6874_v31, 1  ;;  %v2618_v54 = vrot.slane %v6876_v60, 1 }
 0x4b5   : > { %v2350_v13 = vpop.f32.mrf.mxu3 }
 0x4b6   : > { %v2351_v4 = vadd.f32 %v6663_v51, %v2350_v13  ;;  %v6884_v45 = vsel %vm933_vm3, %v2615_v16, %v2616_v8  ;;  %v6887_v2 = vsel %vm933_vm3, %v2616_v8, %v2618_v54 }
 0x4b7   : > { %9281 = vst [vmem:[#allocation17_spill] sm:$0xff] %v6884_v45  ;;  %2691 = vrot.lane.b32.xlu2 %v6884_v45, %s4385_s26  ;;  %2693 = vrot.lane.b32.xlu0 %v6887_v2, %s4385_s26  ;;  %v2305_v49 = vpop.f32.mrf.mxu1 }
 0x4b8   : > { %v2398_v30 = vmax.f32 %v2351_v4, 0.0  ;;  %v2306_v19 = vadd.f32 %v6663_v51, %v2305_v49 }
 0x4ba   : > { %2485 = vst.msk [vmem:[#allocation3 + $0x139] sm:$0xff] %vm549_vm1, %v2398_v30  ;;  %v2383_v14 = vmax.f32 %v2306_v19, 0.0 }
 0x4bb   : > { %v6898_v11 = vld [vmem:[#allocation3 + $0x78] sm:$0xff] }
 0x4bc   : > { %2470 = vst.msk [vmem:[#allocation3 + $0x81] sm:$0xff] %vm549_vm1, %v2383_v14  ;;  %v2620_v56 = vrot.slane %v6898_v11, 1 }
 0x4bd   : > { %v2353_v1 = vpop.f32.mrf.mxu3 }
 0x4be   : > { %v2354_v55 = vadd.f32 %v6663_v51, %v2353_v1 }
 0x4bf   : > { %v2308_v17 = vpop.f32.mrf.mxu1 }
 0x4c0   : > { %v2399_v7 = vmax.f32 %v2354_v55, 0.0  ;;  %v2309_v44 = vadd.f32 %v6663_v51, %v2308_v17 }
 0x4c2   : > { %2486 = vst.msk [vmem:[#allocation3 + $0x141] sm:$0xff] %vm549_vm1, %v2399_v7  ;;  %v2384_v9 = vmax.f32 %v2309_v44, 0.0 }
 0x4c3   : > { %v6901_v46 = vld [vmem:[#allocation3 + $0x80] sm:$0xff]  ;;  %v6903_v58 = vld [vmem:[#allocation3 + $0x88] sm:$0x3] }
 0x4c4   : > { %2471 = vst.msk [vmem:[#allocation3 + $0x91] sm:$0xff] %vm549_vm1, %v2384_v9  ;;  %v2621_v59 = vrot.slane %v6901_v46, 1  ;;  %v2623_v39 = vrot.slane %v6903_v58, 1 }
 0x4c5   : > { %v2356_v63 = vpop.f32.mrf.mxu3 }
 0x4c6   : > { %v2357_v33 = vadd.f32 %v6663_v51, %v2356_v63  ;;  %v6911_v20 = vsel %vm933_vm3, %v2621_v59, %v2623_v39  ;;  %v6914_v37 = vsel %vm933_vm3, %v2620_v56, %v2621_v59 }
 0x4c7   : > { %9282 = vst [vmem:[#allocation15_spill] sm:$0xff] %v6911_v20  ;;  %2697 = vrot.lane.b32.xlu2 %v6911_v20, %s4385_s26  ;;  %2695 = vrot.lane.b32.xlu1 %v6914_v37, %s4385_s26  ;;  %v2311_v61 = vpop.f32.mrf.mxu1 }
 0x4c8   : > { %v2400_v21 = vmax.f32 %v2357_v33, 0.0  ;;  %v2312_v43 = vadd.f32 %v6663_v51, %v2311_v61 }
 0x4c9   : > { %v7110_v20 = vld [vmem:[#allocation3 + $0x148] sm:$0x3] }
 0x4ca   : > { %2487 = vst.msk [vmem:[#allocation3 + $0x151] sm:$0xff] %vm549_vm1, %v2400_v21  ;;  %v2385_v35 = vmax.f32 %v2312_v43, 0.0 }
 0x4cb   : > { %v6925_v25 = vld [vmem:[#allocation3 + $0x90] sm:$0xff] }
 0x4cc   : > { %2472 = vst.msk [vmem:[#allocation3 + $0x99] sm:$0xff] %vm549_vm1, %v2385_v35  ;;  %v2625_v16 = vrot.slane %v6925_v25, 1 }
 0x4cd   : > { %v2359_v22 = vpop.f32.mrf.mxu3 }
 0x4ce   : > { %v2360_v48 = vadd.f32 %v6663_v51, %v2359_v22 }
 0x4cf   : > { %v2314_v28 = vpop.f32.mrf.mxu1 }
 0x4d0   : > { %v2401_v50 = vmax.f32 %v2360_v48, 0.0  ;;  %v2315_v34 = vadd.f32 %v6663_v51, %v2314_v28 }
 0x4d2   : > { %2488 = vst.msk [vmem:[#allocation3 + $0x159] sm:$0xff] %vm549_vm1, %v2401_v50  ;;  %v2386_v12 = vmax.f32 %v2315_v34, 0.0 }
 0x4d3   : > { %v6928_v10 = vld [vmem:[#allocation3 + $0x98] sm:$0xff]  ;;  %v6930_v5 = vld [vmem:[#allocation3 + $0xa0] sm:$0x3] }
 0x4d4   : > { %2473 = vst.msk [vmem:[#allocation3 + $0xa9] sm:$0xff] %vm549_vm1, %v2386_v12  ;;  %v2626_v3 = vrot.slane %v6928_v10, 1  ;;  %v2628_v24 = vrot.slane %v6930_v5, 1 }
 0x4d5   : > { %v2362_v8 = vpop.f32.mrf.mxu3 }
 0x4d6   : > { %v2363_v54 = vadd.f32 %v6663_v51, %v2362_v8  ;;  %v6938_v13 = vsel %vm933_vm3, %v2626_v3, %v2628_v24  ;;  %v6941_v4 = vsel %vm933_vm3, %v2625_v16, %v2626_v3 }
 0x4d7   : > { %9283 = vst [vmem:[#allocation6_spill] sm:$0xff] %v6938_v13  ;;  %v2317_v49 = vpop.f32.mrf.mxu1  ;;  %2701 = vrot.lane.b32.xlu1 %v6938_v13, %s4385_s26  ;;  %2699 = vrot.lane.b32.xlu0 %v6941_v4, %s4385_s26 }
 0x4d8   : > { %9284 = vst [vmem:[#allocation28_spill] sm:$0xff] %v6941_v4  ;;  %v2402_v30 = vmax.f32 %v2363_v54, 0.0  ;;  %v2318_v19 = vadd.f32 %v6663_v51, %v2317_v49  ;;  %v2772_v4 = vrot.slane %v6591_v23, 2 }
 0x4da   : > { %2489 = vst.msk [vmem:[#allocation3 + $0x169] sm:$0xff] %vm549_vm1, %v2402_v30  ;;  %v2387_v14 = vmax.f32 %v2318_v19, 0.0 }
 0x4db   : > { %v6952_v9 = vld [vmem:[#allocation3 + $0xa8] sm:$0xff] }
 0x4dc   : > { %2474 = vst.msk [vmem:[#allocation3 + $0xb1] sm:$0xff] %vm549_vm1, %v2387_v14  ;;  %v2630_v63 = vrot.slane %v6952_v9, 1 }
 0x4dd   : > { %v2365_v1 = vpop.f32.mrf.mxu3 }
 0x4de   : > { %v2366_v55 = vadd.f32 %v6663_v51, %v2365_v1 }
 0x4df   : > { %v2320_v17 = vpop.f32.mrf.mxu1 }
 0x4e0   : > { %v2403_v7 = vmax.f32 %v2366_v55, 0.0  ;;  %v2321_v44 = vadd.f32 %v6663_v51, %v2320_v17 }
 0x4e1   : > { %v7159_v45 = vpop.permute.xlu2 %2679 }
 0x4e2   : > { %2490 = vst.msk [vmem:[#allocation3 + $0x171] sm:$0xff] %vm549_vm1, %v2403_v7  ;;  %v2388_v59 = vmax.f32 %v2321_v44, 0.0 }
 0x4e3   : > { %v6955_v39 = vld [vmem:[#allocation3 + $0xb0] sm:$0xff]  ;;  %v6957_v56 = vld [vmem:[#allocation3 + $0xb8] sm:$0x3]  ;;  %9304 = vst [vmem:[#allocation41_spill] sm:$0xff] %v7159_v45 }
 0x4e4   : > { %2475 = vst.msk [vmem:[#allocation3 + $0xc1] sm:$0xff] %vm549_vm1, %v2388_v59  ;;  %v2631_v33 = vrot.slane %v6955_v39, 1  ;;  %v2633_v61 = vrot.slane %v6957_v56, 1 }
 0x4e5   : > { %v2368_v21 = vpop.f32.mrf.mxu3 }
 0x4e6   : > { %v2369_v43 = vadd.f32 %v6663_v51, %v2368_v21  ;;  %v6965_v35 = vsel %vm933_vm3, %v2630_v63, %v2631_v33  ;;  %v6968_v22 = vsel %vm933_vm3, %v2631_v33, %v2633_v61 }
 0x4e7   : > { %9285 = vst [vmem:[#allocation5_spill] sm:$0xff] %v6965_v35  ;;  %2703 = vrot.lane.b32.xlu2 %v6965_v35, %s4385_s26  ;;  %2705 = vrot.lane.b32.xlu0 %v6968_v22, %s4385_s26  ;;  %v2323_v48 = vpop.f32.mrf.mxu1 }
 0x4e8   : > { %9286 = vst [vmem:[#allocation21_spill] sm:$0xff] %v6968_v22  ;;  %v2404_v28 = vmax.f32 %v2369_v43, 0.0  ;;  %v2324_v50 = vadd.f32 %v6663_v51, %v2323_v48 }
 0x4e9   : > { %v7133_v23 = vld [vmem:[#allocation3 + $0x178] sm:$0x3] }
 0x4ea   : > { %2491 = vst.msk [vmem:[#allocation3 + $0x181] sm:$0xff] %vm549_vm1, %v2404_v28  ;;  %v2389_v34 = vmax.f32 %v2324_v50, 0.0 }
 0x4eb   : > { %v6979_v54 = vld [vmem:[#allocation3 + $0xc0] sm:$0xff] }
 0x4ec   : > { %2476 = vst.msk [vmem:[#allocation3 + $0xc9] sm:$0xff] %vm549_vm1, %v2389_v34  ;;  %v2635_v55 = vrot.slane %v6979_v54, 1 }
 0x4ed   : > { %v2371_v12 = vpop.f32.mrf.mxu3 }
 0x4ee   : > { %v2372_v3 = vadd.f32 %v6663_v51, %v2371_v12 }
 0x4ef   : > { %v2326_v24 = vpop.f32.mrf.mxu1 }
 0x4f0   : > { %v2405_v16 = vmax.f32 %v2372_v3, 0.0  ;;  %v2327_v8 = vadd.f32 %v6663_v51, %v2326_v24 }
 0x4f2   : > { %2492 = vst.msk [vmem:[#allocation3 + $0x189] sm:$0xff] %vm549_vm1, %v2405_v16  ;;  %v2390_v49 = vmax.f32 %v2327_v8, 0.0 }
 0x4f3   : > { %v6982_v30 = vld [vmem:[#allocation3 + $0xc8] sm:$0xff]  ;;  %v6984_v19 = vld [vmem:[#allocation3 + $0xd0] sm:$0x3] }
 0x4f4   : > { %2477 = vst.msk [vmem:[#allocation3 + $0xd9] sm:$0xff] %vm549_vm1, %v2390_v49  ;;  %v2636_v14 = vrot.slane %v6982_v30, 1  ;;  %v2638_v1 = vrot.slane %v6984_v19, 1 }
 0x4f6   : > { %v6991_v17 = vsel %vm933_vm3, %v2636_v14, %v2638_v1  ;;  %v6994_v7 = vsel %vm933_vm3, %v2635_v55, %v2636_v14 }
 0x4f7   : > { %9287 = vst [vmem:[#allocation23_spill] sm:$0xff] %v6991_v17  ;;  %2709 = vrot.lane.b32.xlu2 %v6991_v17, %s4385_s26  ;;  %2707 = vrot.lane.b32.xlu1 %v6994_v7, %s4385_s26  ;;  %v2329_v44 = vpop.f32.mrf.mxu1 }
 0x4f8   : > { %9288 = vst [vmem:[#allocation16_spill] sm:$0xff] %v6994_v7  ;;  %v2330_v59 = vadd.f32 %v6663_v51, %v2329_v44 }
 0x4fa   : > { %v2391_v63 = vmax.f32 %v2330_v59, 0.0 }
 0x4fb   : > { %v7003_v21 = vld [vmem:[#allocation3 + $0xd8] sm:$0xff] }
 0x4fc   : > { %2478 = vst.msk [vmem:[#allocation3 + $0xe1] sm:$0xff] %vm549_vm1, %v2391_v63  ;;  %v2640_v12 = vrot.slane %v7003_v21, 1 }
 0x4ff   : > { %v2332_v33 = vpop.f32.mrf.mxu1 }
 0x500   : > { %v2333_v61 = vadd.f32 %v6663_v51, %v2332_v33 }
 0x502   : > { %v2392_v43 = vmax.f32 %v2333_v61, 0.0 }
 0x503   : > { %v7005_v48 = vld [vmem:[#allocation3 + $0xe0] sm:$0xff]  ;;  %v7007_v28 = vld [vmem:[#allocation3 + $0xe8] sm:$0x3] }
 0x504   : > { %2479 = vst.msk [vmem:[#allocation3 + $0xf1] sm:$0xff] %vm549_vm1, %v2392_v43  ;;  %v2641_v50 = vrot.slane %v7005_v48, 1  ;;  %v2643_v34 = vrot.slane %v7007_v28, 1 }
 0x506   : > { %v7014_v3 = vsel %vm933_vm3, %v2641_v50, %v2643_v34  ;;  %v7017_v24 = vsel %vm933_vm3, %v2640_v12, %v2641_v50 }
 0x507   : > { %9289 = vst [vmem:[#allocation24_spill] sm:$0xff] %v7014_v3  ;;  %v2335_v16 = vpop.f32.mrf.mxu1  ;;  %2713 = vrot.lane.b32.xlu1 %v7014_v3, %s4385_s26  ;;  %2711 = vrot.lane.b32.xlu0 %v7017_v24, %s4385_s26 }
 0x508   : > { %9290 = vst [vmem:[#allocation20_spill] sm:$0xff] %v7017_v24  ;;  %v2336_v8 = vadd.f32 %v6663_v51, %v2335_v16 }
 0x50a   : > { %v2393_v49 = vmax.f32 %v2336_v8, 0.0 }
 0x50b   : > { %v7026_v55 = vld [vmem:[#allocation3 + $0xf0] sm:$0xff] }
 0x50c   : > { %2480 = vst.msk [vmem:[#allocation3 + $0xf9] sm:$0xff] %vm549_vm1, %v2393_v49  ;;  %v2645_v33 = vrot.slane %v7026_v55, 1 }
 0x50f   : > { %v2338_v14 = vpop.f32.mrf.mxu1 }
 0x510   : > { %v2339_v1 = vadd.f32 %v6663_v51, %v2338_v14 }
 0x512   : > { %v2394_v44 = vmax.f32 %v2339_v1, 0.0 }
 0x513   : > { %v7028_v59 = vld [vmem:[#allocation3 + $0xf8] sm:$0xff]  ;;  %v7030_v63 = vld [vmem:[#allocation3 + $0x100] sm:$0x3] }
 0x514   : > { %2481 = vst.msk [vmem:[#allocation3 + $0x109] sm:$0xff] %vm549_vm1, %v2394_v44  ;;  %v2646_v61 = vrot.slane %v7028_v59, 1  ;;  %v2648_v43 = vrot.slane %v7030_v63, 1 }
 0x516   : > { %v7037_v50 = vsel %vm933_vm3, %v2645_v33, %v2646_v61  ;;  %v7040_v34 = vsel %vm933_vm3, %v2646_v61, %v2648_v43 }
 0x517   : > { %9291 = vst [vmem:[#allocation25_spill] sm:$0xff] %v7037_v50  ;;  %2715 = vrot.lane.b32.xlu2 %v7037_v50, %s4385_s26  ;;  %2717 = vrot.lane.b32.xlu0 %v7040_v34, %s4385_s26  ;;  %v2341_v12 = vpop.f32.mrf.mxu1 }
 0x518   : > { %9292 = vst [vmem:[#allocation43_spill] sm:$0xff] %v7040_v34  ;;  %v2342_v16 = vadd.f32 %v6663_v51, %v2341_v12  ;;  %v7072_v34 = vld [vmem:[#allocation3 + $0x138] sm:$0xff] }
 0x51a   : > { %v2395_v8 = vmax.f32 %v2342_v16, 0.0 }
 0x51b   : > { %v7049_v1 = vld [vmem:[#allocation3 + $0x108] sm:$0xff] }
 0x51c   : > { %2482 = vst.msk [vmem:[#allocation3 + $0x111] sm:$0xff] %vm549_vm1, %v2395_v8  ;;  %v2650_v12 = vrot.slane %v7049_v1, 1 }
 0x51f   : > { %v2344_v49 = vpop.f32.mrf.mxu1 }
 0x520   : > { %v2345_v14 = vadd.f32 %v6663_v51, %v2344_v49 }
 0x522   : > { %v2396_v44 = vmax.f32 %v2345_v14, 0.0  ;;  %v7069_v14 = vld [vmem:[#allocation3 + $0x140] sm:$0xff] }
 0x523   : > { %v7051_v33 = vld [vmem:[#allocation3 + $0x110] sm:$0xff]  ;;  %v7053_v61 = vld [vmem:[#allocation3 + $0x118] sm:$0x3] }
 0x524   : > { %2483 = vst.msk [vmem:[#allocation3 + $0x121] sm:$0xff] %vm549_vm1, %v2396_v44  ;;  %v2651_v43 = vrot.slane %v7051_v33, 1  ;;  %v2653_v50 = vrot.slane %v7053_v61, 1 }
 0x526   : > { %v7060_v16 = vsel %vm933_vm3, %v2651_v43, %v2653_v50  ;;  %v7063_v8 = vsel %vm933_vm3, %v2650_v12, %v2651_v43  ;;  %v2661_v50 = vrot.slane %v7069_v14, 1  ;;  %v2660_v43 = vrot.slane %v7072_v34, 1 }
 0x527   : > { %9293 = vst [vmem:[#allocation49_spill] sm:$0xff] %v7060_v16  ;;  %2721 = vrot.lane.b32.xlu2 %v7060_v16, %s4385_s26  ;;  %2719 = vrot.lane.b32.xlu1 %v7063_v8, %s4385_s26  ;;  %v2347_v49 = vpop.f32.mrf.mxu1  ;;  %v7082_v16 = vld [vmem:[#allocation3 + $0x158] sm:$0xff] }
 0x528   : > { %9294 = vst [vmem:[#allocation14_spill] sm:$0xff] %v7063_v8  ;;  %v2348_v44 = vadd.f32 %v6663_v51, %v2347_v49  ;;  %v7078_v12 = vsel %vm933_vm3, %v2660_v43, %v2661_v50  ;;  %v7084_v8 = vld [vmem:[#allocation3 + $0x160] sm:$0x3] }
 0x529   : > { %9295 = vst [vmem:[#allocation26_spill] sm:$0xff] %v7078_v12  ;;  %v2668_v24 = vrot.slane %v7084_v8, 1 }
 0x52a   : > { %v2397_v17 = vmax.f32 %v2348_v44, 0.0 }
 0x52b   : > { %v7086_v51 = vld [vmem:[#allocation3 + $0x120] sm:$0xff] }
 0x52c   : > { %2484 = vst.msk [vmem:[#allocation3 + $0x129] sm:$0xff] %vm549_vm1, %v2397_v17  ;;  %v2666_v17 = vrot.slane %v7082_v16, 1 }
 0x52e   : > { %v7108_v7 = vsel %vm933_vm3, %v2666_v17, %v2668_v24 }
 0x52f   : > { %2727 = vrot.lane.b32.xlu2 %v7078_v12, %s4385_s26  ;;  %v2655_v12 = vrot.slane %v7086_v51, 1  ;;  %9298 = vst [vmem:[#allocation46_spill] sm:$0xff] %v7108_v7 }
 0x533   : > { %v7088_v49 = vld [vmem:[#allocation3 + $0x128] sm:$0xff]  ;;  %v7090_v44 = vld [vmem:[#allocation3 + $0x130] sm:$0x3] }
 0x534   : > { %v2656_v43 = vrot.slane %v7088_v49, 1  ;;  %v2658_v3 = vrot.slane %v7090_v44, 1 }
 0x536   : > { %v7098_v35 = vsel %vm933_vm3, %v2656_v43, %v2658_v3  ;;  %v7101_v22 = vsel %vm933_vm3, %v2655_v12, %v2656_v43  ;;  %v2771_v3 = vrot.slane %v6589_v18, 2  ;;  %v7116_v12 = vld [vmem:[#allocation3 + $0x150] sm:$0xff]  ;;  %v2663_v43 = vrot.slane %v7110_v20, 1 }
 0x537   : > { %9296 = vst [vmem:[#allocation34_spill] sm:$0xff] %v7098_v35  ;;  %2725 = vrot.lane.b32.xlu1 %v7098_v35, %s4385_s26  ;;  %2723 = vrot.lane.b32.xlu0 %v7101_v22, %s4385_s26  ;;  %v2665_v35 = vrot.slane %v7116_v12, 1  ;;  %v7131_v18 = vld [vmem:[#allocation3 + $0x170] sm:$0xff] }
 0x538   : > { %9297 = vst [vmem:[#allocation40_spill] sm:$0xff] %v7101_v22  ;;  %2733 = vrot.lane.b32.xlu2 %v7108_v7, %s4385_s26  ;;  %v2773_v22 = vsel %vm1110_vm4, %v2771_v3, %v2772_v4  ;;  %v7122_v24 = vsel %vm933_vm3, %v2661_v50, %v2663_v43  ;;  %v7136_v7 = vld [vmem:[#allocation3 + $0x168] sm:$0xff]  ;;  %v2671_v50 = vrot.slane %v7131_v18, 1  ;;  %v2673_v3 = vrot.slane %v7133_v23, 1 }
 0x539   : > { %9299 = vst [vmem:[#allocation44_spill] sm:$0xff] %v7122_v24  ;;  %v7125_v13 = vsel %vm933_vm3, %v2665_v35, %v2666_v17  ;;  %v2777_v35 = vrot.slane %v6724_v53, 2  ;;  %v2779_v17 = vrot.slane %v6726_v57, 2  ;;  %v2670_v43 = vrot.slane %v7136_v7, 1 }
 0x53a   : > { %9300 = vst [vmem:[#allocation36_spill] sm:$0xff] %v7125_v13  ;;  %v2774_v57 = vrot.slane %v6665_v62, 2  ;;  %v7176_v62 = vpop.permute.xlu2 %2685 }
 0x53b   : > { %9306 = vst [vmem:[#allocation48_spill] sm:$0xff] %v7176_v62 }
 0x53f   : > { %2729 = vrot.lane.b32.xlu0 %v7122_v24, %s4385_s26  ;;  %2731 = vrot.lane.b32.xlu1 %v7125_v13, %s4385_s26  ;;  %v7144_v24 = vsel %vm933_vm3, %v2671_v50, %v2673_v3  ;;  %v7147_v13 = vsel %vm933_vm3, %v2670_v43, %v2671_v50  ;;  %v2787_v3 = vrot.slane %v6838_v0, 2  ;;  %v2776_v50 = vrot.slane %v6719_v26, 2 }
 0x540   : > { %2851 = vrot.lane.b32.xlu2 %v2773_v22, %s4386_s29  ;;  %9301 = vst [vmem:[#allocation57_spill] sm:$0xff] %v7144_v24  ;;  %v7150_v22 = vsel %vm1110_vm4, %v2777_v35, %v2779_v17  ;;  %v2775_v17 = vsel %vm1110_vm4, %v2772_v4, %v2774_v57  ;;  %v2786_v43 = vrot.slane %v6835_v47, 2  ;;  %v2782_v4 = vrot.slane %v6783_v15, 2 }
 0x541   : > { %9302 = vst [vmem:[#allocation63_spill] sm:$0xff] %v7147_v13  ;;  %v2784_v57 = vrot.slane %v6785_v42, 2 }
 0x542   : > { %9303 = vst [vmem:[#allocation66_spill] sm:$0xff] %v7150_v22  ;;  %v7198_v42 = vpop.permute.xlu2 %2691 }
 0x543   : > { %v7184_v45 = vsel %vm1110_vm4, %v2782_v4, %v2784_v57  ;;  %9308 = vst [vmem:[#allocation67_spill] sm:$0xff] %v7198_v42  ;;  %v2802_v57 = vrot.slane %v6928_v10, 2  ;;  %v7226_v42 = vpop.permute.xlu1 %2677 }
 0x544   : > { %9312 = vst [vmem:[#allocation75_spill] sm:$0xff] %v7226_v42 }
 0x547   : > { %2737 = vrot.lane.b32.xlu1 %v7144_v24, %s4385_s26  ;;  %2735 = vrot.lane.b32.xlu0 %v7147_v13, %s4385_s26  ;;  %v7166_v24 = vsel %vm1110_vm4, %v2776_v50, %v2777_v35  ;;  %v7169_v13 = vsel %vm1110_vm4, %v2786_v43, %v2787_v3  ;;  %v2792_v35 = vrot.slane %v6874_v31, 2  ;;  %v2794_v50 = vrot.slane %v6876_v60, 2 }
 0x548   : > { %2857 = vrot.lane.b32.xlu2 %v7150_v22, %s4386_s29  ;;  %9305 = vst [vmem:[#allocation47_spill] sm:$0xff] %v7169_v13  ;;  %v2781_v43 = vrot.slane %v6778_v27, 2  ;;  %v2789_v60 = vrot.slane %v6840_v32, 2 }
 0x54a   : > { %v7208_v62 = vsel %vm1110_vm4, %v2787_v3, %v2789_v60  ;;  %v7219_v32 = vpop.permute.xlu2 %2697  ;;  %v2807_v3 = vrot.slane %v6955_v39, 2  ;;  %v2809_v60 = vrot.slane %v6957_v56, 2  ;;  %v2804_v56 = vrot.slane %v6930_v5, 2 }
 0x54b   : > { %9309 = vst [vmem:[#allocation59_spill] sm:$0xff] %v7208_v62  ;;  %v7264_v5 = vpop.permute.xlu1 %2683 }
 0x54c   : > { %9311 = vst [vmem:[#allocation76_spill] sm:$0xff] %v7219_v32  ;;  %v7237_v32 = vsel %vm1110_vm4, %v2807_v3, %v2809_v60  ;;  %v2816_v60 = vrot.slane %v7003_v21, 2  ;;  %v7255_v42 = vsel %vm1110_vm4, %v2802_v57, %v2804_v56  ;;  %v2814_v56 = vrot.slane %v6984_v19, 2 }
 0x54d   : > { %9314 = vst [vmem:[#allocation60_spill] sm:$0xff] %v7237_v32 }
 0x54e   : > { %9318 = vst [vmem:[#allocation78_spill] sm:$0xff] %v7264_v5 }
 0x54f   : > { %2855 = vrot.lane.b32.xlu1 %v7166_v24, %s4386_s29  ;;  %2853 = vrot.lane.b32.xlu0 %v2775_v17, %s4386_s29  ;;  %v7187_v17 = vsel %vm1110_vm4, %v2781_v43, %v2782_v4  ;;  %v2791_v4 = vrot.slane %v6872_v52, 2 }
 0x550   : > { %2863 = vrot.lane.b32.xlu2 %v7169_v13, %s4386_s29  ;;  %v7190_v13 = vsel %vm1110_vm4, %v2792_v35, %v2794_v50  ;;  %v2801_v50 = vrot.slane %v6925_v25, 2 }
 0x551   : > { %9307 = vst [vmem:[#allocation70_spill] sm:$0xff] %v7190_v13  ;;  %v7205_v43 = vsel %vm1110_vm4, %v2791_v4, %v2792_v35  ;;  %v2797_v35 = vrot.slane %v6901_v46, 2  ;;  %v2799_v4 = vrot.slane %v6903_v58, 2 }
 0x552   : > { %v7211_v22 = vsel %vm1110_vm4, %v2801_v50, %v2802_v57  ;;  %v2796_v50 = vrot.slane %v6898_v11, 2  ;;  %v7245_v58 = vpop.permute.xlu2 %2703  ;;  %v2812_v57 = vrot.slane %v6982_v30, 2 }
 0x553   : > { %9310 = vst [vmem:[#allocation68_spill] sm:$0xff] %v7211_v22  ;;  %v7290_v19 = vpop.permute.xlu1 %2689 }
 0x554   : > { %9315 = vst [vmem:[#allocation62_spill] sm:$0xff] %v7245_v58 }
 0x555   : > { %9322 = vst [vmem:[#allocation95_spill] sm:$0xff] %v7290_v19 }
 0x557   : > { %2861 = vrot.lane.b32.xlu1 %v7184_v45, %s4386_s29  ;;  %2859 = vrot.lane.b32.xlu0 %v7187_v17, %s4386_s29 }
 0x558   : > { %2869 = vrot.lane.b32.xlu2 %v7190_v13, %s4386_s29  ;;  %v7229_v13 = vsel %vm1110_vm4, %v2797_v35, %v2799_v4  ;;  %v2806_v4 = vrot.slane %v6952_v9, 2 }
 0x55f   : > { %2867 = vrot.lane.b32.xlu1 %v7205_v43, %s4386_s29  ;;  %2865 = vrot.lane.b32.xlu0 %v7208_v62, %s4386_s29  ;;  %v7232_v62 = vsel %vm1110_vm4, %v2796_v50, %v2797_v35  ;;  %v2817_v35 = vrot.slane %v7005_v48, 2  ;;  %v7252_v50 = vsel %vm1110_vm4, %v2806_v4, %v2807_v3  ;;  %v7270_v3 = vpop.permute.xlu2 %2709  ;;  %v2822_v4 = vrot.slane %v7028_v59, 2 }
 0x560   : > { %2875 = vrot.lane.b32.xlu2 %v7211_v22, %s4386_s29  ;;  %v7234_v22 = vpop.permute.xlu0 %2675  ;;  %9316 = vst [vmem:[#allocation80_spill] sm:$0xff] %v7252_v50 }
 0x561   : > { %9313 = vst [vmem:[#allocation89_spill] sm:$0xff] %v7234_v22  ;;  %v7258_v22 = vsel %vm1110_vm4, %v2816_v60, %v2817_v35  ;;  %v2824_v60 = vrot.slane %v7030_v63, 2 }
 0x562   : > { %9317 = vst [vmem:[#allocation86_spill] sm:$0xff] %v7258_v22 }
 0x563   : > { %9320 = vst [vmem:[#allocation81_spill] sm:$0xff] %v7270_v3  ;;  %v2831_v3 = vrot.slane %v7086_v51, 2 }
 0x567   : > { %2873 = vrot.lane.b32.xlu1 %v7229_v13, %s4386_s29  ;;  %2871 = vrot.lane.b32.xlu0 %v7232_v62, %s4386_s29 }
 0x568   : > { %2881 = vrot.lane.b32.xlu2 %v7237_v32, %s4386_s29  ;;  %v7268_v58 = vpop.permute.xlu0 %2681  ;;  %v2811_v32 = vrot.slane %v6979_v54, 2 }
 0x569   : > { %9319 = vst [vmem:[#allocation82_spill] sm:$0xff] %v7268_v58  ;;  %v7284_v58 = vsel %vm1110_vm4, %v2822_v4, %v2824_v60  ;;  %v2821_v60 = vrot.slane %v7026_v55, 2 }
 0x56a   : > { %v7281_v5 = vsel %vm1110_vm4, %v2811_v32, %v2812_v57  ;;  %9321 = vst [vmem:[#allocation85_spill] sm:$0xff] %v7284_v58  ;;  %v2819_v32 = vrot.slane %v7007_v28, 2  ;;  %v7315_v28 = vpop.permute.xlu1 %2695 }
 0x56b   : > { %9327 = vst [vmem:[#allocation91_spill] sm:$0xff] %v7315_v28 }
 0x56c   : > { %v7306_v19 = vsel %vm1110_vm4, %v2817_v35, %v2819_v32  ;;  %v2827_v35 = vrot.slane %v7051_v33, 2  ;;  %v2837_v32 = vrot.slane %v7069_v14, 2 }
 0x56f   : > { %2879 = vrot.lane.b32.xlu1 %v7252_v50, %s4386_s29  ;;  %2877 = vrot.lane.b32.xlu0 %v7255_v42, %s4386_s29  ;;  %v7278_v50 = vsel %vm1110_vm4, %v2812_v57, %v2814_v56  ;;  %v2832_v57 = vrot.slane %v7088_v49, 2 }
 0x570   : > { %2887 = vrot.lane.b32.xlu2 %v7258_v22, %s4386_s29  ;;  %v7294_v63 = vpop.permute.xlu0 %2687  ;;  %v7303_v22 = vsel %vm1110_vm4, %v2821_v60, %v2822_v4  ;;  %v2839_v60 = vrot.slane %v7110_v20, 2 }
 0x571   : > { %9323 = vst [vmem:[#allocation103_spill] sm:$0xff] %v7294_v63  ;;  %v7296_v56 = vpop.permute.xlu2 %2715 }
 0x572   : > { %9324 = vst [vmem:[#allocation73_spill] sm:$0xff] %v7296_v56 }
 0x573   : > { %9325 = vst [vmem:[#allocation87_spill] sm:$0xff] %v7303_v22 }
 0x577   : > { %2885 = vrot.lane.b32.xlu1 %v7278_v50, %s4386_s29  ;;  %2883 = vrot.lane.b32.xlu0 %v7281_v5, %s4386_s29 }
 0x578   : > { %2893 = vrot.lane.b32.xlu2 %v7284_v58, %s4386_s29  ;;  %v7309_v58 = vsel %vm1110_vm4, %v2831_v3, %v2832_v57  ;;  %v7319_v56 = vpop.permute.xlu0 %2693  ;;  %v2829_v3 = vrot.slane %v7053_v61, 2  ;;  %v7341_v61 = vpop.permute.xlu1 %2701 }
 0x579   : > { %9326 = vst [vmem:[#allocation93_spill] sm:$0xff] %v7309_v58 }
 0x57a   : > { %9328 = vst [vmem:[#allocation96_spill] sm:$0xff] %v7319_v56  ;;  %v7329_v63 = vsel %vm1110_vm4, %v2827_v35, %v2829_v3 }
 0x57b   : > { %9330 = vst [vmem:[#allocation88_spill] sm:$0xff] %v7329_v63 }
 0x57c   : > { %9332 = vst [vmem:[#allocation22_spill] sm:$0xff] %v7341_v61 }
 0x57f   : > { %2891 = vrot.lane.b32.xlu1 %v7303_v22, %s4386_s29  ;;  %2889 = vrot.lane.b32.xlu0 %v7306_v19, %s4386_s29  ;;  %v2826_v22 = vrot.slane %v7049_v1, 2 }
 0x580   : > { %2899 = vrot.lane.b32.xlu2 %v7309_v58, %s4386_s29  ;;  %v7335_v58 = vsel %vm1110_vm4, %v2837_v32, %v2839_v60  ;;  %v7345_v20 = vpop.permute.xlu0 %2699  ;;  %v2836_v60 = vrot.slane %v7072_v34, 2 }
 0x581   : > { %v7321_v4 = vpop.permute.xlu2 %2721  ;;  %v7332_v28 = vsel %vm1110_vm4, %v2826_v22, %v2827_v35  ;;  %9333 = vst [vmem:[#allocation111_spill] sm:$0xff] %v7345_v20  ;;  %v2834_v22 = vrot.slane %v7090_v44, 2  ;;  %v2847_v35 = vrot.slane %v7131_v18, 2  ;;  %v9393_v20 = vld [vmem:[#allocation43_spill] sm:$0xff] }
 0x582   : > { %9329 = vst [vmem:[#allocation98_spill] sm:$0xff] %v7321_v4  ;;  %v2846_v4 = vrot.slane %v7136_v7, 2 }
 0x583   : > { %9331 = vst [vmem:[#allocation102_spill] sm:$0xff] %v7332_v28  ;;  %v7357_v61 = vsel %vm1110_vm4, %v2832_v57, %v2834_v22  ;;  %v2842_v57 = vrot.slane %v7082_v16, 2  ;;  %v2841_v22 = vrot.slane %v7116_v12, 2 }
 0x584   : > { %9335 = vst [vmem:[#allocation105_spill] sm:$0xff] %v7357_v61 }
 0x587   : > { %2897 = vrot.lane.b32.xlu1 %v7329_v63, %s4386_s29  ;;  %2895 = vrot.lane.b32.xlu0 %v7332_v28, %s4386_s29  ;;  %v7354_v63 = vsel %vm1110_vm4, %v2836_v60, %v2837_v32  ;;  %v7360_v28 = vsel %vm1110_vm4, %v2846_v4, %v2847_v35  ;;  %v2844_v4 = vrot.slane %v7084_v8, 2 }
 0x588   : > { %2905 = vrot.lane.b32.xlu2 %v7335_v58, %s4386_s29  ;;  %9336 = vst [vmem:[#allocation8_spill] sm:$0xff] %v7360_v28  ;;  %v7368_v44 = vpop.permute.xlu0 %2705 }
 0x589   : > { %v7347_v3 = vpop.permute.xlu2 %2727  ;;  %9337 = vst [vmem:[#allocation92_spill] sm:$0xff] %v7368_v44  ;;  %v7378_v60 = vsel %vm1110_vm4, %v2842_v57, %v2844_v4  ;;  %v2849_v4 = vrot.slane %v7133_v23, 2 }
 0x58a   : > { %9334 = vst [vmem:[#allocation37_spill] sm:$0xff] %v7347_v3  ;;  %v7370_v3 = vpop.permute.xlu1 %2707 }
 0x58b   : > { %9338 = vst [vmem:[#allocation99_spill] sm:$0xff] %v7370_v3 }
 0x58c   : > { %9340 = vst [vmem:[#allocation94_spill] sm:$0xff] %v7378_v60 }
 0x58f   : > { %2903 = vrot.lane.b32.xlu1 %v7354_v63, %s4386_s29  ;;  %2901 = vrot.lane.b32.xlu0 %v7357_v61, %s4386_s29  ;;  %v7381_v61 = vsel %vm1110_vm4, %v2841_v22, %v2842_v57  ;;  %v7397_v57 = vsel %vm1110_vm4, %v2847_v35, %v2849_v4 }
 0x590   : > { %2911 = vrot.lane.b32.xlu2 %v7360_v28, %s4386_s29  ;;  %v7391_v8 = vpop.permute.xlu0 %2711  ;;  %9343 = vst [vmem:[#allocation115_spill] sm:$0xff] %v7397_v57 }
 0x591   : > { %9342 = vst [vmem:[#allocation32_spill] sm:$0xff] %v7391_v8  ;;  %v9381_v8 = vld [vmem:[#allocation15_spill] sm:$0xff] }
 0x592   : > { %v7372_v32 = vpop.permute.xlu2 %2733 }
 0x593   : > { %9339 = vst [vmem:[#allocation29_spill] sm:$0xff] %v7372_v32  ;;  %v7389_v32 = vpop.permute.xlu1 %2713 }
 0x594   : > { %9341 = vst [vmem:[#allocation110_spill] sm:$0xff] %v7389_v32 }
 0x597   : > { %2909 = vrot.lane.b32.xlu1 %v7378_v60, %s4386_s29  ;;  %2907 = vrot.lane.b32.xlu0 %v7381_v61, %s4386_s29  ;;  %v9401_v60 = vld [vmem:[#allocation36_spill] sm:$0xff] }
 0x598   : > { %2951 = vrot.lane.b32.xlu2 %v6724_v53, %s4388_s13  ;;  %v7405_v53 = vpop.permute.xlu0 %2717 }
 0x599   : > { %9344 = vst [vmem:[#allocation178_spill] sm:$0xff] %v7405_v53 }
 0x59a   : > { %v7393_v3 = vpop.permute.xlu2 %2851 }
 0x59b   : > { %v7407_v22 = vpop.permute.xlu1 %2719 }
 0x59c   : > { %9345 = vst [vmem:[#allocation181_spill] sm:$0xff] %v7407_v22  ;;  %v7507_v22 = vld [vmem:[#allocation3 + $0x188] sm:$0xff] }
 0x59d   : > { %9364 = vst [vmem:[#allocation101_spill] sm:$0xff] %v7507_v22 }
 0x59f   : > { %2949 = vrot.lane.b32.xlu1 %v6719_v26, %s4388_s13  ;;  %2913 = vrot.lane.b32.xlu0 %v7397_v57, %s4386_s29 }
 0x5a0   : > { %2957 = vrot.lane.b32.xlu2 %v6835_v47, %s4388_s13 }
 0x5a2   : > { %v7409_v32 = vpop.permute.xlu2 %2857 }
 0x5a7   : > { %2955 = vrot.lane.b32.xlu1 %v6783_v15, %s4388_s13  ;;  %2953 = vrot.lane.b32.xlu0 %v6778_v27, %s4388_s13 }
 0x5a8   : > { %2963 = vrot.lane.b32.xlu2 %v6874_v31, %s4388_s13 }
 0x5a9   : > { %v7417_v26 = vpop.permute.xlu1 %2725  ;;  %v7419_v23 = vpop.permute.xlu0 %2723 }
 0x5aa   : > { %9346 = vst [vmem:[#allocation18_spill] sm:$0xff] %v7417_v26  ;;  %v7421_v47 = vpop.permute.xlu2 %2863 }
 0x5ab   : > { %9347 = vst [vmem:[#allocation38_spill] sm:$0xff] %v7419_v23 }
 0x5af   : > { %2961 = vrot.lane.b32.xlu1 %v6872_v52, %s4388_s13  ;;  %2959 = vrot.lane.b32.xlu0 %v6838_v0, %s4388_s13 }
 0x5b0   : > { %2969 = vrot.lane.b32.xlu2 %v6925_v25, %s4388_s13 }
 0x5b1   : > { %v7429_v15 = vpop.permute.xlu1 %2731  ;;  %v7431_v27 = vpop.permute.xlu0 %2729 }
 0x5b2   : > { %9348 = vst [vmem:[#allocation166_spill] sm:$0xff] %v7429_v15  ;;  %v7433_v31 = vpop.permute.xlu2 %2869 }
 0x5b3   : > { %9349 = vst [vmem:[#allocation97_spill] sm:$0xff] %v7431_v27 }
 0x5b4   : > { %9350 = vst [vmem:[#allocation148_spill] sm:$0xff] %v7433_v31 }
 0x5b7   : > { %2967 = vrot.lane.b32.xlu1 %v6901_v46, %s4388_s13  ;;  %2965 = vrot.lane.b32.xlu0 %v6898_v11, %s4388_s13 }
 0x5b8   : > { %2975 = vrot.lane.b32.xlu2 %v6955_v39, %s4388_s13 }
 0x5b9   : > { %v7441_v52 = vpop.permute.xlu1 %2737  ;;  %v7443_v0 = vpop.permute.xlu0 %2735 }
 0x5ba   : > { %9351 = vst [vmem:[#allocation106_spill] sm:$0xff] %v7441_v52  ;;  %v7445_v35 = vpop.permute.xlu2 %2875 }
 0x5bb   : > { %9352 = vst [vmem:[#allocation118_spill] sm:$0xff] %v7443_v0 }
 0x5bc   : > { %9353 = vst [vmem:[#allocation27_spill] sm:$0xff] %v7445_v35 }
 0x5bf   : > { %2973 = vrot.lane.b32.xlu1 %v6952_v9, %s4388_s13  ;;  %2971 = vrot.lane.b32.xlu0 %v6928_v10, %s4388_s13 }
 0x5c0   : > { %2981 = vrot.lane.b32.xlu2 %v7003_v21, %s4388_s13 }
 0x5c1   : > { %v7453_v46 = vpop.permute.xlu1 %2855  ;;  %v7455_v11 = vpop.permute.xlu0 %2853 }
 0x5c2   : > { %v7457_v4 = vpop.permute.xlu2 %2881 }
 0x5c3   : > { %9354 = vst [vmem:[#allocation54_spill] sm:$0xff] %v7457_v4 }
 0x5c7   : > { %2979 = vrot.lane.b32.xlu1 %v6982_v30, %s4388_s13  ;;  %2977 = vrot.lane.b32.xlu0 %v6979_v54, %s4388_s13 }
 0x5c8   : > { %2987 = vrot.lane.b32.xlu2 %v7028_v59, %s4388_s13 }
 0x5c9   : > { %v7465_v52 = vpop.permute.xlu1 %2861  ;;  %v7467_v10 = vpop.permute.xlu0 %2859 }
 0x5ca   : > { %v7469_v0 = vpop.permute.xlu2 %2887 }
 0x5cb   : > { %9355 = vst [vmem:[#allocation56_spill] sm:$0xff] %v7469_v0 }
 0x5cf   : > { %2985 = vrot.lane.b32.xlu1 %v7026_v55, %s4388_s13  ;;  %2983 = vrot.lane.b32.xlu0 %v7005_v48, %s4388_s13 }
 0x5d0   : > { %2993 = vrot.lane.b32.xlu2 %v7086_v51, %s4388_s13 }
 0x5d1   : > { %v7477_v30 = vpop.permute.xlu1 %2867  ;;  %v7479_v54 = vpop.permute.xlu0 %2865 }
 0x5d2   : > { %9356 = vst [vmem:[#allocation113_spill] sm:$0xff] %v7477_v30  ;;  %v7481_v59 = vpop.permute.xlu2 %2893  ;;  %v7772_v30 = vld [vmem:[#allocation3 + $0x68] sm:$0xff] }
 0x5d3   : > { %9357 = vst [vmem:[#allocation107_spill] sm:$0xff] %v7481_v59  ;;  %v7521_v59 = vld [vmem:[#allocation3 + $0x180] sm:$0xff] }
 0x5d4   : > { %9368 = vst [vmem:[#allocation42_spill] sm:$0xff] %v7521_v59 }
 0x5d5   : > { %9439 = vst [vmem:[#allocation9_spill] sm:$0xff] %v7772_v30 }
 0x5d7   : > { %2991 = vrot.lane.b32.xlu1 %v7051_v33, %s4388_s13  ;;  %2989 = vrot.lane.b32.xlu0 %v7049_v1, %s4388_s13 }
 0x5d8   : > { %2999 = vrot.lane.b32.xlu2 %v7069_v14, %s4388_s13 }
 0x5d9   : > { %v7489_v55 = vpop.permute.xlu1 %2873  ;;  %v7491_v48 = vpop.permute.xlu0 %2871 }
 0x5da   : > { %9358 = vst [vmem:[#allocation125_spill] sm:$0xff] %v7489_v55  ;;  %v7493_v51 = vpop.permute.xlu2 %2899  ;;  %v9395_v55 = vld [vmem:[#allocation34_spill] sm:$0xff] }
 0x5db   : > { %9359 = vst [vmem:[#allocation173_spill] sm:$0xff] %v7491_v48 }
 0x5dc   : > { %9360 = vst [vmem:[#allocation108_spill] sm:$0xff] %v7493_v51  ;;  %v9387_v51 = vld [vmem:[#allocation24_spill] sm:$0xff] }
 0x5df   : > { %2997 = vrot.lane.b32.xlu1 %v7072_v34, %s4388_s13  ;;  %2995 = vrot.lane.b32.xlu0 %v7088_v49, %s4388_s13 }
 0x5e0   : > { %3005 = vrot.lane.b32.xlu2 %v7136_v7, %s4388_s13 }
 0x5e1   : > { %v7501_v33 = vpop.permute.xlu1 %2879  ;;  %v7503_v1 = vpop.permute.xlu0 %2877 }
 0x5e2   : > { %9361 = vst [vmem:[#allocation11_spill] sm:$0xff] %v7501_v33  ;;  %v7505_v14 = vpop.permute.xlu2 %2905  ;;  %v9389_v33 = vld [vmem:[#allocation20_spill] sm:$0xff] }
 0x5e3   : > { %9362 = vst [vmem:[#allocation50_spill] sm:$0xff] %v7503_v1 }
 0x5e4   : > { %9363 = vst [vmem:[#allocation186_spill] sm:$0xff] %v7505_v14 }
 0x5e7   : > { %3003 = vrot.lane.b32.xlu1 %v7082_v16, %s4388_s13  ;;  %3001 = vrot.lane.b32.xlu0 %v7116_v12, %s4388_s13 }
 0x5e8   : > { %3011 = vrot.lane.b32.xlu2 %v7507_v22, %s4388_s13 }
 0x5e9   : > { %v7515_v34 = vpop.permute.xlu1 %2885  ;;  %v7517_v7 = vpop.permute.xlu0 %2883 }
 0x5ea   : > { %9365 = vst [vmem:[#allocation33_spill] sm:$0xff] %v7515_v34  ;;  %v7519_v49 = vpop.permute.xlu2 %2911 }
 0x5eb   : > { %9366 = vst [vmem:[#allocation167_spill] sm:$0xff] %v7517_v7 }
 0x5ec   : > { %9367 = vst [vmem:[#allocation114_spill] sm:$0xff] %v7519_v49 }
 0x5ef   : > { %3009 = vrot.lane.b32.xlu1 %v7521_v59, %s4388_s13  ;;  %3007 = vrot.lane.b32.xlu0 %v7131_v18, %s4388_s13 }
 0x5f0   : > { %3055 = vrot.lane.b32.xlu2 %v6799_v40, %s4389_s17 }
 0x5f1   : > { %v7529_v16 = vpop.permute.xlu1 %2891  ;;  %v7531_v53 = vpop.permute.xlu0 %2889 }
 0x5f2   : > { %9369 = vst [vmem:[#allocation126_spill] sm:$0xff] %v7529_v16  ;;  %v7533_v15 = vpop.permute.xlu2 %2951 }
 0x5f3   : > { %9370 = vst [vmem:[#allocation45_spill] sm:$0xff] %v7531_v53 }
 0x5f7   : > { %3053 = vrot.lane.b32.xlu1 %v6741_v6, %s4389_s17  ;;  %3051 = vrot.lane.b32.xlu0 %v6744_v38, %s4389_s17 }
 0x5f8   : > { %3061 = vrot.lane.b32.xlu2 %v6853_v41, %s4389_s17 }
 0x5f9   : > { %v7541_v49 = vpop.permute.xlu1 %2897  ;;  %v7543_v18 = vpop.permute.xlu0 %2895 }
 0x5fa   : > { %9371 = vst [vmem:[#allocation64_spill] sm:$0xff] %v7541_v49  ;;  %v7545_v14 = vpop.permute.xlu2 %2957  ;;  %v9375_v49 = vld [vmem:[#allocation17_spill] sm:$0xff] }
 0x5fb   : > { %9372 = vst [vmem:[#allocation180_spill] sm:$0xff] %v7543_v18  ;;  %v9376_v18 = vld [vmem:[#allocation6_spill] sm:$0xff] }
 0x5ff   : > { %3059 = vrot.lane.b32.xlu1 %v6856_v36, %s4389_s17  ;;  %3057 = vrot.lane.b32.xlu0 %v6796_v29, %s4389_s17 }
 0x600   : > { %3067 = vrot.lane.b32.xlu2 %v6914_v37, %s4389_s17 }
 0x601   : > { %v7553_v6 = vpop.permute.xlu1 %2903  ;;  %v7555_v38 = vpop.permute.xlu0 %2901 }
 0x602   : > { %9373 = vst [vmem:[#allocation116_spill] sm:$0xff] %v7553_v6  ;;  %v7557_v16 = vpop.permute.xlu2 %2963  ;;  %v9380_v6 = vld [vmem:[#allocation28_spill] sm:$0xff] }
 0x603   : > { %9374 = vst [vmem:[#allocation123_spill] sm:$0xff] %v7555_v38  ;;  %v9382_v38 = vld [vmem:[#allocation16_spill] sm:$0xff] }
 0x607   : > { %3065 = vrot.lane.b32.xlu1 %v6887_v2, %s4389_s17  ;;  %3063 = vrot.lane.b32.xlu0 %v9375_v49, %s4389_s17 }
 0x608   : > { %3073 = vrot.lane.b32.xlu2 %v9376_v18, %s4389_s17 }
 0x609   : > { %v7565_v53 = vpop.permute.xlu1 %2909  ;;  %v7567_v27 = vpop.permute.xlu0 %2907 }
 0x60a   : > { %9377 = vst [vmem:[#allocation30_spill] sm:$0xff] %v7565_v53  ;;  %v7569_v0 = vpop.permute.xlu2 %2969  ;;  %v9385_v53 = vld [vmem:[#allocation21_spill] sm:$0xff] }
 0x60b   : > { %9378 = vst [vmem:[#allocation52_spill] sm:$0xff] %v7567_v27  ;;  %v9386_v27 = vld [vmem:[#allocation5_spill] sm:$0xff] }
 0x60c   : > { %9379 = vst [vmem:[#allocation169_spill] sm:$0xff] %v7569_v0 }
 0x60f   : > { %3071 = vrot.lane.b32.xlu1 %v9380_v6, %s4389_s17  ;;  %3069 = vrot.lane.b32.xlu0 %v9381_v8, %s4389_s17 }
 0x610   : > { %3079 = vrot.lane.b32.xlu2 %v9382_v38, %s4389_s17 }
 0x611   : > { %v7577_v26 = vpop.permute.xlu1 %2949  ;;  %v7579_v34 = vpop.permute.xlu0 %2913 }
 0x612   : > { %9383 = vst [vmem:[#allocation117_spill] sm:$0xff] %v7579_v34  ;;  %v7581_v7 = vpop.permute.xlu2 %2975  ;;  %v9390_v34 = vld [vmem:[#allocation23_spill] sm:$0xff] }
 0x613   : > { %9384 = vst [vmem:[#allocation72_spill] sm:$0xff] %v7581_v7  ;;  %v9391_v7 = vld [vmem:[#allocation14_spill] sm:$0xff] }
 0x617   : > { %3077 = vrot.lane.b32.xlu1 %v9385_v53, %s4389_s17  ;;  %3075 = vrot.lane.b32.xlu0 %v9386_v27, %s4389_s17 }
 0x618   : > { %3085 = vrot.lane.b32.xlu2 %v9387_v51, %s4389_s17 }
 0x619   : > { %v7589_v23 = vpop.permute.xlu1 %2955  ;;  %v7591_v4 = vpop.permute.xlu0 %2953 }
 0x61a   : > { %v7593_v44 = vpop.permute.xlu2 %2981 }
 0x61b   : > { %9388 = vst [vmem:[#allocation4_spill] sm:$0xff] %v7593_v44  ;;  %v9394_v44 = vld [vmem:[#allocation25_spill] sm:$0xff] }
 0x61f   : > { %3083 = vrot.lane.b32.xlu1 %v9389_v33, %s4389_s17  ;;  %3081 = vrot.lane.b32.xlu0 %v9390_v34, %s4389_s17 }
 0x620   : > { %3091 = vrot.lane.b32.xlu2 %v9391_v7, %s4389_s17  ;;  %v9399_v7 = vld [vmem:[#allocation40_spill] sm:$0xff] }
 0x621   : > { %v7601_v1 = vpop.permute.xlu1 %2961  ;;  %v7603_v57 = vpop.permute.xlu0 %2959 }
 0x622   : > { %v7605_v35 = vpop.permute.xlu2 %2987 }
 0x623   : > { %9392 = vst [vmem:[#allocation61_spill] sm:$0xff] %v7605_v35  ;;  %v9400_v35 = vld [vmem:[#allocation49_spill] sm:$0xff] }
 0x627   : > { %3089 = vrot.lane.b32.xlu1 %v9393_v20, %s4389_s17  ;;  %3087 = vrot.lane.b32.xlu0 %v9394_v44, %s4389_s17 }
 0x628   : > { %3097 = vrot.lane.b32.xlu2 %v9395_v55, %s4389_s17 }
 0x629   : > { %v7613_v0 = vpop.permute.xlu1 %2967  ;;  %v7615_v28 = vpop.permute.xlu0 %2965 }
 0x62a   : > { %9396 = vst [vmem:[#allocation122_spill] sm:$0xff] %v7613_v0  ;;  %v7617_v48 = vpop.permute.xlu2 %2993  ;;  %v9405_v0 = vld [vmem:[#allocation44_spill] sm:$0xff] }
 0x62b   : > { %9397 = vst [vmem:[#allocation74_spill] sm:$0xff] %v7615_v28 }
 0x62c   : > { %9398 = vst [vmem:[#allocation120_spill] sm:$0xff] %v7617_v48  ;;  %v9406_v48 = vld [vmem:[#allocation26_spill] sm:$0xff] }
 0x62f   : > { %3095 = vrot.lane.b32.xlu1 %v9399_v7, %s4389_s17  ;;  %3093 = vrot.lane.b32.xlu0 %v9400_v35, %s4389_s17  ;;  %v9407_v7 = vld [vmem:[#allocation57_spill] sm:$0xff] }
 0x630   : > { %3103 = vrot.lane.b32.xlu2 %v9401_v60, %s4389_s17 }
 0x631   : > { %v7625_v31 = vpop.permute.xlu1 %2973  ;;  %v7627_v56 = vpop.permute.xlu0 %2971 }
 0x632   : > { %9402 = vst [vmem:[#allocation131_spill] sm:$0xff] %v7625_v31  ;;  %v7629_v55 = vpop.permute.xlu2 %2999  ;;  %v9411_v31 = vld [vmem:[#allocation63_spill] sm:$0xff] }
 0x633   : > { %9403 = vst [vmem:[#allocation69_spill] sm:$0xff] %v7627_v56  ;;  %v7647_v56 = vld [vmem:[#allocation3 + $0x190] sm:$0x3] }
 0x634   : > { %9404 = vst [vmem:[#allocation138_spill] sm:$0xff] %v7629_v55  ;;  %v9412_v55 = vld [vmem:[#allocation46_spill] sm:$0xff] }
 0x635   : > { %9413 = vst [vmem:[#allocation109_spill] sm:$0xff] %v7647_v56 }
 0x637   : > { %3101 = vrot.lane.b32.xlu1 %v9405_v0, %s4389_s17  ;;  %3099 = vrot.lane.b32.xlu0 %v9406_v48, %s4389_s17 }
 0x638   : > { %3109 = vrot.lane.b32.xlu2 %v9407_v7, %s4389_s17  ;;  %v3046_v7 = vrot.slane %v7521_v59, 1 }
 0x639   : > { %v7637_v20 = vpop.permute.xlu1 %2979  ;;  %v7639_v35 = vpop.permute.xlu0 %2977 }
 0x63a   : > { %9408 = vst [vmem:[#allocation179_spill] sm:$0xff] %v7637_v20  ;;  %v7641_v28 = vpop.permute.xlu2 %3005  ;;  %v3047_v20 = vrot.slane %v7507_v22, 1 }
 0x63b   : > { %9409 = vst [vmem:[#allocation100_spill] sm:$0xff] %v7639_v35 }
 0x63c   : > { %9410 = vst [vmem:[#allocation35_spill] sm:$0xff] %v7641_v28  ;;  %v3049_v28 = vrot.slane %v7647_v56, 1 }
 0x63f   : > { %3107 = vrot.lane.b32.xlu1 %v9411_v31, %s4389_s17  ;;  %3105 = vrot.lane.b32.xlu0 %v9412_v55, %s4389_s17  ;;  %v7661_v31 = vsel %vm933_vm3, %v3047_v20, %v3049_v28  ;;  %v7664_v55 = vsel %vm933_vm3, %v3046_v7, %v3047_v20  ;;  %v9421_v28 = vld [vmem:[#allocation66_spill] sm:$0xff] }
 0x640   : > { %3152 = vrot.lane.b32.xlu2 %v7166_v24, %s4390_s20  ;;  %9417 = vst [vmem:[#allocation53_spill] sm:$0xff] %v7661_v31 }
 0x641   : > { %v7651_v0 = vpop.permute.xlu1 %2985  ;;  %v7653_v48 = vpop.permute.xlu0 %2983  ;;  %9418 = vst [vmem:[#allocation170_spill] sm:$0xff] %v7664_v55 }
 0x642   : > { %9414 = vst [vmem:[#allocation58_spill] sm:$0xff] %v7651_v0  ;;  %v7656_v35 = vpop.permute.xlu2 %3011 }
 0x643   : > { %9415 = vst [vmem:[#allocation185_spill] sm:$0xff] %v7653_v48 }
 0x644   : > { %9416 = vst [vmem:[#allocation121_spill] sm:$0xff] %v7656_v35 }
 0x647   : > { %3113 = vrot.lane.b32.xlu1 %v7661_v31, %s4389_s17  ;;  %3111 = vrot.lane.b32.xlu0 %v7664_v55, %s4389_s17 }
 0x648   : > { %3158 = vrot.lane.b32.xlu2 %v7184_v45, %s4390_s20 }
 0x649   : > { %v7672_v24 = vpop.permute.xlu1 %2991  ;;  %v7674_v35 = vpop.permute.xlu0 %2989 }
 0x64a   : > { %9419 = vst [vmem:[#allocation129_spill] sm:$0xff] %v7672_v24  ;;  %v7676_v0 = vpop.permute.xlu2 %3055  ;;  %v9424_v24 = vld [vmem:[#allocation59_spill] sm:$0xff] }
 0x64b   : > { %9420 = vst [vmem:[#allocation55_spill] sm:$0xff] %v7674_v35  ;;  %v9425_v35 = vld [vmem:[#allocation47_spill] sm:$0xff] }
 0x64f   : > { %3156 = vrot.lane.b32.xlu1 %v7187_v17, %s4390_s20  ;;  %3154 = vrot.lane.b32.xlu0 %v9421_v28, %s4390_s20 }
 0x650   : > { %3164 = vrot.lane.b32.xlu2 %v7205_v43, %s4390_s20 }
 0x651   : > { %v7684_v20 = vpop.permute.xlu1 %2997  ;;  %v7686_v7 = vpop.permute.xlu0 %2995 }
 0x652   : > { %9422 = vst [vmem:[#allocation77_spill] sm:$0xff] %v7684_v20  ;;  %v7688_v48 = vpop.permute.xlu2 %3061  ;;  %v7702_v20 = vld [vmem:[#allocation3 + $0x30] sm:$0xff] }
 0x653   : > { %9423 = vst [vmem:[#allocation79_spill] sm:$0xff] %v7686_v7  ;;  %v9429_v7 = vld [vmem:[#allocation70_spill] sm:$0xff] }
 0x657   : > { %3162 = vrot.lane.b32.xlu1 %v9424_v24, %s4390_s20  ;;  %3160 = vrot.lane.b32.xlu0 %v9425_v35, %s4390_s20 }
 0x658   : > { %3352 = vrot.lane.b32.xlu2 %v6799_v40, %s4392_s21 }
 0x659   : > { %v7696_v31 = vpop.permute.xlu1 %3003  ;;  %v7698_v28 = vpop.permute.xlu0 %3001 }
 0x65a   : > { %9426 = vst [vmem:[#allocation127_spill] sm:$0xff] %v7696_v31  ;;  %v7700_v56 = vpop.permute.xlu2 %3067 }
 0x65b   : > { %9427 = vst [vmem:[#allocation132_spill] sm:$0xff] %v7698_v28  ;;  %v7716_v28 = vld [vmem:[#allocation3 + $0x38] sm:$0xff] }
 0x65c   : > { %9428 = vst [vmem:[#allocation134_spill] sm:$0xff] %v7700_v56  ;;  %v7758_v56 = vld [vmem:[#allocation3 + $0x60] sm:$0xff] }
 0x65f   : > { %3250 = vrot.lane.b32.xlu1 %v7702_v20, %s4391_s15  ;;  %3166 = vrot.lane.b32.xlu0 %v9429_v7, %s4390_s20 }
 0x660   : > { %3354 = vrot.lane.b32.xlu2 %v6796_v29, %s4392_s21 }
 0x661   : > { %v7710_v22 = vpop.permute.xlu1 %3009  ;;  %v7712_v40 = vpop.permute.xlu0 %3007 }
 0x662   : > { %9430 = vst [vmem:[#allocation176_spill] sm:$0xff] %v7710_v22  ;;  %v7714_v31 = vpop.permute.xlu2 %3073 }
 0x663   : > { %9431 = vst [vmem:[#allocation13_spill] sm:$0xff] %v7712_v40  ;;  %v7730_v40 = vld [vmem:[#allocation3 + $0x48] sm:$0xff] }
 0x664   : > { %9432 = vst [vmem:[#allocation19_spill] sm:$0xff] %v7714_v31  ;;  %v7744_v31 = vld [vmem:[#allocation3 + $0x50] sm:$0xff] }
 0x667   : > { %3252 = vrot.lane.b32.xlu1 %v7716_v28, %s4391_s15  ;;  %3453 = vrot.lane.b32.xlu0 %v7187_v17, %s4393_s22 }
 0x668   : > { %3356 = vrot.lane.b32.xlu2 %v6856_v36, %s4392_s21 }
 0x669   : > { %v7724_v55 = vpop.permute.xlu1 %3053  ;;  %v7726_v29 = vpop.permute.xlu0 %3051 }
 0x66a   : > { %v7728_v22 = vpop.permute.xlu2 %3079 }
 0x66b   : > { %9433 = vst [vmem:[#allocation39_spill] sm:$0xff] %v7728_v22 }
 0x66f   : > { %3254 = vrot.lane.b32.xlu1 %v7730_v40, %s4391_s15  ;;  %3455 = vrot.lane.b32.xlu0 %v7184_v45, %s4393_s22 }
 0x670   : > { %3358 = vrot.lane.b32.xlu2 %v6853_v41, %s4392_s21 }
 0x671   : > { %v7738_v17 = vpop.permute.xlu1 %3059  ;;  %v7740_v36 = vpop.permute.xlu0 %3057 }
 0x672   : > { %v7742_v59 = vpop.permute.xlu2 %3085 }
 0x673   : > { %9434 = vst [vmem:[#allocation7_spill] sm:$0xff] %v7742_v59 }
 0x677   : > { %3256 = vrot.lane.b32.xlu1 %v7744_v31, %s4391_s15  ;;  %3457 = vrot.lane.b32.xlu0 %v9425_v35, %s4393_s22 }
 0x678   : > { %3360 = vrot.lane.b32.xlu2 %v9375_v49, %s4392_s21 }
 0x679   : > { %v7752_v45 = vpop.permute.xlu1 %3065  ;;  %v7754_v41 = vpop.permute.xlu0 %3063 }
 0x67a   : > { %v7756_v22 = vpop.permute.xlu2 %3091 }
 0x67b   : > { %9435 = vst [vmem:[#allocation124_spill] sm:$0xff] %v7756_v22 }
 0x67f   : > { %3258 = vrot.lane.b32.xlu1 %v7758_v56, %s4391_s15  ;;  %3459 = vrot.lane.b32.xlu0 %v9424_v24, %s4393_s22 }
 0x680   : > { %3362 = vrot.lane.b32.xlu2 %v6887_v2, %s4392_s21 }
 0x681   : > { %v7766_v35 = vpop.permute.xlu1 %3071  ;;  %v7768_v49 = vpop.permute.xlu0 %3069 }
 0x682   : > { %9436 = vst [vmem:[#allocation137_spill] sm:$0xff] %v7766_v35  ;;  %v7770_v59 = vpop.permute.xlu2 %3097  ;;  %v7786_v35 = vld [vmem:[#allocation3 + $0x78] sm:$0xff] }
 0x683   : > { %9437 = vst [vmem:[#allocation144_spill] sm:$0xff] %v7768_v49 }
 0x684   : > { %9438 = vst [vmem:[#allocation139_spill] sm:$0xff] %v7770_v59 }
 0x685   : > { %9443 = vst [vmem:[#allocation130_spill] sm:$0xff] %v7786_v35 }
 0x687   : > { %3260 = vrot.lane.b32.xlu1 %v7772_v30, %s4391_s15  ;;  %3461 = vrot.lane.b32.xlu0 %v7205_v43, %s4393_s22 }
 0x688   : > { %3364 = vrot.lane.b32.xlu2 %v6914_v37, %s4392_s21 }
 0x689   : > { %v7780_v24 = vpop.permute.xlu1 %3077  ;;  %v7782_v2 = vpop.permute.xlu0 %3075 }
 0x68a   : > { %9440 = vst [vmem:[#allocation128_spill] sm:$0xff] %v7780_v24  ;;  %v7784_v22 = vpop.permute.xlu2 %3103  ;;  %v7800_v24 = vld [vmem:[#allocation3 + $0x80] sm:$0xff] }
 0x68b   : > { %9441 = vst [vmem:[#allocation71_spill] sm:$0xff] %v7782_v2 }
 0x68c   : > { %9442 = vst [vmem:[#allocation135_spill] sm:$0xff] %v7784_v22 }
 0x68d   : > { %9447 = vst [vmem:[#allocation133_spill] sm:$0xff] %v7800_v24 }
 0x68f   : > { %3262 = vrot.lane.b32.xlu1 %v7786_v35, %s4391_s15  ;;  %3463 = vrot.lane.b32.xlu0 %v9429_v7, %s4393_s22 }
 0x690   : > { %3366 = vrot.lane.b32.xlu2 %v9381_v8, %s4392_s21 }
 0x691   : > { %v7794_v43 = vpop.permute.xlu1 %3083  ;;  %v7796_v37 = vpop.permute.xlu0 %3081 }
 0x692   : > { %9444 = vst [vmem:[#allocation143_spill] sm:$0xff] %v7794_v43  ;;  %v7798_v59 = vpop.permute.xlu2 %3109 }
 0x693   : > { %9445 = vst [vmem:[#allocation172_spill] sm:$0xff] %v7796_v37 }
 0x694   : > { %9446 = vst [vmem:[#allocation104_spill] sm:$0xff] %v7798_v59 }
 0x697   : > { %3264 = vrot.lane.b32.xlu1 %v7800_v24, %s4391_s15  ;;  %3465 = vrot.lane.b32.xlu0 %v7232_v62, %s4393_s22 }
 0x698   : > { %3266 = vrot.lane.b32.xlu2 %v6925_v25, %s4391_s15 }
 0x699   : > { %v7808_v7 = vpop.permute.xlu1 %3089  ;;  %v7810_v8 = vpop.permute.xlu0 %3087 }
 0x69a   : > { %9448 = vst [vmem:[#allocation83_spill] sm:$0xff] %v7808_v7  ;;  %v7812_v22 = vpop.permute.xlu2 %3152  ;;  %v9452_v7 = vld [vmem:[#allocation68_spill] sm:$0xff] }
 0x69b   : > { %9449 = vst [vmem:[#allocation140_spill] sm:$0xff] %v7810_v8 }
 0x69f   : > { %3168 = vrot.lane.b32.xlu1 %v7232_v62, %s4390_s20  ;;  %3467 = vrot.lane.b32.xlu0 %v7229_v13, %s4393_s22 }
 0x6a0   : > { %3170 = vrot.lane.b32.xlu2 %v7229_v13, %s4390_s20 }
 0x6a1   : > { %v7820_v59 = vpop.permute.xlu1 %3095  ;;  %v7822_v43 = vpop.permute.xlu0 %3093 }
 0x6a2   : > { %9450 = vst [vmem:[#allocation147_spill] sm:$0xff] %v7820_v59  ;;  %v7824_v25 = vpop.permute.xlu2 %3158  ;;  %v3813_v59 = vld [vmem:[%s8731_s5 + $0x40] sm:$0xff] }
 0x6a3   : > { %9451 = vst [vmem:[#allocation145_spill] sm:$0xff] %v7822_v43  ;;  %v3812_v43 = vld [vmem:[%s8731_s5 + $0x38] sm:$0xff]  ;;  %3921 = vmatpush.msra.mxu2 %v3813_v59  ;;  %4287 = vmatpush.msra.mxu3 %v3813_v59  ;;  %v3810_v59 = vld [vmem:[%s8731_s5 + $0x28] sm:$0xff] }
 0x6a5   : > { %3922 = vmatpush.msra.mxu2 %v3812_v43  ;;  %4288 = vmatpush.msra.mxu3 %v3812_v43 }
 0x6a7   : > { %3469 = vrot.lane.b32.xlu1 %v9452_v7, %s4393_s22  ;;  %3368 = vrot.lane.b32.xlu0 %v9380_v6, %s4392_s21  ;;  %v3811_v6 = vld [vmem:[%s8731_s5 + $0x30] sm:$0xff] }
 0x6a8   : > { %3471 = vrot.lane.b32.xlu2 %v7255_v42, %s4393_s22  ;;  %3923 = vmatpush.msra.mxu2 %v3811_v6 }
 0x6a9   : > { %v7832_v62 = vpop.permute.xlu1 %3101  ;;  %v7834_v8 = vpop.permute.xlu0 %3099  ;;  %4289 = vmatpush.msra.mxu3 %v3811_v6  ;;  %v3806_v6 = vld [vmem:[%s8731_s5 + $0x8] sm:$0xff] }
 0x6aa   : > { %9453 = vst [vmem:[#allocation171_spill] sm:$0xff] %v7832_v62  ;;  %v7836_v13 = vpop.permute.xlu2 %3164  ;;  %v7849_v62 = vld [vmem:[#allocation3 + $0x98] sm:$0xff]  ;;  %3924 = vmatpush.msra.mxu2 %v3810_v59 }
 0x6ab   : > { %9454 = vst [vmem:[#allocation31_spill] sm:$0xff] %v7834_v8  ;;  %4290 = vmatpush.msra.mxu3 %v3810_v59 }
 0x6ac   : > { %9455 = vst [vmem:[#allocation141_spill] sm:$0xff] %v7849_v62 }
 0x6af   : > { %3370 = vrot.lane.b32.xlu1 %v9376_v18, %s4392_s21  ;;  %3268 = vrot.lane.b32.xlu0 %v7849_v62, %s4391_s15  ;;  %v3809_v18 = vld [vmem:[%s8731_s5 + $0x20] sm:$0xff]  ;;  %v3807_v62 = vld [vmem:[%s8731_s5 + $0x10] sm:$0xff] }
 0x6b0   : > { %3372 = vrot.lane.b32.xlu2 %v9386_v27, %s4392_s21  ;;  %v3808_v27 = vld [vmem:[%s8731_s5 + $0x18] sm:$0xff]  ;;  %3925 = vmatpush.msra.mxu2 %v3809_v18 }
 0x6b1   : > { %v7858_v8 = vpop.permute.xlu1 %3107  ;;  %v7860_v37 = vpop.permute.xlu0 %3105  ;;  %4291 = vmatpush.msra.mxu3 %v3809_v18 }
 0x6b2   : > { %9456 = vst [vmem:[#allocation51_spill] sm:$0xff] %v7858_v8  ;;  %v3353_v43 = vpop.permute.xlu2 %3352  ;;  %3926 = vmatpush.msra.mxu2 %v3808_v27 }
 0x6b3   : > { %9457 = vst [vmem:[#allocation136_spill] sm:$0xff] %v7860_v37  ;;  %4292 = vmatpush.msra.mxu3 %v3808_v27 }
 0x6b4   : > { %3927 = vmatpush.msra.mxu2 %v3807_v62 }
 0x6b5   : > { %4293 = vmatpush.msra.mxu3 %v3807_v62 }
 0x6b6   : > { %3928 = vmatpush.msra.mxu2 %v3806_v6 }
 0x6b7   : > { %3270 = vrot.lane.b32.xlu1 %v6952_v9, %s4391_s15  ;;  %3172 = vrot.lane.b32.xlu0 %v9452_v7, %s4390_s20  ;;  %v3805_v9 = vld [vmem:[%s8731_s5] sm:$0xff] }
 0x6b8   : > { %3272 = vrot.lane.b32.xlu2 %v6955_v39, %s4391_s15  ;;  %3929 = vmatpush.msra.mxu2 %v3805_v9  ;;  %v9460_v39 = vld [vmem:[#allocation80_spill] sm:$0xff] }
 0x6b9   : > { %v7880_v59 = vpop.permute.xlu1 %3113  ;;  %v7882_v8 = vpop.permute.xlu0 %3111  ;;  %4294 = vmatpush.msra.mxu3 %v3806_v6 }
 0x6ba   : > { %9458 = vst [vmem:[#allocation146_spill] sm:$0xff] %v7880_v59  ;;  %v3355_v18 = vpop.permute.xlu2 %3354 }
 0x6bb   : > { %9459 = vst [vmem:[#allocation154_spill] sm:$0xff] %v7882_v8  ;;  %4295 = vmatpush.msra.mxu3 %v3805_v9  ;;  %v9461_v8 = vld [vmem:[#allocation60_spill] sm:$0xff]  ;;  %v7907_v9 = vld [vmem:[#allocation3 + $0xc0] sm:$0xff] }
 0x6bc   : > { %9462 = vst [vmem:[#allocation150_spill] sm:$0xff] %v7907_v9 }
 0x6bf   : > { %3174 = vrot.lane.b32.xlu1 %v7255_v42, %s4390_s20  ;;  %3473 = vrot.lane.b32.xlu0 %v9460_v39, %s4393_s22 }
 0x6c0   : > { %3176 = vrot.lane.b32.xlu2 %v9460_v39, %s4390_s20  ;;  %v9463_v39 = vld [vmem:[#allocation89_spill] sm:$0xff] }
 0x6c1   : > { %v3157_v7 = vpop.permute.xlu1 %3156  ;;  %v3155_v27 = vpop.permute.xlu0 %3154 }
 0x6c2   : > { %v3357_v59 = vpop.permute.xlu2 %3356 }
 0x6c7   : > { %3475 = vrot.lane.b32.xlu1 %v9461_v8, %s4393_s22  ;;  %3374 = vrot.lane.b32.xlu0 %v9385_v53, %s4392_s21  ;;  %v4354_v53 = vld [vmem:[#allocation3] sm:$0xff] }
 0x6c8   : > { %3477 = vrot.lane.b32.xlu2 %v7281_v5, %s4393_s22  ;;  %v3549_v37 = vsel %vm549_vm1, %v4354_v53, %v9463_v39  ;;  %v7928_v53 = vld [vmem:[#allocation3 + $0xc8] sm:$0xff] }
 0x6c9   : > { %v7899_v42 = vpop.permute.xlu1 %3162  ;;  %v7901_v62 = vpop.permute.xlu0 %3160  ;;  %v3581_v35 = vsel %vm1921_vm7, %v3549_v37, %v7393_v3  ;;  %v4356_v3 = vld [vmem:[#allocation3 + $0x8] sm:$0xff] }
 0x6ca   : > { %v7903_v6 = vpop.permute.xlu2 %3358 }
 0x6cf   : > { %3376 = vrot.lane.b32.xlu1 %v9382_v38, %s4392_s21  ;;  %3274 = vrot.lane.b32.xlu0 %v7907_v9, %s4391_s15  ;;  %v3613_v38 = vsel %vm1954_vm6, %v3581_v35, %v7577_v26  ;;  %v9464_v26 = vld [vmem:[#allocation75_spill] sm:$0xff] }
 0x6d0   : > { %3378 = vrot.lane.b32.xlu2 %v9390_v34, %s4392_s21  ;;  %v3645_v9 = vsel %vm1987_vm8, %v3613_v38, %v7726_v29  ;;  %v3550_v29 = vsel %vm549_vm1, %v4356_v3, %v9464_v26 }
 0x6d1   : > { %v3251_v2 = vpop.permute.xlu1 %3250  ;;  %v7915_v24 = vpop.permute.xlu0 %3166  ;;  %v3677_v34 = vsel %vm2020_vm9, %v3645_v9, %v7812_v22 }
 0x6d2   : > { %v7919_v49 = vpop.permute.xlu2 %3360  ;;  %v3709_v30 = vsel %vm2053_vm11, %v3677_v34, %v3251_v2  ;;  %v3582_v2 = vsel %vm1921_vm7, %v3550_v29, %v7455_v11  ;;  %v4357_v11 = vld [vmem:[#allocation3 + $0x18] sm:$0xff] }
 0x6d3   : > { %v3741_v22 = vsel %vm2086_vm10, %v3709_v30, %v3353_v43 }
 0x6d7   : > { %3276 = vrot.lane.b32.xlu1 %v7928_v53, %s4391_s15  ;;  %3178 = vrot.lane.b32.xlu0 %v9461_v8, %s4390_s20  ;;  %v3614_v8 = vsel %vm1954_vm6, %v3582_v2, %v7533_v15  ;;  %v9465_v15 = vld [vmem:[#allocation41_spill] sm:$0xff] }
 0x6d8   : > { %3278 = vrot.lane.b32.xlu2 %v7003_v21, %s4391_s15  ;;  %v3646_v21 = vsel %vm1987_vm8, %v3614_v8, %v7724_v55  ;;  %v3551_v30 = vsel %vm549_vm1, %v4357_v11, %v9465_v15  ;;  %v8000_v11 = vld [vmem:[#allocation3 + $0xf0] sm:$0xff] }
 0x6d9   : > { %v3253_v35 = vpop.permute.xlu1 %3252  ;;  %v3454_v37 = vpop.permute.xlu0 %3453  ;;  %v3678_v38 = vsel %vm2020_vm9, %v3646_v21, %v3155_v27  ;;  %v3583_v27 = vsel %vm1921_vm7, %v3551_v30, %v7453_v46  ;;  %v4358_v46 = vld [vmem:[#allocation3 + $0x20] sm:$0xff] }
 0x6da   : > { %v7941_v9 = vpop.permute.xlu2 %3362  ;;  %v3773_v39 = vsel %vm339_vm0, %v3741_v22, %v3454_v37  ;;  %v3710_v34 = vsel %vm2053_vm11, %v3678_v38, %v3253_v35  ;;  %v3615_v29 = vsel %vm1954_vm6, %v3583_v27, %v7591_v4  ;;  %v9467_v4 = vld [vmem:[#allocation82_spill] sm:$0xff] }
 0x6db   : > { %4233 = vmatmul.msk.f32.vlgmr.msra.gmra.mxu2 %vm2164_vm12, %v3773_v39  ;;  %v3742_v55 = vsel %vm2086_vm10, %v3710_v34, %v3355_v18  ;;  %v9466_v18 = vld [vmem:[#allocation86_spill] sm:$0xff]  ;;  %v3552_v22 = vsel %vm549_vm1, %v4358_v46, %v9467_v4 }
 0x6df   : > { %3180 = vrot.lane.b32.xlu1 %v7281_v5, %s4390_s20  ;;  %3479 = vrot.lane.b32.xlu0 %v7278_v50, %s4393_s22 }
 0x6e0   : > { %3182 = vrot.lane.b32.xlu2 %v7278_v50, %s4390_s20  ;;  %v3647_v50 = vsel %vm1987_vm8, %v3615_v29, %v7676_v0 }
 0x6e1   : > { %v3255_v43 = vpop.permute.xlu1 %3254  ;;  %v3456_v3 = vpop.permute.xlu0 %3455  ;;  %v3679_v35 = vsel %vm2020_vm9, %v3647_v50, %v3157_v7  ;;  %v3584_v7 = vsel %vm1921_vm7, %v3552_v22, %v7409_v32  ;;  %v7996_v32 = vld [vmem:[#allocation3 + $0xe0] sm:$0xff] }
 0x6e2   : > { %v7962_v26 = vpop.permute.xlu2 %3364  ;;  %v3774_v5 = vsel %vm339_vm0, %v3742_v55, %v3456_v3  ;;  %v3711_v37 = vsel %vm2053_vm11, %v3679_v35, %v3255_v43 }
 0x6e3   : > { %4234 = vmatmul.msk.f32.gmra.mxu2 %vm2164_vm12, %v3774_v5  ;;  %v3743_v0 = vsel %vm2086_vm10, %v3711_v37, %v3357_v59 }
 0x6e7   : > { %3481 = vrot.lane.b32.xlu1 %v9466_v18, %s4393_s22  ;;  %3380 = vrot.lane.b32.xlu0 %v9389_v33, %s4392_s21  ;;  %v3616_v33 = vsel %vm1954_vm6, %v3584_v7, %v7589_v23  ;;  %v9468_v23 = vld [vmem:[#allocation78_spill] sm:$0xff] }
 0x6e8   : > { %3483 = vrot.lane.b32.xlu2 %v7306_v19, %s4393_s22  ;;  %v3648_v38 = vsel %vm1987_vm8, %v3616_v33, %v7740_v36  ;;  %v3553_v36 = vsel %vm549_vm1, %v7702_v20, %v9468_v23  ;;  %v9474_v23 = vld [vmem:[#allocation67_spill] sm:$0xff] }
 0x6e9   : > { %v3257_v2 = vpop.permute.xlu1 %3256  ;;  %v3458_v39 = vpop.permute.xlu0 %3457  ;;  %v3680_v34 = vsel %vm2020_vm9, %v3648_v38, %v7824_v25 }
 0x6ea   : > { %v7983_v8 = vpop.permute.xlu2 %3366  ;;  %v3775_v21 = vsel %vm339_vm0, %v3743_v0, %v3458_v39  ;;  %v3712_v59 = vsel %vm2053_vm11, %v3680_v34, %v3257_v2  ;;  %v8094_v34 = vld [vmem:[#allocation3 + $0xf8] sm:$0xff] }
 0x6eb   : > { %4235 = vmatmul.msk.f32.gmra.mxu2 %vm2164_vm12, %v3775_v21  ;;  %v3744_v30 = vsel %vm2086_vm10, %v3712_v59, %v7903_v6 }
 0x6ef   : > { %3382 = vrot.lane.b32.xlu1 %v9387_v51, %s4392_s21  ;;  %3280 = vrot.lane.b32.xlu0 %v7996_v32, %s4391_s15  ;;  %v3585_v51 = vsel %vm1921_vm7, %v3553_v36, %v7467_v10  ;;  %v9469_v10 = vld [vmem:[#allocation48_spill] sm:$0xff] }
 0x6f0   : > { %3282 = vrot.lane.b32.xlu2 %v8000_v11, %s4391_s15  ;;  %v3617_v55 = vsel %vm1954_vm6, %v3585_v51, %v7545_v14  ;;  %v3554_v14 = vsel %vm549_vm1, %v7716_v28, %v9469_v10  ;;  %v9476_v51 = vld [vmem:[#allocation74_spill] sm:$0xff] }
 0x6f1   : > { %v3259_v25 = vpop.permute.xlu1 %3258  ;;  %v3460_v15 = vpop.permute.xlu0 %3459  ;;  %v3649_v20 = vsel %vm1987_vm8, %v3617_v55, %v7738_v17  ;;  %v3586_v29 = vsel %vm1921_vm7, %v3554_v14, %v7465_v52  ;;  %v9477_v55 = vld [vmem:[#allocation134_spill] sm:$0xff] }
 0x6f2   : > { %v8011_v43 = vpop.permute.xlu2 %3266  ;;  %v3776_v3 = vsel %vm339_vm0, %v3744_v30, %v3460_v15  ;;  %v3681_v27 = vsel %vm2020_vm9, %v3649_v20, %v7901_v62  ;;  %v3618_v37 = vsel %vm1954_vm6, %v3586_v29, %v7603_v57  ;;  %v9470_v57 = vld [vmem:[#allocation103_spill] sm:$0xff]  ;;  %v9475_v15 = vld [vmem:[#allocation113_spill] sm:$0xff]  ;;  %v9480_v29 = vld [vmem:[#allocation96_spill] sm:$0xff] }
 0x6f3   : > { %4236 = vmatmul.msk.f32.gmra.mxu2 %vm2164_vm12, %v3776_v3  ;;  %v3713_v6 = vsel %vm2053_vm11, %v3681_v27, %v3259_v25  ;;  %v3555_v52 = vsel %vm549_vm1, %v7730_v40, %v9470_v57  ;;  %v9478_v27 = vld [vmem:[#allocation46_spill] sm:$0xff]  ;;  %v9485_v57 = vld [vmem:[#allocation144_spill] sm:$0xff] }
 0x6f4   : > { %v3745_v62 = vsel %vm2086_vm10, %v3713_v6, %v7919_v49  ;;  %v3587_v46 = vsel %vm1921_vm7, %v3555_v52, %v7421_v47  ;;  %v9471_v47 = vld [vmem:[#allocation87_spill] sm:$0xff] }
 0x6f7   : > { %3200 = vrot.lane.b32.xlu1 %v7354_v63, %s4390_s20  ;;  %3184 = vrot.lane.b32.xlu0 %v9466_v18, %s4390_s20 }
 0x6f8   : > { %3400 = vrot.lane.b32.xlu2 %v9401_v60, %s4392_s21  ;;  %v3650_v60 = vsel %vm1987_vm8, %v3618_v37, %v7688_v48 }
 0x6f9   : > { %v3261_v5 = vpop.permute.xlu1 %3260  ;;  %v3462_v17 = vpop.permute.xlu0 %3461  ;;  %v3682_v28 = vsel %vm2020_vm9, %v3650_v60, %v7899_v42  ;;  %v9482_v60 = vld [vmem:[#allocation148_spill] sm:$0xff] }
 0x6fa   : > { %v8035_v50 = vpop.permute.xlu2 %3170  ;;  %v3777_v35 = vsel %vm339_vm0, %v3745_v62, %v3462_v17  ;;  %v3714_v49 = vsel %vm2053_vm11, %v3682_v28, %v3261_v5  ;;  %v9483_v28 = vld [vmem:[#allocation122_spill] sm:$0xff] }
 0x6fb   : > { %4237 = vmatmul.msk.f32.gmra.mxu2 %vm2164_vm12, %v3777_v35  ;;  %v3746_v42 = vsel %vm2086_vm10, %v3714_v49, %v7941_v9  ;;  %v8072_v9 = vld [vmem:[#allocation3 + $0x158] sm:$0xff] }
 0x6fc   : > { %v9481_v35 = vld [vmem:[#allocation9_spill] sm:$0xff] }
 0x6fd   : > { %v3558_v37 = vsel %vm549_vm1, %v9481_v35, %v9480_v29 }
 0x6ff   : > { %3384 = vrot.lane.b32.xlu1 %v9394_v44, %s4392_s21  ;;  %3298 = vrot.lane.b32.xlu0 %v7116_v12, %s4391_s15  ;;  %v3619_v12 = vsel %vm1954_vm6, %v3587_v46, %v7601_v1  ;;  %v9472_v1 = vld [vmem:[#allocation95_spill] sm:$0xff] }
 0x700   : > { %3186 = vrot.lane.b32.xlu2 %v7306_v19, %s4390_s20  ;;  %v3651_v19 = vsel %vm1987_vm8, %v3619_v12, %v7754_v41  ;;  %v3556_v41 = vsel %vm549_vm1, %v7744_v31, %v9472_v1 }
 0x701   : > { %v3263_v18 = vpop.permute.xlu1 %3262  ;;  %v3464_v48 = vpop.permute.xlu0 %3463  ;;  %v3683_v40 = vsel %vm2020_vm9, %v3651_v19, %v7836_v13  ;;  %v3588_v0 = vsel %vm1921_vm7, %v3556_v41, %v7479_v54  ;;  %v9473_v54 = vld [vmem:[#allocation85_spill] sm:$0xff]  ;;  %v8155_v41 = vld [vmem:[#allocation3 + $0x168] sm:$0xff] }
 0x702   : > { %v3472_v4 = vpop.permute.xlu2 %3471  ;;  %v3778_v44 = vsel %vm339_vm0, %v3746_v42, %v3464_v48  ;;  %v3715_v22 = vsel %vm2053_vm11, %v3683_v40, %v3263_v18  ;;  %v3620_v33 = vsel %vm1954_vm6, %v3588_v0, %v7557_v16  ;;  %v9486_v18 = vld [vmem:[#allocation14_spill] sm:$0xff] }
 0x703   : > { %4238 = vmatmul.msk.f32.gmra.mxu2 %vm2164_vm12, %v3778_v44  ;;  %v3747_v13 = vsel %vm2086_vm10, %v3715_v22, %v7962_v26  ;;  %v3652_v31 = vsel %vm1987_vm8, %v3620_v33, %v7752_v45  ;;  %v9487_v22 = vld [vmem:[#allocation91_spill] sm:$0xff] }
 0x704   : > { %v3684_v38 = vsel %vm2020_vm9, %v3652_v31, %v7915_v24  ;;  %v3557_v24 = vsel %vm549_vm1, %v7758_v56, %v9474_v23  ;;  %v9479_v56 = vld [vmem:[#allocation43_spill] sm:$0xff]  ;;  %v9492_v31 = vld [vmem:[#allocation137_spill] sm:$0xff] }
 0x705   : > { %v3589_v30 = vsel %vm1921_vm7, %v3557_v24, %v9475_v15  ;;  %v9494_v23 = vld [vmem:[#allocation63_spill] sm:$0xff]  ;;  %v8179_v24 = vld [vmem:[#allocation3 + $0x110] sm:$0xff] }
 0x706   : > { %v3621_v3 = vsel %vm1954_vm6, %v3589_v30, %v9476_v51  ;;  %v9495_v51 = vld [vmem:[#allocation76_spill] sm:$0xff] }
 0x707   : > { %3501 = vrot.lane.b32.xlu1 %v7381_v61, %s4393_s22  ;;  %3485 = vrot.lane.b32.xlu0 %v9471_v47, %s4393_s22  ;;  %v3653_v20 = vsel %vm1987_vm8, %v3621_v3, %v9477_v55  ;;  %v9496_v3 = vld [vmem:[#allocation133_spill] sm:$0xff] }
 0x708   : > { %3300 = vrot.lane.b32.xlu2 %v8072_v9, %s4391_s15  ;;  %v3560_v55 = vsel %vm549_vm1, %v9496_v3, %v9495_v51 }
 0x709   : > { %v3265_v2 = vpop.permute.xlu1 %3264  ;;  %v3466_v39 = vpop.permute.xlu0 %3465 }
 0x70a   : > { %v8083_v7 = vpop.permute.xlu2 %3372  ;;  %v3779_v21 = vsel %vm339_vm0, %v3747_v13, %v3466_v39  ;;  %v3716_v26 = vsel %vm2053_vm11, %v3684_v38, %v3265_v2  ;;  %v9489_v2 = vld [vmem:[#allocation173_spill] sm:$0xff] }
 0x70b   : > { %4239 = vmatmul.msk.f32.gmra.mxu2 %vm2164_vm12, %v3779_v21  ;;  %v3748_v45 = vsel %vm2086_vm10, %v3716_v26, %v7983_v8  ;;  %v9491_v13 = vld [vmem:[#allocation169_spill] sm:$0xff] }
 0x70f   : > { %3284 = vrot.lane.b32.xlu1 %v8094_v34, %s4391_s15  ;;  %3202 = vrot.lane.b32.xlu0 %v7335_v58, %s4390_s20 }
 0x710   : > { %3487 = vrot.lane.b32.xlu2 %v9473_v54, %s4393_s22 }
 0x711   : > { %v3169_v16 = vpop.permute.xlu1 %3168  ;;  %v3468_v59 = vpop.permute.xlu0 %3467 }
 0x712   : > { %v8107_v36 = vpop.permute.xlu2 %3272  ;;  %v3780_v25 = vsel %vm339_vm0, %v3748_v45, %v3468_v59  ;;  %v3685_v8 = vsel %vm2020_vm9, %v3653_v20, %v3169_v16  ;;  %v9493_v45 = vld [vmem:[#allocation102_spill] sm:$0xff] }
 0x713   : > { %4240 = vmatmul.msk.f32.gmra.mxu2 %vm2164_vm12, %v3780_v25  ;;  %v3717_v10 = vsel %vm2053_vm11, %v3685_v8, %v8011_v43  ;;  %v9484_v43 = vld [vmem:[#allocation94_spill] sm:$0xff] }
 0x717   : > { %3402 = vrot.lane.b32.xlu1 %v9478_v27, %s4392_s21  ;;  %3386 = vrot.lane.b32.xlu0 %v9479_v56, %s4392_s21  ;;  %v9497_v27 = vld [vmem:[#allocation125_spill] sm:$0xff] }
 0x718   : > { %3204 = vrot.lane.b32.xlu2 %v7381_v61, %s4390_s20  ;;  %v3590_v61 = vsel %vm1921_vm7, %v3558_v37, %v9482_v60  ;;  %v3592_v56 = vsel %vm1921_vm7, %v3560_v55, %v9497_v27  ;;  %v8255_v55 = vld [vmem:[#allocation3 + $0x120] sm:$0xff] }
 0x719   : > { %v3470_v6 = vpop.permute.xlu1 %3469  ;;  %v3369_v14 = vpop.permute.xlu0 %3368  ;;  %v3622_v49 = vsel %vm1954_vm6, %v3590_v61, %v9483_v28 }
 0x71a   : > { %v8126_v5 = vpop.permute.xlu2 %3176  ;;  %v3749_v17 = vsel %vm2086_vm10, %v3717_v10, %v3369_v14  ;;  %v3654_v52 = vsel %vm1987_vm8, %v3622_v49, %v9485_v57  ;;  %v9499_v14 = vld [vmem:[#allocation19_spill] sm:$0xff]  ;;  %v4366_v49 = vld [vmem:[#allocation3 + $0x90] sm:$0xff] }
 0x71b   : > { %v3781_v62 = vsel %vm339_vm0, %v3749_v17, %v3470_v6  ;;  %v3686_v48 = vsel %vm2020_vm9, %v3654_v52, %v8035_v50  ;;  %v8159_v50 = vld [vmem:[#allocation3 + $0x108] sm:$0xff]  ;;  %v9498_v6 = vld [vmem:[#allocation69_spill] sm:$0xff] }
 0x71c   : > { %4241 = vmatmul.msk.f32.gmra.mxu2 %vm2164_vm12, %v3781_v62  ;;  %v3624_v10 = vsel %vm1954_vm6, %v3592_v56, %v9498_v6  ;;  %v9500_v62 = vld [vmem:[#allocation57_spill] sm:$0xff]  ;;  %v9502_v57 = vld [vmem:[#allocation27_spill] sm:$0xff] }
 0x71d   : > { %v3656_v17 = vsel %vm1987_vm8, %v3624_v10, %v9499_v14  ;;  %v4369_v10 = vld [vmem:[#allocation3 + $0xa8] sm:$0xff]  ;;  %v9515_v14 = vld [vmem:[#allocation62_spill] sm:$0xff] }
 0x71f   : > { %3188 = vrot.lane.b32.xlu1 %v9471_v47, %s4390_s20  ;;  %3503 = vrot.lane.b32.xlu0 %v9484_v43, %s4393_s22  ;;  %v9488_v47 = vld [vmem:[#allocation130_spill] sm:$0xff] }
 0x720   : > { %3388 = vrot.lane.b32.xlu2 %v9486_v18, %s4392_s21  ;;  %v3559_v1 = vsel %vm549_vm1, %v9488_v47, %v9487_v22  ;;  %v9503_v18 = vld [vmem:[#allocation131_spill] sm:$0xff] }
 0x721   : > { %v3371_v42 = vpop.permute.xlu1 %3370  ;;  %v3269_v46 = vpop.permute.xlu0 %3268  ;;  %v3591_v39 = vsel %vm1921_vm7, %v3559_v1, %v9489_v2 }
 0x722   : > { %v3478_v44 = vpop.permute.xlu2 %3477  ;;  %v3718_v12 = vsel %vm2053_vm11, %v3686_v48, %v3269_v46  ;;  %v3623_v0 = vsel %vm1954_vm6, %v3591_v39, %v9491_v13  ;;  %v9505_v46 = vld [vmem:[#allocation71_spill] sm:$0xff]  ;;  %v9506_v13 = vld [vmem:[#allocation22_spill] sm:$0xff] }
 0x723   : > { %v3750_v19 = vsel %vm2086_vm10, %v3718_v12, %v3371_v42  ;;  %v3655_v38 = vsel %vm1987_vm8, %v3623_v0, %v9492_v31  ;;  %v8220_v42 = vld [vmem:[#allocation3 + $0x170] sm:$0xff]  ;;  %v9507_v0 = vld [vmem:[#allocation141_spill] sm:$0xff]  ;;  %v9510_v31 = vld [vmem:[#allocation50_spill] sm:$0xff] }
 0x724   : > { %v3782_v40 = vsel %vm339_vm0, %v3750_v19, %v3472_v4  ;;  %v9490_v4 = vld [vmem:[#allocation8_spill] sm:$0xff] }
 0x725   : > { %4242 = vmatmul.msk.f32.gmra.mxu2 %vm2164_vm12, %v3782_v40 }
 0x727   : > { %3302 = vrot.lane.b32.xlu1 %v8155_v41, %s4391_s15  ;;  %3286 = vrot.lane.b32.xlu0 %v8159_v50, %s4391_s15 }
 0x728   : > { %3505 = vrot.lane.b32.xlu2 %v9490_v4, %s4393_s22 }
 0x729   : > { %v3271_v21 = vpop.permute.xlu1 %3270  ;;  %v3173_v33 = vpop.permute.xlu0 %3172 }
 0x72a   : > { %v8171_v26 = vpop.permute.xlu2 %3378  ;;  %v3687_v16 = vsel %vm2020_vm9, %v3655_v38, %v3173_v33  ;;  %v9508_v33 = vld [vmem:[#allocation115_spill] sm:$0xff] }
 0x72b   : > { %v3719_v59 = vsel %vm2053_vm11, %v3687_v16, %v3271_v21  ;;  %v3562_v21 = vsel %vm549_vm1, %v9507_v0, %v9506_v13  ;;  %v9511_v16 = vld [vmem:[#allocation42_spill] sm:$0xff] }
 0x72c   : > { %v3751_v30 = vsel %vm2086_vm10, %v3719_v59, %v8083_v7  ;;  %v3594_v38 = vsel %vm1921_vm7, %v3562_v21, %v9510_v31  ;;  %v9512_v59 = vld [vmem:[#allocation72_spill] sm:$0xff]  ;;  %v9524_v21 = vld [vmem:[#allocation179_spill] sm:$0xff] }
 0x72f   : > { %3489 = vrot.lane.b32.xlu1 %v9493_v45, %s4393_s22  ;;  %3404 = vrot.lane.b32.xlu0 %v9494_v23, %s4392_s21 }
 0x730   : > { %3288 = vrot.lane.b32.xlu2 %v8179_v24, %s4391_s15 }
 0x731   : > { %v3175_v25 = vpop.permute.xlu1 %3174  ;;  %v3474_v15 = vpop.permute.xlu0 %3473 }
 0x732   : > { %v8188_v20 = vpop.permute.xlu2 %3278  ;;  %v3783_v8 = vsel %vm339_vm0, %v3751_v30, %v3474_v15  ;;  %v3688_v7 = vsel %vm2020_vm9, %v3656_v17, %v3175_v25  ;;  %v9513_v25 = vld [vmem:[#allocation128_spill] sm:$0xff]  ;;  %v3563_v17 = vsel %vm549_vm1, %v4369_v10, %v9515_v14  ;;  %v8338_v14 = vld [vmem:[#allocation3 + $0x128] sm:$0xff] }
 0x733   : > { %4243 = vmatmul.msk.f32.gmra.mxu2 %vm2164_vm12, %v3783_v8  ;;  %v3720_v35 = vsel %vm2053_vm11, %v3688_v7, %v8107_v36  ;;  %v9504_v36 = vld [vmem:[#allocation49_spill] sm:$0xff] }
 0x734   : > { %v9514_v8 = vld [vmem:[#allocation93_spill] sm:$0xff] }
 0x737   : > { %3206 = vrot.lane.b32.xlu1 %v9484_v43, %s4390_s20  ;;  %3190 = vrot.lane.b32.xlu0 %v9473_v54, %s4390_s20  ;;  %v9501_v43 = vld [vmem:[#allocation111_spill] sm:$0xff] }
 0x738   : > { %3406 = vrot.lane.b32.xlu2 %v9500_v62, %s4392_s21  ;;  %v3561_v54 = vsel %vm549_vm1, %v4366_v49, %v9501_v43  ;;  %v9519_v49 = vld [vmem:[#allocation170_spill] sm:$0xff]  ;;  %v9520_v43 = vld [vmem:[#allocation40_spill] sm:$0xff] }
 0x739   : > { %v3476_v29 = vpop.permute.xlu1 %3475  ;;  %v3375_v37 = vpop.permute.xlu0 %3374  ;;  %v3593_v52 = vsel %vm1921_vm7, %v3561_v54, %v9502_v57 }
 0x73a   : > { %v8207_v60 = vpop.permute.xlu2 %3182  ;;  %v3752_v61 = vsel %vm2086_vm10, %v3720_v35, %v3375_v37  ;;  %v3625_v48 = vsel %vm1954_vm6, %v3593_v52, %v9503_v18  ;;  %v9521_v18 = vld [vmem:[#allocation101_spill] sm:$0xff] }
 0x73b   : > { %v3784_v28 = vsel %vm339_vm0, %v3752_v61, %v3476_v29  ;;  %v3657_v12 = vsel %vm1987_vm8, %v3625_v48, %v9505_v46  ;;  %v9516_v29 = vld [vmem:[#allocation11_spill] sm:$0xff]  ;;  %v3148_v48 = vrot.slane %v9521_v18, 2 }
 0x73c   : > { %4244 = vmatmul.msk.f32.gmra.mxu2 %vm2164_vm12, %v3784_v28  ;;  %v3689_v19 = vsel %vm2020_vm9, %v3657_v12, %v8126_v5  ;;  %v9509_v5 = vld [vmem:[#allocation88_spill] sm:$0xff]  ;;  %v3595_v35 = vsel %vm1921_vm7, %v3563_v17, %v9516_v29  ;;  %v9518_v61 = vld [vmem:[#allocation39_spill] sm:$0xff] }
 0x73f   : > { %3390 = vrot.lane.b32.xlu1 %v9504_v36, %s4392_s21  ;;  %3304 = vrot.lane.b32.xlu0 %v8220_v42, %s4391_s15 }
 0x740   : > { %3192 = vrot.lane.b32.xlu2 %v9493_v45, %s4390_s20 }
 0x741   : > { %v3377_v40 = vpop.permute.xlu1 %3376  ;;  %v3275_v22 = vpop.permute.xlu0 %3274 }
 0x742   : > { %v8230_v47 = vpop.permute.xlu2 %3483  ;;  %v3721_v1 = vsel %vm2053_vm11, %v3689_v19, %v3275_v22  ;;  %v8294_v19 = vld [vmem:[%s8732_s6] ss:$0 sm:$0xff] }
 0x743   : > { %v3753_v2 = vsel %vm2086_vm10, %v3721_v1, %v3377_v40  ;;  %v3147_v40 = vrot.slane %v9511_v16, 2  ;;  %v9522_v22 = vld [vmem:[#allocation92_spill] sm:$0xff] }
 0x744   : > { %v3785_v39 = vsel %vm339_vm0, %v3753_v2, %v3478_v44  ;;  %v3626_v44 = vsel %vm1954_vm6, %v3594_v38, %v9512_v59  ;;  %v9523_v2 = vld [vmem:[#allocation54_spill] sm:$0xff]  ;;  %v9525_v38 = vld [vmem:[#allocation172_spill] sm:$0xff] }
 0x745   : > { %4245 = vmatmul.msk.f32.gmra.mxu2 %vm2164_vm12, %v3785_v39  ;;  %v3658_v15 = vsel %vm1987_vm8, %v3626_v44, %v9513_v25  ;;  %v3149_v0 = vsel %vm1110_vm4, %v3147_v40, %v3148_v48  ;;  %v9526_v59 = vld [vmem:[#allocation34_spill] sm:$0xff] }
 0x747   : > { %3507 = vrot.lane.b32.xlu1 %v9508_v33, %s4393_s22  ;;  %3491 = vrot.lane.b32.xlu0 %v9509_v5, %s4393_s22 }
 0x748   : > { %3306 = vrot.lane.b32.xlu2 %v9511_v16, %s4391_s15 }
 0x749   : > { %v3277_v45 = vpop.permute.xlu1 %3276  ;;  %v3179_v23 = vpop.permute.xlu0 %3178 }
 0x74a   : > { %v8251_v30 = vpop.permute.xlu2 %3282  ;;  %v3690_v51 = vsel %vm2020_vm9, %v3658_v15, %v3179_v23 }
 0x74b   : > { %v3722_v3 = vsel %vm2053_vm11, %v3690_v51, %v3277_v45 }
 0x74c   : > { %v3754_v6 = vsel %vm2086_vm10, %v3722_v3, %v8171_v26  ;;  %v9527_v3 = vld [vmem:[#allocation109_spill] sm:$0xff] }
 0x74f   : > { %3290 = vrot.lane.b32.xlu1 %v8255_v55, %s4391_s15  ;;  %3208 = vrot.lane.b32.xlu0 %v9490_v4, %s4390_s20  ;;  %v9517_v4 = vld [vmem:[#allocation100_spill] sm:$0xff] }
 0x750   : > { %3493 = vrot.lane.b32.xlu2 %v9514_v8, %s4393_s22  ;;  %v3627_v37 = vsel %vm1954_vm6, %v3595_v35, %v9517_v4  ;;  %v2544_v4 = vld [vmem:[#allocation3 + $0x198] sm:$0xff] }
 0x751   : > { %v3181_v27 = vpop.permute.xlu1 %3180  ;;  %v3480_v56 = vpop.permute.xlu0 %3479  ;;  %v3659_v28 = vsel %vm1987_vm8, %v3627_v37, %v9518_v61  ;;  %v8348_v37 = vld [vmem:[#allocation3 + $0x1a0] sm:$0xff]  ;;  %v3347_v40 = vrot.slane %v2544_v4, 1 }
 0x752   : > { %v8267_v7 = vpop.permute.xlu2 %3400  ;;  %v3786_v62 = vsel %vm339_vm0, %v3754_v6, %v3480_v56  ;;  %v3691_v26 = vsel %vm2020_vm9, %v3659_v28, %v3181_v27  ;;  %v3150_v27 = vrot.slane %v9527_v3, 2  ;;  %v9528_v28 = vld [vmem:[#allocation105_spill] sm:$0xff] }
 0x753   : > { %4246 = vmatmul.msk.f32.gmra.mxu2 %vm2164_vm12, %v3786_v62  ;;  %v3723_v57 = vsel %vm2053_vm11, %v3691_v26, %v8188_v20  ;;  %v4370_v20 = vld [vmem:[#allocation3 + $0xb0] sm:$0xff]  ;;  %v9529_v26 = vld [vmem:[#allocation53_spill] sm:$0xff] }
 0x754   : > { %v3564_v1 = vsel %vm549_vm1, %v4370_v20, %v9522_v22  ;;  %v8334_v10 = vsel %vm1110_vm4, %v3148_v48, %v3150_v27  ;;  %v3348_v20 = vrot.slane %v8348_v37, 1  ;;  %v9533_v22 = vld [vmem:[#allocation108_spill] sm:$0xff] }
 0x755   : > { %v3596_v39 = vsel %vm1921_vm7, %v3564_v1, %v9523_v2  ;;  %v9534_v2 = vld [vmem:[#allocation167_spill] sm:$0xff] }
 0x757   : > { %3408 = vrot.lane.b32.xlu1 %v9519_v49, %s4392_s21  ;;  %3392 = vrot.lane.b32.xlu0 %v9520_v43, %s4392_s21  ;;  %v9530_v49 = vld [vmem:[#allocation99_spill] sm:$0xff]  ;;  %v9531_v43 = vld [vmem:[#allocation150_spill] sm:$0xff] }
 0x758   : > { %3210 = vrot.lane.b32.xlu2 %v9508_v33, %s4390_s20  ;;  %v3628_v33 = vsel %vm1954_vm6, %v3596_v39, %v9524_v21 }
 0x759   : > { %v3482_v54 = vpop.permute.xlu1 %3481  ;;  %v3381_v52 = vpop.permute.xlu0 %3380  ;;  %v3660_v16 = vsel %vm1987_vm8, %v3628_v33, %v9525_v38  ;;  %v9536_v33 = vld [vmem:[#allocation77_spill] sm:$0xff] }
 0x75a   : > { %v8287_v36 = vpop.permute.xlu2 %3186  ;;  %v3755_v46 = vsel %vm2086_vm10, %v3723_v57, %v3381_v52  ;;  %v3692_v44 = vsel %vm2020_vm9, %v3660_v16, %v8207_v60  ;;  %v8358_v57 = vld [vmem:[#allocation3 + $0x138] sm:$0xff]  ;;  %v9532_v52 = vld [vmem:[#allocation38_spill] sm:$0xff]  ;;  %v9538_v16 = vld [vmem:[#allocation31_spill] sm:$0xff] }
 0x75b   : > { %v3787_v12 = vsel %vm339_vm0, %v3755_v46, %v3482_v54  ;;  %v3565_v54 = vsel %vm549_vm1, %v9531_v43, %v9530_v49 }
 0x75c   : > { %4247 = vmatmul.msk.f32.gmra.mxu2 %vm2164_vm12, %v3787_v12  ;;  %v3597_v39 = vsel %vm1921_vm7, %v3565_v54, %v9534_v2 }
 0x75e   : > { %v3931_v13 = vpop.f32.mrf.mxu2 }
 0x75f   : > { %v3932_v31 = vadd.f32 %v8294_v19, %v3931_v13  ;;  %3194 = vrot.lane.b32.xlu1 %v9509_v5, %s4390_s20  ;;  %3509 = vrot.lane.b32.xlu0 %v3149_v0, %s4393_s22  ;;  %v9535_v13 = vld [vmem:[#allocation4_spill] sm:$0xff] }
 0x760   : > { %3394 = vrot.lane.b32.xlu2 %v9526_v59, %s4392_s21  ;;  %v3629_v21 = vsel %vm1954_vm6, %v3597_v39, %v9535_v13  ;;  %v9544_v13 = vld [vmem:[#allocation18_spill] sm:$0xff] }
 0x761   : > { %v4027_v45 = vmax.f32 %v3932_v31, 0.0  ;;  %v3383_v5 = vpop.permute.xlu1 %3382  ;;  %v3281_v23 = vpop.permute.xlu0 %3280 }
 0x762   : > { %v8322_v25 = vpop.permute.xlu2 %3300  ;;  %v3724_v15 = vsel %vm2053_vm11, %v3692_v44, %v3281_v23  ;;  %v3349_v23 = vsel %vm933_vm3, %v3347_v40, %v3348_v20 }
 0x763   : > { %4059 = vst.msk [vmem:[%s8314_s18] sm:$0xff] %vm549_vm1, %v4027_v45  ;;  %v3756_v51 = vsel %vm2086_vm10, %v3724_v15, %v3383_v5 }
 0x764   : > { %v3788_v56 = vsel %vm339_vm0, %v3756_v51, %v8230_v47 }
 0x765   : > { %4248 = vmatmul.msk.f32.gmra.mxu2 %vm2164_vm12, %v3788_v56 }
 0x766   : > { %v3934_v60 = vpop.f32.mrf.mxu2 }
 0x767   : > { %v3935_v6 = vadd.f32 %v8294_v19, %v3934_v60  ;;  %3308 = vrot.lane.b32.xlu1 %v9521_v18, %s4391_s15  ;;  %3292 = vrot.lane.b32.xlu0 %v8338_v14, %s4391_s15  ;;  %v3573_v18 = vsel %vm549_vm1, %v8255_v55, %v9532_v52  ;;  %v9537_v55 = vld [vmem:[#allocation143_spill] sm:$0xff]  ;;  %v9540_v52 = vld [vmem:[#allocation81_spill] sm:$0xff] }
 0x768   : > { %3511 = vrot.lane.b32.xlu2 %v8334_v10, %s4393_s22  ;;  %v3605_v1 = vsel %vm1921_vm7, %v3573_v18, %v9533_v22  ;;  %v3661_v38 = vsel %vm1987_vm8, %v3629_v21, %v9537_v55  ;;  %v3566_v18 = vsel %vm549_vm1, %v7928_v53, %v9540_v52  ;;  %v9543_v22 = vld [vmem:[#allocation7_spill] sm:$0xff]  ;;  %v3574_v21 = vsel %vm549_vm1, %v8338_v14, %v9544_v13 }
 0x769   : > { %v4028_v47 = vmax.f32 %v3935_v6, 0.0  ;;  %v3201_v17 = vpop.permute.xlu1 %3200  ;;  %v3185_v62 = vpop.permute.xlu0 %3184  ;;  %v3637_v31 = vsel %vm1954_vm6, %v3605_v1, %v9536_v33 }
 0x76a   : > { %v8344_v29 = vpop.permute.xlu2 %3487  ;;  %v3669_v59 = vsel %vm1987_vm8, %v3637_v31, %v9538_v16  ;;  %v3693_v5 = vsel %vm2020_vm9, %v3661_v38, %v3185_v62  ;;  %v9545_v16 = vld [vmem:[#allocation123_spill] sm:$0xff] }
 0x76b   : > { %4060 = vst.msk [vmem:[%s8314_s18 + $0x8] sm:$0xff] %vm549_vm1, %v4028_v47  ;;  %v3701_v45 = vsel %vm2020_vm9, %v3669_v59, %v3201_v17  ;;  %v3725_v27 = vsel %vm2053_vm11, %v3693_v5, %v8251_v30 }
 0x76e   : > { %v3937_v35 = vpop.f32.mrf.mxu2 }
 0x76f   : > { %v3938_v61 = vadd.f32 %v8294_v19, %v3937_v35  ;;  %3495 = vrot.lane.b32.xlu1 %v9528_v28, %s4393_s22  ;;  %3410 = vrot.lane.b32.xlu0 %v9529_v26, %s4392_s21  ;;  %v3449_v26 = vrot.slane %v8348_v37, 2 }
 0x770   : > { %3294 = vrot.lane.b32.xlu2 %v8358_v57, %s4391_s15 }
 0x771   : > { %v4029_v48 = vmax.f32 %v3938_v61, 0.0  ;;  %v3385_v46 = vpop.permute.xlu1 %3384  ;;  %v3299_v12 = vpop.permute.xlu0 %3298  ;;  %v9539_v61 = vld [vmem:[#allocation26_spill] sm:$0xff] }
 0x772   : > { %v8380_v44 = vpop.permute.xlu2 %3204  ;;  %v3733_v15 = vsel %vm2053_vm11, %v3701_v45, %v3299_v12  ;;  %v3757_v56 = vsel %vm2086_vm10, %v3725_v27, %v3385_v46  ;;  %v9541_v46 = vld [vmem:[#allocation33_spill] sm:$0xff] }
 0x773   : > { %4061 = vst.msk [vmem:[%s8314_s18 + $0x10] sm:$0xff] %vm549_vm1, %v4029_v48  ;;  %v3765_v47 = vsel %vm2086_vm10, %v3733_v15, %v8267_v7  ;;  %v3448_v7 = vrot.slane %v2544_v4, 2  ;;  %v3598_v12 = vsel %vm1921_vm7, %v3566_v18, %v9541_v46 }
 0x775   : > { %v3450_v48 = vsel %vm1110_vm4, %v3448_v7, %v3449_v26  ;;  %v4374_v7 = vld [vmem:[#allocation3 + $0xd8] sm:$0xff] }
 0x776   : > { %v3940_v51 = vpop.f32.mrf.mxu2 }
 0x777   : > { %v3941_v3 = vadd.f32 %v8294_v19, %v3940_v51  ;;  %3212 = vrot.lane.b32.xlu1 %v3149_v0, %s4390_s20  ;;  %3196 = vrot.lane.b32.xlu0 %v9514_v8, %s4390_s20  ;;  %v2546_v51 = vld [vmem:[#allocation3 + $0x1a8] sm:$0x3] }
 0x778   : > { %3412 = vrot.lane.b32.xlu2 %v3349_v23, %s4392_s21  ;;  %v9547_v23 = vld [vmem:[#allocation171_spill] sm:$0xff] }
 0x779   : > { %v4030_v60 = vmax.f32 %v3941_v3, 0.0  ;;  %v3502_v6 = vpop.permute.xlu1 %3501  ;;  %v3486_v17 = vpop.permute.xlu0 %3485 }
 0x77a   : > { %v3797_v62 = vsel %vm339_vm0, %v3765_v47, %v3502_v6  ;;  %v3789_v0 = vsel %vm339_vm0, %v3757_v56, %v3486_v17  ;;  %v8404_v30 = vpop.permute.xlu2 %3388  ;;  %v4373_v56 = vld [vmem:[#allocation3 + $0x140] sm:$0xff] }
 0x77b   : > { %4062 = vst.msk [vmem:[%s8314_s18 + $0x18] sm:$0xff] %vm549_vm1, %v4030_v60  ;;  %4249 = vmatmul.msk.f32.gmra.mxu2 %vm2164_vm12, %v3789_v0  ;;  %4257 = vmatmul.msk.f32.vlgmr.msra.gmra.mxu3 %vm2164_vm12, %v3797_v62  ;;  %v3350_v60 = vrot.slane %v2546_v51, 1 }
 0x77e   : > { %v3943_v8 = vpop.f32.mrf.mxu2 }
 0x77f   : > { %v3944_v35 = vadd.f32 %v8294_v19, %v3943_v8  ;;  %3396 = vrot.lane.b32.xlu1 %v9539_v61, %s4392_s21  ;;  %3310 = vrot.lane.b32.xlu0 %v2544_v4, %s4391_s15  ;;  %v3451_v61 = vrot.slane %v2546_v51, 2 }
 0x780   : > { %3198 = vrot.lane.b32.xlu2 %v9528_v28, %s4390_s20  ;;  %v9542_v28 = vld [vmem:[#allocation185_spill] sm:$0xff] }
 0x781   : > { %v4031_v49 = vmax.f32 %v3944_v35, 0.0  ;;  %v3285_v43 = vpop.permute.xlu1 %3284  ;;  %v3203_v54 = vpop.permute.xlu0 %3202  ;;  %v3630_v4 = vsel %vm1954_vm6, %v3598_v12, %v9542_v28  ;;  %v9548_v35 = vld [vmem:[#allocation44_spill] sm:$0xff]  ;;  %v9552_v28 = vld [vmem:[#allocation37_spill] sm:$0xff] }
 0x782   : > { %v3662_v1 = vsel %vm1987_vm8, %v3630_v4, %v9543_v22  ;;  %v8433_v39 = vpop.permute.xlu2 %3505  ;;  %v3575_v4 = vsel %vm549_vm1, %v8358_v57, %v9552_v28  ;;  %v9556_v57 = vld [vmem:[#allocation135_spill] sm:$0xff] }
 0x783   : > { %4063 = vst.msk [vmem:[%s8314_s18 + $0x20] sm:$0xff] %vm549_vm1, %v4031_v49  ;;  %v3694_v53 = vsel %vm2020_vm9, %v3662_v1, %v8287_v36  ;;  %v9546_v36 = vld [vmem:[#allocation138_spill] sm:$0xff]  ;;  %v9549_v49 = vld [vmem:[#allocation32_spill] sm:$0xff] }
 0x784   : > { %v3726_v33 = vsel %vm2053_vm11, %v3694_v53, %v3285_v43  ;;  %v3567_v43 = vsel %vm549_vm1, %v4374_v7, %v9549_v49  ;;  %v9554_v53 = vld [vmem:[#allocation116_spill] sm:$0xff]  ;;  %v9562_v49 = vld [vmem:[#allocation127_spill] sm:$0xff] }
 0x785   : > { %v3607_v13 = vsel %vm1921_vm7, %v3575_v4, %v9554_v53 }
 0x786   : > { %v3946_v40 = vpop.f32.mrf.mxu2 }
 0x787   : > { %v3947_v2 = vadd.f32 %v8294_v19, %v3946_v40  ;;  %3513 = vrot.lane.b32.xlu1 %v3450_v48, %s4393_s22  ;;  %3497 = vrot.lane.b32.xlu0 %v7354_v63, %s4393_s22  ;;  %v3606_v63 = vsel %vm1921_vm7, %v3574_v21, %v9545_v16  ;;  %v9550_v48 = vld [vmem:[#allocation56_spill] sm:$0xff] }
 0x788   : > { %3312 = vrot.lane.b32.xlu2 %v8348_v37, %s4391_s15  ;;  %v3638_v45 = vsel %vm1954_vm6, %v3606_v63, %v9546_v36  ;;  %v3599_v46 = vsel %vm1921_vm7, %v3567_v43, %v9550_v48  ;;  %v9553_v40 = vld [vmem:[#allocation140_spill] sm:$0xff] }
 0x789   : > { %v4032_v31 = vmax.f32 %v3947_v2, 0.0  ;;  %v3403_v55 = vpop.permute.xlu1 %3402  ;;  %v3387_v38 = vpop.permute.xlu0 %3386  ;;  %v3670_v14 = vsel %vm1987_vm8, %v3638_v45, %v9547_v23  ;;  %v3452_v2 = vsel %vm1110_vm4, %v3449_v26, %v3451_v61  ;;  %v9561_v61 = vld [vmem:[#allocation61_spill] sm:$0xff] }
 0x78a   : > { %v3758_v59 = vsel %vm2086_vm10, %v3726_v33, %v3387_v38  ;;  %v3702_v15 = vsel %vm2020_vm9, %v3670_v14, %v3203_v54  ;;  %v8463_v0 = vpop.permute.xlu2 %3288  ;;  %v9555_v33 = vld [vmem:[#allocation132_spill] sm:$0xff] }
 0x78b   : > { %4064 = vst.msk [vmem:[%s8314_s18 + $0x28] sm:$0xff] %vm549_vm1, %v4032_v31  ;;  %v3790_v5 = vsel %vm339_vm0, %v3758_v59, %v8344_v29  ;;  %v3734_v29 = vsel %vm2053_vm11, %v3702_v15, %v8322_v25  ;;  %v3351_v25 = vsel %vm933_vm3, %v3348_v20, %v3350_v60  ;;  %v9551_v20 = vld [vmem:[#allocation58_spill] sm:$0xff]  ;;  %v3639_v31 = vsel %vm1954_vm6, %v3607_v13, %v9555_v33 }
 0x78c   : > { %4250 = vmatmul.msk.f32.gmra.mxu2 %vm2164_vm12, %v3790_v5  ;;  %v3766_v6 = vsel %vm2086_vm10, %v3734_v29, %v3403_v55  ;;  %v3631_v12 = vsel %vm1954_vm6, %v3599_v46, %v9551_v20  ;;  %v3671_v38 = vsel %vm1987_vm8, %v3639_v31, %v9556_v57 }
 0x78d   : > { %v3663_v22 = vsel %vm1987_vm8, %v3631_v12, %v9553_v40  ;;  %v3703_v37 = vsel %vm2020_vm9, %v3671_v38, %v8380_v44 }
 0x78e   : > { %v3949_v3 = vpop.f32.mrf.mxu2 }
 0x78f   : > { %v3950_v27 = vadd.f32 %v8294_v19, %v3949_v3  ;;  %3296 = vrot.lane.b32.xlu1 %v4373_v56, %s4391_s15  ;;  %3214 = vrot.lane.b32.xlu0 %v8334_v10, %s4390_s20 }
 0x790   : > { %3499 = vrot.lane.b32.xlu2 %v7335_v58, %s4393_s22 }
 0x791   : > { %v4033_v47 = vmax.f32 %v3950_v27, 0.0  ;;  %v3189_v17 = vpop.permute.xlu1 %3188  ;;  %v3504_v62 = vpop.permute.xlu0 %3503 }
 0x792   : > { %v3798_v8 = vsel %vm339_vm0, %v3766_v6, %v3504_v62  ;;  %v3407_v1 = vpop.permute.xlu2 %3406  ;;  %v3695_v21 = vsel %vm2020_vm9, %v3663_v22, %v3189_v17  ;;  %v9557_v6 = vld [vmem:[#allocation110_spill] sm:$0xff]  ;;  %v9558_v17 = vld [vmem:[#allocation97_spill] sm:$0xff] }
 0x793   : > { %4065 = vst.msk [vmem:[%s8314_s18 + $0x30] sm:$0xff] %vm549_vm1, %v4033_v47  ;;  %4258 = vmatmul.msk.f32.gmra.mxu3 %vm2164_vm12, %v3798_v8  ;;  %v3568_v47 = vsel %vm549_vm1, %v7996_v32, %v9557_v6  ;;  %v9570_v6 = vld [vmem:[#allocation52_spill] sm:$0xff] }
 0x796   : > { %v3952_v58 = vpop.f32.mrf.mxu2 }
 0x797   : > { %v3953_v10 = vadd.f32 %v8294_v19, %v3952_v58  ;;  %3414 = vrot.lane.b32.xlu1 %v3351_v25, %s4392_s21  ;;  %3398 = vrot.lane.b32.xlu0 %v9548_v35, %s4392_s21  ;;  %v9559_v25 = vld [vmem:[#allocation186_spill] sm:$0xff] }
 0x799   : > { %v4034_v54 = vmax.f32 %v3953_v10, 0.0  ;;  %v3303_v52 = vpop.permute.xlu1 %3302  ;;  %v3287_v18 = vpop.permute.xlu0 %3286  ;;  %v9560_v10 = vld [vmem:[#allocation45_spill] sm:$0xff] }
 0x79a   : > { %v3727_v55 = vsel %vm2053_vm11, %v3695_v21, %v3287_v18  ;;  %v3735_v63 = vsel %vm2053_vm11, %v3703_v37, %v3303_v52  ;;  %v3193_v15 = vpop.permute.xlu2 %3192  ;;  %v3600_v35 = vsel %vm1921_vm7, %v3568_v47, %v9560_v10  ;;  %v9564_v52 = vld [vmem:[#allocation136_spill] sm:$0xff] }
 0x79b   : > { %4066 = vst.msk [vmem:[%s8314_s18 + $0x38] sm:$0xff] %vm549_vm1, %v4034_v54  ;;  %v3759_v45 = vsel %vm2086_vm10, %v3727_v55, %v8404_v30  ;;  %v3632_v7 = vsel %vm1954_vm6, %v3600_v35, %v9561_v61  ;;  %v9563_v54 = vld [vmem:[#allocation83_spill] sm:$0xff] }
 0x79c   : > { %v3664_v32 = vsel %vm1987_vm8, %v3632_v7, %v9563_v54 }
 0x79f   : > { %3515 = vrot.lane.b32.xlu0 %v3452_v2, %s4393_s22  ;;  %v3955_v16 = vpop.f32.mrf.mxu2 }
 0x7a0   : > { %v3956_v26 = vadd.f32 %v8294_v19, %v3955_v16  ;;  %v9565_v16 = vld [vmem:[#allocation73_spill] sm:$0xff] }
 0x7a1   : > { %v3490_v59 = vpop.permute.xlu1 %3489  ;;  %v3405_v36 = vpop.permute.xlu0 %3404 }
 0x7a2   : > { %v4035_v5 = vmax.f32 %v3956_v26, 0.0  ;;  %v3767_v23 = vsel %vm2086_vm10, %v3735_v63, %v3405_v36  ;;  %v3791_v14 = vsel %vm339_vm0, %v3759_v45, %v3490_v59  ;;  %v3307_v60 = vpop.permute.xlu2 %3306  ;;  %v9566_v26 = vld [vmem:[#allocation126_spill] sm:$0xff]  ;;  %v9567_v59 = vld [vmem:[#allocation55_spill] sm:$0xff]  ;;  %v9568_v45 = vld [vmem:[#allocation124_spill] sm:$0xff] }
 0x7a3   : > { %4251 = vmatmul.msk.f32.gmra.mxu2 %vm2164_vm12, %v3791_v14  ;;  %v3799_v44 = vsel %vm339_vm0, %v3767_v23, %v8433_v39  ;;  %v3576_v39 = vsel %vm549_vm1, %v4373_v56, %v9558_v17 }
 0x7a4   : > { %4067 = vst.msk [vmem:[%s8314_s18 + $0x40] sm:$0xff] %vm549_vm1, %v4035_v5  ;;  %4259 = vmatmul.msk.f32.gmra.mxu3 %vm2164_vm12, %v3799_v44  ;;  %v3608_v58 = vsel %vm1921_vm7, %v3576_v39, %v9559_v25  ;;  %v4375_v44 = vld [vmem:[#allocation3 + $0x150] sm:$0xff]  ;;  %v9571_v39 = vld [vmem:[#allocation35_spill] sm:$0xff] }
 0x7a5   : > { %v3640_v43 = vsel %vm1954_vm6, %v3608_v58, %v9562_v49  ;;  %v9572_v25 = vld [vmem:[#allocation51_spill] sm:$0xff] }
 0x7a6   : > { %v3672_v56 = vsel %vm1987_vm8, %v3640_v43, %v9564_v52 }
 0x7a8   : > { %v3958_v51 = vpop.f32.mrf.mxu2 }
 0x7a9   : > { %v3959_v3 = vadd.f32 %v8294_v19, %v3958_v51  ;;  %v3207_v27 = vpop.permute.xlu1 %3206  ;;  %v3191_v30 = vpop.permute.xlu0 %3190  ;;  %v9569_v51 = vld [vmem:[#allocation166_spill] sm:$0xff] }
 0x7aa   : > { %v3704_v18 = vsel %vm2020_vm9, %v3672_v56, %v3207_v27  ;;  %v3696_v48 = vsel %vm2020_vm9, %v3664_v32, %v3191_v30  ;;  %v3494_v13 = vpop.permute.xlu2 %3493 }
 0x7ab   : > { %v4036_v29 = vmax.f32 %v3959_v3, 0.0  ;;  %v3728_v28 = vsel %vm2053_vm11, %v3696_v48, %v8463_v0 }
 0x7ad   : > { %4068 = vst.msk [vmem:[%s8314_s18 + $0x48] sm:$0xff] %vm549_vm1, %v4036_v29 }
 0x7b1   : > { %v3391_v62 = vpop.permute.xlu1 %3390  ;;  %v3305_v8 = vpop.permute.xlu0 %3304 }
 0x7b2   : > { %v3736_v46 = vsel %vm2053_vm11, %v3704_v18, %v3305_v8  ;;  %v3760_v4 = vsel %vm2086_vm10, %v3728_v28, %v3391_v62  ;;  %v3211_v37 = vpop.permute.xlu2 %3210  ;;  %v9573_v18 = vld [vmem:[#allocation178_spill] sm:$0xff] }
 0x7b3   : > { %v3768_v53 = vsel %vm2086_vm10, %v3736_v46, %v3407_v1  ;;  %v3569_v1 = vsel %vm549_vm1, %v8000_v11, %v9565_v16  ;;  %v3577_v11 = vsel %vm549_vm1, %v4375_v44, %v9569_v51  ;;  %v3570_v48 = vsel %vm549_vm1, %v8094_v34, %v9573_v18 }
 0x7b4   : > { %v3601_v63 = vsel %vm1921_vm7, %v3569_v1, %v9566_v26  ;;  %v3609_v47 = vsel %vm1921_vm7, %v3577_v11, %v9570_v6 }
 0x7b5   : > { %v3633_v36 = vsel %vm1954_vm6, %v3601_v63, %v9567_v59 }
 0x7b6   : > { %v3961_v20 = vpop.f32.mrf.mxu2  ;;  %v3665_v5 = vsel %vm1987_vm8, %v3633_v36, %v9568_v45 }
 0x7b7   : > { %v3962_v12 = vadd.f32 %v8294_v19, %v3961_v20  ;;  %v3697_v23 = vsel %vm2020_vm9, %v3665_v5, %v3193_v15  ;;  %v3641_v15 = vsel %vm1954_vm6, %v3609_v47, %v9571_v39  ;;  %v9582_v47 = vld [vmem:[#allocation118_spill] sm:$0xff] }
 0x7b8   : > { %v3673_v58 = vsel %vm1987_vm8, %v3641_v15, %v9572_v25  ;;  %v9584_v25 = vld [vmem:[#allocation180_spill] sm:$0xff] }
 0x7b9   : > { %v4037_v40 = vmax.f32 %v3962_v12, 0.0  ;;  %v3508_v22 = vpop.permute.xlu1 %3507  ;;  %v3492_v2 = vpop.permute.xlu0 %3491 }
 0x7ba   : > { %v3792_v21 = vsel %vm339_vm0, %v3760_v4, %v3492_v2  ;;  %v3800_v33 = vsel %vm339_vm0, %v3768_v53, %v3508_v22  ;;  %v3395_v35 = vpop.permute.xlu2 %3394  ;;  %v9575_v4 = vld [vmem:[#allocation129_spill] sm:$0xff] }
 0x7bb   : > { %4069 = vst.msk [vmem:[%s8314_s18 + $0x50] sm:$0xff] %vm549_vm1, %v4037_v40  ;;  %4252 = vmatmul.msk.f32.gmra.mxu2 %vm2164_vm12, %v3792_v21  ;;  %4260 = vmatmul.msk.f32.gmra.mxu3 %vm2164_vm12, %v3800_v33  ;;  %v9576_v22 = vld [vmem:[#allocation29_spill] sm:$0xff]  ;;  %v9578_v21 = vld [vmem:[#allocation30_spill] sm:$0xff] }
 0x7bc   : > { %v3578_v2 = vsel %vm549_vm1, %v8072_v9, %v9576_v22  ;;  %v9577_v53 = vld [vmem:[#allocation145_spill] sm:$0xff] }
 0x7bd   : > { %v3610_v34 = vsel %vm1921_vm7, %v3578_v2, %v9578_v21 }
 0x7bf   : > { %v3964_v0 = vpop.f32.mrf.mxu2 }
 0x7c0   : > { %v3965_v31 = vadd.f32 %v8294_v19, %v3964_v0  ;;  %v9579_v0 = vld [vmem:[#allocation13_spill] sm:$0xff] }
 0x7c1   : > { %v3291_v55 = vpop.permute.xlu1 %3290  ;;  %v3209_v57 = vpop.permute.xlu0 %3208 }
 0x7c2   : > { %v4038_v38 = vmax.f32 %v3965_v31, 0.0  ;;  %v3729_v3 = vsel %vm2053_vm11, %v3697_v23, %v3291_v55  ;;  %v3705_v10 = vsel %vm2020_vm9, %v3673_v58, %v3209_v57  ;;  %v3512_v56 = vpop.permute.xlu2 %3511  ;;  %v3642_v31 = vsel %vm1954_vm6, %v3610_v34, %v9579_v0  ;;  %v9580_v57 = vld [vmem:[#allocation104_spill] sm:$0xff] }
 0x7c3   : > { %v3737_v61 = vsel %vm2053_vm11, %v3705_v10, %v3307_v60  ;;  %v9574_v60 = vld [vmem:[#allocation107_spill] sm:$0xff]  ;;  %v9585_v10 = vld [vmem:[#allocation120_spill] sm:$0xff] }
 0x7c4   : > { %4070 = vst.msk [vmem:[%s8314_s18 + $0x58] sm:$0xff] %vm549_vm1, %v4038_v38  ;;  %v3602_v28 = vsel %vm1921_vm7, %v3570_v48, %v9574_v60  ;;  %v3674_v38 = vsel %vm1987_vm8, %v3642_v31, %v9580_v57 }
 0x7c5   : > { %v3634_v40 = vsel %vm1954_vm6, %v3602_v28, %v9575_v4  ;;  %v3706_v9 = vsel %vm2020_vm9, %v3674_v38, %v3211_v37  ;;  %v9591_v38 = vld [vmem:[#allocation79_spill] sm:$0xff] }
 0x7c8   : > { %v3967_v14 = vpop.f32.mrf.mxu2 }
 0x7c9   : > { %v3968_v27 = vadd.f32 %v8294_v19, %v3967_v14  ;;  %v3409_v30 = vpop.permute.xlu1 %3408  ;;  %v3393_v29 = vpop.permute.xlu0 %3392 }
 0x7ca   : > { %v3761_v17 = vsel %vm2086_vm10, %v3729_v3, %v3393_v29  ;;  %v3769_v7 = vsel %vm2086_vm10, %v3737_v61, %v3409_v30  ;;  %v3295_v45 = vpop.permute.xlu2 %3294  ;;  %v9581_v29 = vld [vmem:[#allocation181_spill] sm:$0xff]  ;;  %v9586_v61 = vld [vmem:[#allocation176_spill] sm:$0xff] }
 0x7cb   : > { %v4039_v62 = vmax.f32 %v3968_v27, 0.0  ;;  %v3793_v8 = vsel %vm339_vm0, %v3761_v17, %v3494_v13  ;;  %v3666_v13 = vsel %vm1987_vm8, %v3634_v40, %v9577_v53  ;;  %v3571_v6 = vsel %vm549_vm1, %v8159_v50, %v9581_v29 }
 0x7cc   : > { %4253 = vmatmul.msk.f32.gmra.mxu2 %vm2164_vm12, %v3793_v8  ;;  %v3579_v17 = vsel %vm549_vm1, %v8155_v41, %v9582_v47  ;;  %v3603_v58 = vsel %vm1921_vm7, %v3571_v6, %v9584_v25 }
 0x7cd   : > { %4071 = vst.msk [vmem:[%s8314_s18 + $0x60] sm:$0xff] %vm549_vm1, %v4039_v62  ;;  %v9583_v62 = vld [vmem:[#allocation114_spill] sm:$0xff] }
 0x7ce   : > { %v3611_v8 = vsel %vm1921_vm7, %v3579_v17, %v9583_v62 }
 0x7d1   : > { %v3195_v49 = vpop.permute.xlu1 %3194  ;;  %v3510_v43 = vpop.permute.xlu0 %3509 }
 0x7d2   : > { %v3801_v54 = vsel %vm339_vm0, %v3769_v7, %v3510_v43  ;;  %v3698_v33 = vsel %vm2020_vm9, %v3666_v13, %v3195_v49  ;;  %v3413_v30 = vpop.permute.xlu2 %3412  ;;  %v3643_v7 = vsel %vm1954_vm6, %v3611_v8, %v9586_v61  ;;  %v9587_v49 = vld [vmem:[#allocation147_spill] sm:$0xff]  ;;  %v9588_v43 = vld [vmem:[#allocation154_spill] sm:$0xff] }
 0x7d3   : > { %4261 = vmatmul.msk.f32.gmra.mxu3 %vm2164_vm12, %v3801_v54  ;;  %v3675_v41 = vsel %vm1987_vm8, %v3643_v7, %v9588_v43 }
 0x7d6   : > { %v3970_v32 = vpop.f32.mrf.mxu2 }
 0x7d7   : > { %v3971_v52 = vadd.f32 %v8294_v19, %v3970_v32 }
 0x7d9   : > { %v4040_v46 = vmax.f32 %v3971_v52, 0.0  ;;  %v3309_v20 = vpop.permute.xlu1 %3308  ;;  %v3293_v12 = vpop.permute.xlu0 %3292 }
 0x7da   : > { %v3730_v55 = vsel %vm2053_vm11, %v3698_v33, %v3293_v12  ;;  %v3738_v26 = vsel %vm2053_vm11, %v3706_v9, %v3309_v20  ;;  %v3199_v52 = vpop.permute.xlu2 %3198  ;;  %v9589_v33 = vld [vmem:[#allocation98_spill] sm:$0xff]  ;;  %v9592_v9 = vld [vmem:[#allocation139_spill] sm:$0xff] }
 0x7db   : > { %4072 = vst.msk [vmem:[%s8314_s18 + $0x68] sm:$0xff] %vm549_vm1, %v4040_v46  ;;  %v3762_v36 = vsel %vm2086_vm10, %v3730_v55, %v3395_v35  ;;  %v3635_v35 = vsel %vm1954_vm6, %v3603_v58, %v9585_v10  ;;  %v3572_v0 = vsel %vm549_vm1, %v8179_v24, %v9589_v33  ;;  %v9590_v55 = vld [vmem:[#allocation64_spill] sm:$0xff] }
 0x7dc   : > { %v3667_v50 = vsel %vm1987_vm8, %v3635_v35, %v9587_v49  ;;  %v3604_v57 = vsel %vm1921_vm7, %v3572_v0, %v9590_v55 }
 0x7df   : > { %v3973_v16 = vpop.f32.mrf.mxu2 }
 0x7e0   : > { %v3974_v1 = vadd.f32 %v8294_v19, %v3973_v16  ;;  %v3636_v16 = vsel %vm1954_vm6, %v3604_v57, %v9591_v38 }
 0x7e1   : > { %v3496_v63 = vpop.permute.xlu1 %3495  ;;  %v3411_v59 = vpop.permute.xlu0 %3410 }
 0x7e2   : > { %v4041_v5 = vmax.f32 %v3974_v1, 0.0  ;;  %v3770_v23 = vsel %vm2086_vm10, %v3738_v26, %v3411_v59  ;;  %v3794_v14 = vsel %vm339_vm0, %v3762_v36, %v3496_v63  ;;  %v3313_v53 = vpop.permute.xlu2 %3312  ;;  %v3668_v1 = vsel %vm1987_vm8, %v3636_v16, %v9592_v9  ;;  %v9593_v63 = vld [vmem:[#allocation106_spill] sm:$0xff] }
 0x7e3   : > { %4254 = vmatmul.msk.f32.gmra.mxu2 %vm2164_vm12, %v3794_v14  ;;  %v3802_v44 = vsel %vm339_vm0, %v3770_v23, %v3512_v56  ;;  %v3700_v26 = vsel %vm2020_vm9, %v3668_v1, %v3199_v52  ;;  %v3580_v59 = vsel %vm549_vm1, %v8220_v42, %v9593_v63 }
 0x7e4   : > { %4073 = vst.msk [vmem:[%s8314_s18 + $0x70] sm:$0xff] %vm549_vm1, %v4041_v5  ;;  %4262 = vmatmul.msk.f32.gmra.mxu3 %vm2164_vm12, %v3802_v44  ;;  %v9595_v44 = vld [vmem:[#allocation121_spill] sm:$0xff] }
 0x7e8   : > { %v3976_v37 = vpop.f32.mrf.mxu2 }
 0x7e9   : > { %v3977_v51 = vadd.f32 %v8294_v19, %v3976_v37  ;;  %v3213_v11 = vpop.permute.xlu1 %3212  ;;  %v3197_v3 = vpop.permute.xlu0 %3196 }
 0x7ea   : > { %v3707_v54 = vsel %vm2020_vm9, %v3675_v41, %v3213_v11  ;;  %v3699_v32 = vsel %vm2020_vm9, %v3667_v50, %v3197_v3  ;;  %v3500_v23 = vpop.permute.xlu2 %3499  ;;  %v9596_v11 = vld [vmem:[#allocation146_spill] sm:$0xff] }
 0x7eb   : > { %v4042_v27 = vmax.f32 %v3977_v51, 0.0  ;;  %v3731_v18 = vsel %vm2053_vm11, %v3699_v32, %v3295_v45  ;;  %v9594_v45 = vld [vmem:[#allocation117_spill] sm:$0xff] }
 0x7ec   : > { %v3612_v5 = vsel %vm1921_vm7, %v3580_v59, %v9594_v45 }
 0x7ed   : > { %4074 = vst.msk [vmem:[%s8314_s18 + $0x78] sm:$0xff] %vm549_vm1, %v4042_v27  ;;  %v3644_v37 = vsel %vm1954_vm6, %v3612_v5, %v9595_v44 }
 0x7ee   : > { %v3676_v3 = vsel %vm1987_vm8, %v3644_v37, %v9596_v11 }
 0x7f1   : > { %v3397_v39 = vpop.permute.xlu1 %3396  ;;  %v3311_v15 = vpop.permute.xlu0 %3310 }
 0x7f2   : > { %v3739_v56 = vsel %vm2053_vm11, %v3707_v54, %v3311_v15  ;;  %v3763_v48 = vsel %vm2086_vm10, %v3731_v18, %v3397_v39 }
 0x7f3   : > { %v3771_v12 = vsel %vm2086_vm10, %v3739_v56, %v3413_v30 }
 0x7f9   : > { %v3514_v46 = vpop.permute.xlu1 %3513  ;;  %v3498_v20 = vpop.permute.xlu0 %3497 }
 0x7fa   : > { %v3795_v60 = vsel %vm339_vm0, %v3763_v48, %v3498_v20  ;;  %v3803_v28 = vsel %vm339_vm0, %v3771_v12, %v3514_v46 }
 0x7fb   : > { %4255 = vmatmul.msk.f32.gmra.mxu2 %vm2164_vm12, %v3795_v60  ;;  %4263 = vmatmul.msk.f32.gmra.mxu3 %vm2164_vm12, %v3803_v28 }
 0x7fe   : > { %v3979_v4 = vpop.f32.mrf.mxu2  ;;  %v4003_v40 = vpop.f32.mrf.mxu3 }
 0x7ff   : > { %v3980_v22 = vadd.f32 %v8294_v19, %v3979_v4  ;;  %v4004_v2 = vadd.f32 %v8294_v19, %v4003_v40 }
 0x801   : > { %v4043_v13 = vmax.f32 %v3980_v22, 0.0  ;;  %v4051_v21 = vmax.f32 %v4004_v2, 0.0  ;;  %v3215_v34 = vpop.permute.xlu0 %3214  ;;  %v3297_v31 = vpop.permute.xlu1 %3296 }
 0x802   : > { %v3732_v24 = vsel %vm2053_vm11, %v3700_v26, %v3297_v31  ;;  %v3708_v42 = vsel %vm2020_vm9, %v3676_v3, %v3215_v34 }
 0x803   : > { %4075 = vst.msk [vmem:[%s8314_s18 + $0x80] sm:$0xff] %vm549_vm1, %v4043_v13  ;;  %v3740_v29 = vsel %vm2053_vm11, %v3708_v42, %v3313_v53 }
 0x804   : > { %4083 = vst.msk [vmem:[%s8314_s18 + $0xc0] sm:$0xff] %vm549_vm1, %v4051_v21 }
 0x809   : > { %v3399_v36 = vpop.permute.xlu0 %3398  ;;  %v3415_v27 = vpop.permute.xlu1 %3414 }
 0x80a   : > { %v3764_v14 = vsel %vm2086_vm10, %v3732_v24, %v3399_v36  ;;  %v3772_v47 = vsel %vm2086_vm10, %v3740_v29, %v3415_v27 }
 0x80b   : > { %v3796_v51 = vsel %vm339_vm0, %v3764_v14, %v3500_v23 }
 0x80c   : > { %4256 = vmatmul.msk.f32.gmra.mxu2 %vm2164_vm12, %v3796_v51 }
 0x80f   : > { %v3982_v30 = vpop.f32.mrf.mxu2 }
 0x810   : > { %v3983_v6 = vadd.f32 %v8294_v19, %v3982_v30 }
 0x811   : > { %v3516_v17 = vpop.permute.xlu0 %3515 }
 0x812   : > { %v4044_v39 = vmax.f32 %v3983_v6, 0.0  ;;  %v3804_v15 = vsel %vm339_vm0, %v3772_v47, %v3516_v17 }
 0x813   : > { %4264 = vmatmul.msk.f32.gmra.mxu3 %vm2164_vm12, %v3804_v15 }
 0x814   : > { %4076 = vst.msk [vmem:[%s8314_s18 + $0x88] sm:$0xff] %vm549_vm1, %v4044_v39 }
 0x816   : > { %v4006_v62 = vpop.f32.mrf.mxu3 }
 0x817   : > { %v4007_v8 = vadd.f32 %v8294_v19, %v4006_v62 }
 0x819   : > { %v4052_v25 = vmax.f32 %v4007_v8, 0.0 }
 0x81b   : > { %4084 = vst.msk [vmem:[%s8314_s18 + $0xc8] sm:$0xff] %vm549_vm1, %v4052_v25 }
 0x826   : > { %v3985_v58 = vpop.f32.mrf.mxu2 }
 0x827   : > { %v3986_v10 = vadd.f32 %v8294_v19, %v3985_v58  ;;  %v4009_v35 = vpop.f32.mrf.mxu3 }
 0x828   : > { %v4010_v61 = vadd.f32 %v8294_v19, %v4009_v35 }
 0x829   : > { %v4045_v7 = vmax.f32 %v3986_v10, 0.0 }
 0x82a   : > { %v4053_v49 = vmax.f32 %v4010_v61, 0.0 }
 0x82b   : > { %4077 = vst.msk [vmem:[%s8314_s18 + $0x90] sm:$0xff] %vm549_vm1, %v4045_v7 }
 0x82c   : > { %4085 = vst.msk [vmem:[%s8314_s18 + $0xd0] sm:$0xff] %vm549_vm1, %v4053_v49 }
 0x83e   : > { %v3988_v50 = vpop.f32.mrf.mxu2  ;;  %v4012_v43 = vpop.f32.mrf.mxu3 }
 0x83f   : > { %v3989_v41 = vadd.f32 %v8294_v19, %v3988_v50  ;;  %v4013_v54 = vadd.f32 %v8294_v19, %v4012_v43 }
 0x841   : > { %v4046_v32 = vmax.f32 %v3989_v41, 0.0  ;;  %v4054_v52 = vmax.f32 %v4013_v54, 0.0 }
 0x843   : > { %4078 = vst.msk [vmem:[%s8314_s18 + $0x98] sm:$0xff] %vm549_vm1, %v4046_v32 }
 0x844   : > { %4086 = vst.msk [vmem:[%s8314_s18 + $0xd8] sm:$0xff] %vm549_vm1, %v4054_v52 }
 0x84f   : > { %v3991_v56 = vpop.f32.mrf.mxu2 }
 0x850   : > { %v3992_v18 = vadd.f32 %v8294_v19, %v3991_v56 }
 0x852   : > { %v4047_v48 = vmax.f32 %v3992_v18, 0.0 }
 0x854   : > { %4079 = vst.msk [vmem:[%s8314_s18 + $0xa0] sm:$0xff] %vm549_vm1, %v4047_v48 }
 0x856   : > { %v4015_v46 = vpop.f32.mrf.mxu3 }
 0x857   : > { %v4016_v20 = vadd.f32 %v8294_v19, %v4015_v46 }
 0x859   : > { %v4055_v12 = vmax.f32 %v4016_v20, 0.0 }
 0x85b   : > { %4087 = vst.msk [vmem:[%s8314_s18 + $0xe0] sm:$0xff] %vm549_vm1, %v4055_v12 }
 0x866   : > { %v3994_v60 = vpop.f32.mrf.mxu2 }
 0x867   : > { %v3995_v28 = vadd.f32 %v8294_v19, %v3994_v60  ;;  %v4018_v4 = vpop.f32.mrf.mxu3 }
 0x868   : > { %v4019_v40 = vadd.f32 %v8294_v19, %v4018_v4 }
 0x869   : > { %v4048_v22 = vmax.f32 %v3995_v28, 0.0 }
 0x86a   : > { %v4056_v2 = vmax.f32 %v4019_v40, 0.0 }
 0x86b   : > { %4080 = vst.msk [vmem:[%s8314_s18 + $0xa8] sm:$0xff] %vm549_vm1, %v4048_v22 }
 0x86c   : > { %4088 = vst.msk [vmem:[%s8314_s18 + $0xe8] sm:$0xff] %vm549_vm1, %v4056_v2 }
 0x87e   : > { %v3997_v53 = vpop.f32.mrf.mxu2  ;;  %v4021_v13 = vpop.f32.mrf.mxu3 }
 0x87f   : > { %v3998_v21 = vadd.f32 %v8294_v19, %v3997_v53  ;;  %v4022_v34 = vadd.f32 %v8294_v19, %v4021_v13 }
 0x881   : > { %v4049_v33 = vmax.f32 %v3998_v21, 0.0  ;;  %v4057_v0 = vmax.f32 %v4022_v34, 0.0 }
 0x883   : > { %4081 = vst.msk [vmem:[%s8314_s18 + $0xb0] sm:$0xff] %vm549_vm1, %v4049_v33 }
 0x884   : > { %4089 = vst.msk [vmem:[%s8314_s18 + $0xf0] sm:$0xff] %vm549_vm1, %v4057_v0 }
 0x88f   : > { %v4000_v31 = vpop.f32.mrf.mxu2 }
 0x890   : > { %v4001_v55 = vadd.f32 %v8294_v19, %v4000_v31 }
 0x892   : > { %v4050_v57 = vmax.f32 %v4001_v55, 0.0 }
 0x894   : > { %4082 = vst.msk [vmem:[%s8314_s18 + $0xb8] sm:$0xff] %vm549_vm1, %v4050_v57 }
 0x896   : > { %v4024_v38 = vpop.f32.mrf.mxu3 }
 0x897   : > { %v4025_v16 = vadd.f32 %v8294_v19, %v4024_v38 }
 0x899   : > { %v4058_v9 = vmax.f32 %v4025_v16, 0.0 }
 0x89b   : > { %4090 = vst.msk [vmem:[%s8314_s18 + $0xf8] sm:$0xff] %vm549_vm1, %v4058_v9 }
 0x89c PF: > { %s17_s24 = sadd.s32 1, %s4382_s24  }
 0x89d   : > { %p14_p4 = scmp.ge.s32.totalorder %s17_s24, 4  }
 0x89f   :  { %16 = sbr.rel (!%p14_p4) target bundleno = 1 (0x1), region = 83 }

</bundles_post_ra>
